<compile_context>
chip_gen: v7x
topology: tpu7x:2x2x1
jax: 0.10.0
libtpu: 0.0.40
codegen_flags: <defaults>
</compile_context>

<pallas_src>
import math

import jax
import jax.numpy as jnp
from jax.experimental import pallas as pl
from jax.experimental.pallas import tpu as pltpu

# ----------------------------- configuration -------------------------------
B = 2            # batch
S = 8            # sequence length
D = 32           # output_dim / model_dim
VOCAB = 64       # vocab_size
N_LAYERS = 2     # n_encoder_layers (same count for decoder)
HIDDEN = 64      # hidden_dim of feed-forward
W_QK = 16        # per-head query/key dim
W_V = 16         # per-head value dim
HEADS = 2        # attention heads
HQK = HEADS * W_QK          # 32  (packed q / k width)
HV = HEADS * W_V            # 32  (packed v width)
EPS = 1e-5                  # LayerNorm eps (PyTorch default)
EMB_SCALE = math.sqrt(D)
ATTN_SCALE = 1.0 / math.sqrt(W_QK)
NEG_INF = -1e30

MM_DTYPE = jnp.bfloat16     # MXU operand dtype (accumulation stays f32)


# ------------------------- weight-slab layout (static) -----------------------
# Every parameter lives in one (SLAB_ROWS, 128) f32 slab.  Row offsets are
# multiples of 8 (sublane aligned); columns start at lane 0 (zero padded).

def _build_layout():
    entries = []

    def add(name, rows, cols):
        assert cols <= 128
        entries.append((name, rows, cols))

    add("emb", 2 * VOCAB, D)          # stacked [input_embedding; output_embedding]
    add("pos", S, D)                  # sinusoidal positional encoding
    for l in range(N_LAYERS):
        p = f"enc{l}_"
        add(p + "wqkv", D, 2 * HQK + HV); add(p + "bqkv", 1, 2 * HQK + HV)
        add(p + "wo", HV, D);             add(p + "bo", 1, D)
        add(p + "ln1", 2, D)
        add(p + "w1", D, HIDDEN);         add(p + "b1", 1, HIDDEN)
        add(p + "w2", HIDDEN, D);         add(p + "b2", 1, D)
        add(p + "ln2", 2, D)
    for l in range(N_LAYERS):
        p = f"dec{l}_"
        add(p + "sa_wqkv", D, 2 * HQK + HV); add(p + "sa_bqkv", 1, 2 * HQK + HV)
        add(p + "sa_wo", HV, D);             add(p + "sa_bo", 1, D)
        add(p + "ln1", 2, D)
        add(p + "ca_wq", D, HQK);            add(p + "ca_bq", 1, HQK)
        add(p + "ca_wkv", D, HQK + HV);      add(p + "ca_bkv", 1, HQK + HV)
        add(p + "ca_wo", HV, D);             add(p + "ca_bo", 1, D)
        add(p + "ln2", 2, D)
        add(p + "w1", D, HIDDEN);            add(p + "b1", 1, HIDDEN)
        add(p + "w2", HIDDEN, D);            add(p + "b2", 1, D)
        add(p + "ln3", 2, D)
    add("fin_w", D, VOCAB); add("fin_b", 1, VOCAB)

    offsets, row = {}, 0
    for name, r, c in entries:
        offsets[name] = (row, r, c)
        row += -(-r // 8) * 8          # pad each entry to a multiple of 8 rows
    return offsets, row


_OFFSETS, SLAB_ROWS = _build_layout()
SLAB_COLS = 128


# --------------------------- in-kernel math helpers ---------------------------

def _dot(a, b):
    """MXU matmul with bf16 operands, f32 accumulation."""
    return jnp.dot(a.astype(MM_DTYPE), b.astype(MM_DTYPE),
                   preferred_element_type=jnp.float32)


# ------------------------------ fused kernel --------------------------------

def _transformer_kernel(ids_in_ref, ids_out_ref, slab_ref, o_ref):
    def wp(name):
        off, r, c = _OFFSETS[name]
        return slab_ref[off:off + r, 0:c]

    def add_ln(x, res, name):
        """Post-LN residual block: LayerNorm(x + res) * gamma + beta (f32)."""
        gb = wp(name)                                       # (2, D)
        y = x + res
        mu = jnp.mean(y, axis=-1, keepdims=True)
        var = jnp.mean(jnp.square(y - mu), axis=-1, keepdims=True)
        yn = (y - mu) * jax.lax.rsqrt(var + EPS)
        return yn * gb[0:1, :] + gb[1:2, :]

    def mha(q, k, v, mask):
        """Multi-head attention on batch-folded rows.

        q, k: (B*S, HQK) lane-packed per head; v: (B*S, HV).  Attention runs
        per (batch, head) on 8x8 tiles; head outputs are lane-concatenated so
        a SINGLE output projection per block follows (done by the caller).
        """
        per_batch = []
        for b in range(B):
            r0 = b * S
            heads = []
            for h in range(HEADS):
                qh = q[r0:r0 + S, h * W_QK:(h + 1) * W_QK]
                kh = k[r0:r0 + S, h * W_QK:(h + 1) * W_QK]
                vh = v[r0:r0 + S, h * W_V:(h + 1) * W_V]
                s = jax.lax.dot_general(
                    qh.astype(MM_DTYPE), kh.astype(MM_DTYPE),
                    (((1,), (1,)), ((), ())),
                    preferred_element_type=jnp.float32) * ATTN_SCALE
                if mask is not None:
                    s = jnp.where(mask, s, NEG_INF)
                m = jnp.max(s, axis=-1, keepdims=True)
                p = jnp.exp(s - m)                                   # f32 softmax
                p = p * pl.reciprocal(jnp.sum(p, axis=-1, keepdims=True),
                                      approx=True)
                heads.append(_dot(p, vh))                            # (S, W_V)
            per_batch.append(jnp.concatenate(heads, axis=-1))        # (S, HV)
        return jnp.concatenate(per_batch, axis=0)                    # (B*S, HV)

    def self_attn(x, p, mask):
        qkv = _dot(x, wp(p + "wqkv")) + wp(p + "bqkv")               # (B*S, 96)
        a = mha(qkv[:, 0:HQK], qkv[:, HQK:2 * HQK],
                qkv[:, 2 * HQK:2 * HQK + HV], mask)
        return _dot(a, wp(p + "wo")) + wp(p + "bo")                  # single out-proj

    def cross_attn(y, enc, p):
        q = _dot(y, wp(p + "ca_wq")) + wp(p + "ca_bq")
        kv = _dot(enc, wp(p + "ca_wkv")) + wp(p + "ca_bkv")
        a = mha(q, kv[:, 0:HQK], kv[:, HQK:HQK + HV], None)
        return _dot(a, wp(p + "ca_wo")) + wp(p + "ca_bo")

    def ffn(x, p):
        h = jnp.maximum(_dot(x, wp(p + "w1")) + wp(p + "b1"), 0.0)
        return _dot(h, wp(p + "w2")) + wp(p + "b2")

    # --------- embeddings: one-hot MXU gather of both streams at once ---------
    ids = jnp.concatenate(
        [ids_in_ref[...], ids_out_ref[...] + VOCAB], axis=0)        # (2*B*S, 1)
    onehot = (ids == jax.lax.broadcasted_iota(
        jnp.int32, (2 * B * S, 2 * VOCAB), 1)).astype(jnp.float32)  # (32, 128)
    emb = jnp.dot(onehot, wp("emb"),
                  preferred_element_type=jnp.float32)               # exact, f32

    pos = wp("pos")                                                  # (S, D)
    pos_bs = jnp.concatenate([pos] * B, axis=0)                      # (B*S, D)

    x = emb[0:B * S, :] * EMB_SCALE + pos_bs                         # encoder stream
    y = emb[B * S:2 * B * S, :] * EMB_SCALE + pos_bs                 # decoder stream

    # TODO(synk): dropout layers omitted (eval semantics -> identity).

    # ------------------------------- encoder -------------------------------
    for l in range(N_LAYERS):
        p = f"enc{l}_"
        x = add_ln(x, self_attn(x, p, None), p + "ln1")
        x = add_ln(x, ffn(x, p), p + "ln2")
    enc_out = x

    # causal mask built once, reused by every decoder self-attention layer
    qi = jax.lax.broadcasted_iota(jnp.int32, (S, S), 0)
    ki = jax.lax.broadcasted_iota(jnp.int32, (S, S), 1)
    causal = ki <= qi

    # ------------------------------- decoder -------------------------------
    for l in range(N_LAYERS):
        p = f"dec{l}_"
        y = add_ln(y, self_attn(y, p + "sa_", causal), p + "ln1")
        y = add_ln(y, cross_attn(y, enc_out, p), p + "ln2")
        y = add_ln(y, ffn(y, p), p + "ln3")

    logits = _dot(y, wp("fin_w")) + wp("fin_b")                      # (B*S, VOCAB)
    o_ref[...] = logits.astype(o_ref.dtype)


# ------------------------------ full forward --------------------------------

@jax.jit
def transformer_forward(params, x_input, x_output):
    ids_in = x_input.reshape(B * S, 1).astype(jnp.int32)    # free bitcast reshape
    ids_out = x_output.reshape(B * S, 1).astype(jnp.int32)

    vmem = pl.BlockSpec(memory_space=pltpu.MemorySpace.VMEM)
    logits = pl.pallas_call(
        _transformer_kernel,
        out_shape=jax.ShapeDtypeStruct((B * S, VOCAB), jnp.float32),
        in_specs=[vmem, vmem, vmem],
        out_specs=pl.BlockSpec(memory_space=pltpu.MemorySpace.VMEM),
    )(ids_in, ids_out, params["slab"])
    return logits.reshape(B, S, VOCAB)                       # free bitcast reshape


# --------------------------- deterministic params ----------------------------

def sinusoidal_pos_enc(seq, dim):
    pos = jnp.arange(seq, dtype=jnp.float32)[:, None]
    i = jnp.arange(dim // 2, dtype=jnp.float32)[None, :]
    angle = pos / jnp.power(10000.0, 2.0 * i / dim)
    pe = jnp.zeros((seq, dim), jnp.float32)
    pe = pe.at[:, 0::2].set(jnp.sin(angle))
    pe = pe.at[:, 1::2].set(jnp.cos(angle))
    return pe


def init_params(key):
    """Create all parameters and pack them into a single (SLAB_ROWS, 128) slab."""
    kiter = iter(jax.random.split(key, 64))

    def rnd(shape):
        return jax.random.normal(next(kiter), shape, jnp.float32) * 0.02

    def zeros(shape):
        return jnp.zeros(shape, jnp.float32)

    def ln():
        return jnp.stack([jnp.ones((D,), jnp.float32),
                          jnp.zeros((D,), jnp.float32)], axis=0)    # (2, D)

    vals = {}
    vals["emb"] = rnd((2 * VOCAB, D))          # rows 0..V-1: in_emb, V..2V-1: out_emb
    vals["pos"] = sinusoidal_pos_enc(S, D)
    for l in range(N_LAYERS):
        p = f"enc{l}_"
        vals[p + "wqkv"] = rnd((D, 2 * HQK + HV)); vals[p + "bqkv"] = zeros((1, 2 * HQK + HV))
        vals[p + "wo"] = rnd((HV, D));             vals[p + "bo"] = zeros((1, D))
        vals[p + "ln1"] = ln()
        vals[p + "w1"] = rnd((D, HIDDEN));         vals[p + "b1"] = zeros((1, HIDDEN))
        vals[p + "w2"] = rnd((HIDDEN, D));         vals[p + "b2"] = zeros((1, D))
        vals[p + "ln2"] = ln()
    for l in range(N_LAYERS):
        p = f"dec{l}_"
        vals[p + "sa_wqkv"] = rnd((D, 2 * HQK + HV)); vals[p + "sa_bqkv"] = zeros((1, 2 * HQK + HV))
        vals[p + "sa_wo"] = rnd((HV, D));             vals[p + "sa_bo"] = zeros((1, D))
        vals[p + "ln1"] = ln()
        vals[p + "ca_wq"] = rnd((D, HQK));            vals[p + "ca_bq"] = zeros((1, HQK))
        vals[p + "ca_wkv"] = rnd((D, HQK + HV));      vals[p + "ca_bkv"] = zeros((1, HQK + HV))
        vals[p + "ca_wo"] = rnd((HV, D));             vals[p + "ca_bo"] = zeros((1, D))
        vals[p + "ln2"] = ln()
        vals[p + "w1"] = rnd((D, HIDDEN));            vals[p + "b1"] = zeros((1, HIDDEN))
        vals[p + "w2"] = rnd((HIDDEN, D));            vals[p + "b2"] = zeros((1, D))
        vals[p + "ln3"] = ln()
    vals["fin_w"] = rnd((D, VOCAB)); vals["fin_b"] = zeros((1, VOCAB))

    slab = jnp.zeros((SLAB_ROWS, SLAB_COLS), jnp.float32)
    for name, (off, r, c) in _OFFSETS.items():
        arr = vals[name]
        assert arr.shape == (r, c), (name, arr.shape, (r, c))
        slab = slab.at[off:off + r, 0:c].set(arr)
    return {"slab": slab}


# ---------------------------------- main -------------------------------------

if __name__ == "__main__":
    key = jax.random.PRNGKey(0)
    kp, ki, ko = jax.random.split(key, 3)

    params = init_params(kp)

    x_input = jax.random.randint(ki, (B, S), 0, VOCAB, dtype=jnp.int32)
    x_output = jax.random.randint(ko, (B, S), 0, VOCAB, dtype=jnp.int32)

    logits = transformer_forward(params, x_input, x_output)
    logits = jax.block_until_ready(logits)

    assert logits.shape == (B, S, VOCAB)
    assert logits.dtype == jnp.float32
    assert bool(jnp.all(jnp.isfinite(logits)))
    print("KERNEL_OK")
</pallas_src>

<mosaic_0001>
module attributes {stable_mosaic.version = 11 : i64} {
  func.func @_transformer_kernel(%arg0: memref<16x1xi32, #tpu.memory_space<vmem>>, %arg1: memref<16x1xi32, #tpu.memory_space<vmem>>, %arg2: memref<1264x128xf32, #tpu.memory_space<vmem>>, %arg3: memref<16x64xf32, #tpu.memory_space<vmem>>) attributes {dimension_semantics = [], scalar_prefetch = 0 : i64, scratch_operands = 0 : i64, tpu.core_type = #tpu.core_type<tc>} {
    %c0 = arith.constant 0 : index
    %c0_0 = arith.constant 0 : index
    %0 = vector.load %arg0[%c0, %c0_0] : memref<16x1xi32, #tpu.memory_space<vmem>>, vector<16x1xi32>
    %c0_1 = arith.constant 0 : index
    %c0_2 = arith.constant 0 : index
    %1 = vector.load %arg1[%c0_1, %c0_2] : memref<16x1xi32, #tpu.memory_space<vmem>>, vector<16x1xi32>
    %c64_i32 = arith.constant 64 : i32
    %2 = vector.broadcast %c64_i32 : i32 to vector<16x1xi32>
    %3 = arith.addi %1, %2 : vector<16x1xi32>
    %4 = tpu.concatenate %0, %3 in 0 : vector<16x1xi32>, vector<16x1xi32> -> vector<32x1xi32>
    %5 = tpu.iota {dimensions = array<i32: 1>} : vector<32x128xi32>
    %6 = vector.broadcast %4 : vector<32x1xi32> to vector<32x128xi32>
    %7 = arith.cmpi eq, %6, %5 : vector<32x128xi32>
    %8 = arith.extui %7 : vector<32x128xi1> to vector<32x128xi32>
    %9 = arith.sitofp %8 : vector<32x128xi32> to vector<32x128xf32>
    %c0_3 = arith.constant 0 : index
    %c0_4 = arith.constant 0 : index
    %10 = vector.load %arg2[%c0_3, %c0_4] : memref<1264x128xf32, #tpu.memory_space<vmem>>, vector<128x32xf32>
    %cst = arith.constant dense<0.000000e+00> : vector<32x32xf32>
    %11 = tpu.matmul %9, %10, %cst {dimension_numbers = #tpu.dot_dimension_numbers<[1], [0], [0], [1], [0, 0, 1, 1], [], []>} : vector<32x128xf32>, vector<128x32xf32>, vector<32x32xf32> -> vector<32x32xf32>
    %c128 = arith.constant 128 : index
    %c0_5 = arith.constant 0 : index
    %12 = vector.load %arg2[%c128, %c0_5] : memref<1264x128xf32, #tpu.memory_space<vmem>>, vector<8x32xf32>
    %13 = tpu.concatenate %12, %12 in 0 : vector<8x32xf32>, vector<8x32xf32> -> vector<16x32xf32>
    %14 = vector.extract_strided_slice %11 {offsets = [0, 0], sizes = [16, 32], strides = [1, 1]} : vector<32x32xf32> to vector<16x32xf32>
    %cst_6 = arith.constant 5.65685415 : f32
    %15 = vector.broadcast %cst_6 : f32 to vector<16x32xf32>
    %16 = arith.mulf %14, %15 : vector<16x32xf32>
    %17 = arith.addf %16, %13 : vector<16x32xf32>
    %18 = vector.extract_strided_slice %11 {offsets = [16, 0], sizes = [16, 32], strides = [1, 1]} : vector<32x32xf32> to vector<16x32xf32>
    %cst_7 = arith.constant 5.65685415 : f32
    %19 = vector.broadcast %cst_7 : f32 to vector<16x32xf32>
    %20 = arith.mulf %18, %19 : vector<16x32xf32>
    %21 = arith.addf %20, %13 : vector<16x32xf32>
    %c136 = arith.constant 136 : index
    %c0_8 = arith.constant 0 : index
    %22 = vector.load %arg2[%c136, %c0_8] : memref<1264x128xf32, #tpu.memory_space<vmem>>, vector<32x96xf32>
    %23 = arith.truncf %17 : vector<16x32xf32> to vector<16x32xbf16>
    %24 = arith.truncf %22 : vector<32x96xf32> to vector<32x96xbf16>
    %cst_9 = arith.constant dense<0.000000e+00> : vector<16x96xf32>
    %25 = tpu.matmul %23, %24, %cst_9 {dimension_numbers = #tpu.dot_dimension_numbers<[1], [0], [0], [1], [0, 0, 1, 1], [], []>} : vector<16x32xbf16>, vector<32x96xbf16>, vector<16x96xf32> -> vector<16x96xf32>
    %c168 = arith.constant 168 : index
    %c0_10 = arith.constant 0 : index
    %26 = vector.load %arg2[%c168, %c0_10] : memref<1264x128xf32, #tpu.memory_space<vmem>>, vector<1x96xf32>
    %27 = vector.broadcast %26 : vector<1x96xf32> to vector<16x96xf32>
    %28 = arith.addf %25, %27 : vector<16x96xf32>
    %29 = vector.extract_strided_slice %28 {offsets = [0, 0], sizes = [16, 32], strides = [1, 1]} : vector<16x96xf32> to vector<16x32xf32>
    %30 = vector.extract_strided_slice %28 {offsets = [0, 32], sizes = [16, 32], strides = [1, 1]} : vector<16x96xf32> to vector<16x32xf32>
    %31 = vector.extract_strided_slice %28 {offsets = [0, 64], sizes = [16, 32], strides = [1, 1]} : vector<16x96xf32> to vector<16x32xf32>
    %32 = vector.extract_strided_slice %29 {offsets = [0, 0], sizes = [8, 16], strides = [1, 1]} : vector<16x32xf32> to vector<8x16xf32>
    %33 = vector.extract_strided_slice %30 {offsets = [0, 0], sizes = [8, 16], strides = [1, 1]} : vector<16x32xf32> to vector<8x16xf32>
    %34 = vector.extract_strided_slice %31 {offsets = [0, 0], sizes = [8, 16], strides = [1, 1]} : vector<16x32xf32> to vector<8x16xf32>
    %35 = arith.truncf %32 : vector<8x16xf32> to vector<8x16xbf16>
    %36 = arith.truncf %33 : vector<8x16xf32> to vector<8x16xbf16>
    %cst_11 = arith.constant dense<0.000000e+00> : vector<8x8xf32>
    %37 = tpu.matmul %35, %36, %cst_11 {dimension_numbers = #tpu.dot_dimension_numbers<[1], [1], [0], [0], [0, 0, 1, 0], [], []>} : vector<8x16xbf16>, vector<8x16xbf16>, vector<8x8xf32> -> vector<8x8xf32>
    %cst_12 = arith.constant 2.500000e-01 : f32
    %38 = vector.broadcast %cst_12 : f32 to vector<8x8xf32>
    %39 = arith.mulf %37, %38 : vector<8x8xf32>
    %cst_13 = arith.constant dense<0xFF800000> : vector<8xf32>
    %40 = vector.multi_reduction <maximumf>, %39, %cst_13 [1] : vector<8x8xf32> to vector<8xf32>
    %41 = vector.shape_cast %40 : vector<8xf32> to vector<8x1xf32>
    %42 = vector.broadcast %41 : vector<8x1xf32> to vector<8x8xf32>
    %43 = arith.subf %39, %42 : vector<8x8xf32>
    %44 = math.exp %43 : vector<8x8xf32>
    %cst_14 = arith.constant dense<0.000000e+00> : vector<8xf32>
    %45 = vector.multi_reduction <add>, %44, %cst_14 [1] : vector<8x8xf32> to vector<8xf32>
    %46 = vector.shape_cast %45 : vector<8xf32> to vector<8x1xf32>
    %47 = tpu.reciprocal %46 {approx = true} : vector<8x1xf32> -> vector<8x1xf32>
    %48 = vector.broadcast %47 : vector<8x1xf32> to vector<8x8xf32>
    %49 = arith.mulf %44, %48 : vector<8x8xf32>
    %50 = arith.truncf %49 : vector<8x8xf32> to vector<8x8xbf16>
    %51 = arith.truncf %34 : vector<8x16xf32> to vector<8x16xbf16>
    %cst_15 = arith.constant dense<0.000000e+00> : vector<8x16xf32>
    %52 = tpu.matmul %50, %51, %cst_15 {dimension_numbers = #tpu.dot_dimension_numbers<[1], [0], [0], [1], [0, 0, 1, 1], [], []>} : vector<8x8xbf16>, vector<8x16xbf16>, vector<8x16xf32> -> vector<8x16xf32>
    %53 = vector.extract_strided_slice %29 {offsets = [0, 16], sizes = [8, 16], strides = [1, 1]} : vector<16x32xf32> to vector<8x16xf32>
    %54 = vector.extract_strided_slice %30 {offsets = [0, 16], sizes = [8, 16], strides = [1, 1]} : vector<16x32xf32> to vector<8x16xf32>
    %55 = vector.extract_strided_slice %31 {offsets = [0, 16], sizes = [8, 16], strides = [1, 1]} : vector<16x32xf32> to vector<8x16xf32>
    %56 = arith.truncf %53 : vector<8x16xf32> to vector<8x16xbf16>
    %57 = arith.truncf %54 : vector<8x16xf32> to vector<8x16xbf16>
    %cst_16 = arith.constant dense<0.000000e+00> : vector<8x8xf32>
    %58 = tpu.matmul %56, %57, %cst_16 {dimension_numbers = #tpu.dot_dimension_numbers<[1], [1], [0], [0], [0, 0, 1, 0], [], []>} : vector<8x16xbf16>, vector<8x16xbf16>, vector<8x8xf32> -> vector<8x8xf32>
    %cst_17 = arith.constant 2.500000e-01 : f32
    %59 = vector.broadcast %cst_17 : f32 to vector<8x8xf32>
    %60 = arith.mulf %58, %59 : vector<8x8xf32>
    %cst_18 = arith.constant dense<0xFF800000> : vector<8xf32>
    %61 = vector.multi_reduction <maximumf>, %60, %cst_18 [1] : vector<8x8xf32> to vector<8xf32>
    %62 = vector.shape_cast %61 : vector<8xf32> to vector<8x1xf32>
    %63 = vector.broadcast %62 : vector<8x1xf32> to vector<8x8xf32>
    %64 = arith.subf %60, %63 : vector<8x8xf32>
    %65 = math.exp %64 : vector<8x8xf32>
    %cst_19 = arith.constant dense<0.000000e+00> : vector<8xf32>
    %66 = vector.multi_reduction <add>, %65, %cst_19 [1] : vector<8x8xf32> to vector<8xf32>
    %67 = vector.shape_cast %66 : vector<8xf32> to vector<8x1xf32>
    %68 = tpu.reciprocal %67 {approx = true} : vector<8x1xf32> -> vector<8x1xf32>
    %69 = vector.broadcast %68 : vector<8x1xf32> to vector<8x8xf32>
    %70 = arith.mulf %65, %69 : vector<8x8xf32>
    %71 = arith.truncf %70 : vector<8x8xf32> to vector<8x8xbf16>
    %72 = arith.truncf %55 : vector<8x16xf32> to vector<8x16xbf16>
    %cst_20 = arith.constant dense<0.000000e+00> : vector<8x16xf32>
    %73 = tpu.matmul %71, %72, %cst_20 {dimension_numbers = #tpu.dot_dimension_numbers<[1], [0], [0], [1], [0, 0, 1, 1], [], []>} : vector<8x8xbf16>, vector<8x16xbf16>, vector<8x16xf32> -> vector<8x16xf32>
    %74 = tpu.concatenate %52, %73 in 1 : vector<8x16xf32>, vector<8x16xf32> -> vector<8x32xf32>
    %75 = vector.extract_strided_slice %29 {offsets = [8, 0], sizes = [8, 16], strides = [1, 1]} : vector<16x32xf32> to vector<8x16xf32>
    %76 = vector.extract_strided_slice %30 {offsets = [8, 0], sizes = [8, 16], strides = [1, 1]} : vector<16x32xf32> to vector<8x16xf32>
    %77 = vector.extract_strided_slice %31 {offsets = [8, 0], sizes = [8, 16], strides = [1, 1]} : vector<16x32xf32> to vector<8x16xf32>
    %78 = arith.truncf %75 : vector<8x16xf32> to vector<8x16xbf16>
    %79 = arith.truncf %76 : vector<8x16xf32> to vector<8x16xbf16>
    %cst_21 = arith.constant dense<0.000000e+00> : vector<8x8xf32>
    %80 = tpu.matmul %78, %79, %cst_21 {dimension_numbers = #tpu.dot_dimension_numbers<[1], [1], [0], [0], [0, 0, 1, 0], [], []>} : vector<8x16xbf16>, vector<8x16xbf16>, vector<8x8xf32> -> vector<8x8xf32>
    %cst_22 = arith.constant 2.500000e-01 : f32
    %81 = vector.broadcast %cst_22 : f32 to vector<8x8xf32>
    %82 = arith.mulf %80, %81 : vector<8x8xf32>
    %cst_23 = arith.constant dense<0xFF800000> : vector<8xf32>
    %83 = vector.multi_reduction <maximumf>, %82, %cst_23 [1] : vector<8x8xf32> to vector<8xf32>
    %84 = vector.shape_cast %83 : vector<8xf32> to vector<8x1xf32>
    %85 = vector.broadcast %84 : vector<8x1xf32> to vector<8x8xf32>
    %86 = arith.subf %82, %85 : vector<8x8xf32>
    %87 = math.exp %86 : vector<8x8xf32>
    %cst_24 = arith.constant dense<0.000000e+00> : vector<8xf32>
    %88 = vector.multi_reduction <add>, %87, %cst_24 [1] : vector<8x8xf32> to vector<8xf32>
    %89 = vector.shape_cast %88 : vector<8xf32> to vector<8x1xf32>
    %90 = tpu.reciprocal %89 {approx = true} : vector<8x1xf32> -> vector<8x1xf32>
    %91 = vector.broadcast %90 : vector<8x1xf32> to vector<8x8xf32>
    %92 = arith.mulf %87, %91 : vector<8x8xf32>
    %93 = arith.truncf %92 : vector<8x8xf32> to vector<8x8xbf16>
    %94 = arith.truncf %77 : vector<8x16xf32> to vector<8x16xbf16>
    %cst_25 = arith.constant dense<0.000000e+00> : vector<8x16xf32>
    %95 = tpu.matmul %93, %94, %cst_25 {dimension_numbers = #tpu.dot_dimension_numbers<[1], [0], [0], [1], [0, 0, 1, 1], [], []>} : vector<8x8xbf16>, vector<8x16xbf16>, vector<8x16xf32> -> vector<8x16xf32>
    %96 = vector.extract_strided_slice %29 {offsets = [8, 16], sizes = [8, 16], strides = [1, 1]} : vector<16x32xf32> to vector<8x16xf32>
    %97 = vector.extract_strided_slice %30 {offsets = [8, 16], sizes = [8, 16], strides = [1, 1]} : vector<16x32xf32> to vector<8x16xf32>
    %98 = vector.extract_strided_slice %31 {offsets = [8, 16], sizes = [8, 16], strides = [1, 1]} : vector<16x32xf32> to vector<8x16xf32>
    %99 = arith.truncf %96 : vector<8x16xf32> to vector<8x16xbf16>
    %100 = arith.truncf %97 : vector<8x16xf32> to vector<8x16xbf16>
    %cst_26 = arith.constant dense<0.000000e+00> : vector<8x8xf32>
    %101 = tpu.matmul %99, %100, %cst_26 {dimension_numbers = #tpu.dot_dimension_numbers<[1], [1], [0], [0], [0, 0, 1, 0], [], []>} : vector<8x16xbf16>, vector<8x16xbf16>, vector<8x8xf32> -> vector<8x8xf32>
    %cst_27 = arith.constant 2.500000e-01 : f32
    %102 = vector.broadcast %cst_27 : f32 to vector<8x8xf32>
    %103 = arith.mulf %101, %102 : vector<8x8xf32>
    %cst_28 = arith.constant dense<0xFF800000> : vector<8xf32>
    %104 = vector.multi_reduction <maximumf>, %103, %cst_28 [1] : vector<8x8xf32> to vector<8xf32>
    %105 = vector.shape_cast %104 : vector<8xf32> to vector<8x1xf32>
    %106 = vector.broadcast %105 : vector<8x1xf32> to vector<8x8xf32>
    %107 = arith.subf %103, %106 : vector<8x8xf32>
    %108 = math.exp %107 : vector<8x8xf32>
    %cst_29 = arith.constant dense<0.000000e+00> : vector<8xf32>
    %109 = vector.multi_reduction <add>, %108, %cst_29 [1] : vector<8x8xf32> to vector<8xf32>
    %110 = vector.shape_cast %109 : vector<8xf32> to vector<8x1xf32>
    %111 = tpu.reciprocal %110 {approx = true} : vector<8x1xf32> -> vector<8x1xf32>
    %112 = vector.broadcast %111 : vector<8x1xf32> to vector<8x8xf32>
    %113 = arith.mulf %108, %112 : vector<8x8xf32>
    %114 = arith.truncf %113 : vector<8x8xf32> to vector<8x8xbf16>
    %115 = arith.truncf %98 : vector<8x16xf32> to vector<8x16xbf16>
    %cst_30 = arith.constant dense<0.000000e+00> : vector<8x16xf32>
    %116 = tpu.matmul %114, %115, %cst_30 {dimension_numbers = #tpu.dot_dimension_numbers<[1], [0], [0], [1], [0, 0, 1, 1], [], []>} : vector<8x8xbf16>, vector<8x16xbf16>, vector<8x16xf32> -> vector<8x16xf32>
    %117 = tpu.concatenate %95, %116 in 1 : vector<8x16xf32>, vector<8x16xf32> -> vector<8x32xf32>
    %118 = tpu.concatenate %74, %117 in 0 : vector<8x32xf32>, vector<8x32xf32> -> vector<16x32xf32>
    %c176 = arith.constant 176 : index
    %c0_31 = arith.constant 0 : index
    %119 = vector.load %arg2[%c176, %c0_31] : memref<1264x128xf32, #tpu.memory_space<vmem>>, vector<32x32xf32>
    %120 = arith.truncf %118 : vector<16x32xf32> to vector<16x32xbf16>
    %121 = arith.truncf %119 : vector<32x32xf32> to vector<32x32xbf16>
    %cst_32 = arith.constant dense<0.000000e+00> : vector<16x32xf32>
    %122 = tpu.matmul %120, %121, %cst_32 {dimension_numbers = #tpu.dot_dimension_numbers<[1], [0], [0], [1], [0, 0, 1, 1], [], []>} : vector<16x32xbf16>, vector<32x32xbf16>, vector<16x32xf32> -> vector<16x32xf32>
    %c208 = arith.constant 208 : index
    %c0_33 = arith.constant 0 : index
    %123 = vector.load %arg2[%c208, %c0_33] : memref<1264x128xf32, #tpu.memory_space<vmem>>, vector<1x32xf32>
    %124 = vector.broadcast %123 : vector<1x32xf32> to vector<16x32xf32>
    %125 = arith.addf %122, %124 : vector<16x32xf32>
    %c216 = arith.constant 216 : index
    %c0_34 = arith.constant 0 : index
    %126 = vector.load %arg2[%c216, %c0_34] : memref<1264x128xf32, #tpu.memory_space<vmem>>, vector<2x32xf32>
    %127 = arith.addf %17, %125 : vector<16x32xf32>
    %cst_35 = arith.constant dense<0.000000e+00> : vector<16xf32>
    %128 = vector.multi_reduction <add>, %127, %cst_35 [1] : vector<16x32xf32> to vector<16xf32>
    %129 = vector.shape_cast %128 : vector<16xf32> to vector<16x1xf32>
    %cst_36 = arith.constant 3.200000e+01 : f32
    %130 = vector.broadcast %cst_36 : f32 to vector<16x1xf32>
    %131 = arith.divf %129, %130 : vector<16x1xf32>
    %132 = vector.broadcast %131 : vector<16x1xf32> to vector<16x32xf32>
    %133 = arith.subf %127, %132 : vector<16x32xf32>
    %134 = arith.mulf %133, %133 : vector<16x32xf32>
    %cst_37 = arith.constant dense<0.000000e+00> : vector<16xf32>
    %135 = vector.multi_reduction <add>, %134, %cst_37 [1] : vector<16x32xf32> to vector<16xf32>
    %136 = vector.shape_cast %135 : vector<16xf32> to vector<16x1xf32>
    %cst_38 = arith.constant 3.200000e+01 : f32
    %137 = vector.broadcast %cst_38 : f32 to vector<16x1xf32>
    %138 = arith.divf %136, %137 : vector<16x1xf32>
    %139 = vector.broadcast %131 : vector<16x1xf32> to vector<16x32xf32>
    %140 = arith.subf %127, %139 : vector<16x32xf32>
    %cst_39 = arith.constant 9.99999974E-6 : f32
    %141 = vector.broadcast %cst_39 : f32 to vector<16x1xf32>
    %142 = arith.addf %138, %141 : vector<16x1xf32>
    %143 = math.rsqrt %142 : vector<16x1xf32>
    %144 = vector.broadcast %143 : vector<16x1xf32> to vector<16x32xf32>
    %145 = arith.mulf %140, %144 : vector<16x32xf32>
    %146 = vector.extract_strided_slice %126 {offsets = [0, 0], sizes = [1, 32], strides = [1, 1]} : vector<2x32xf32> to vector<1x32xf32>
    %147 = vector.broadcast %146 : vector<1x32xf32> to vector<16x32xf32>
    %148 = arith.mulf %145, %147 : vector<16x32xf32>
    %149 = vector.extract_strided_slice %126 {offsets = [1, 0], sizes = [1, 32], strides = [1, 1]} : vector<2x32xf32> to vector<1x32xf32>
    %150 = vector.broadcast %149 : vector<1x32xf32> to vector<16x32xf32>
    %151 = arith.addf %148, %150 : vector<16x32xf32>
    %c224 = arith.constant 224 : index
    %c0_40 = arith.constant 0 : index
    %152 = vector.load %arg2[%c224, %c0_40] : memref<1264x128xf32, #tpu.memory_space<vmem>>, vector<32x64xf32>
    %153 = arith.truncf %151 : vector<16x32xf32> to vector<16x32xbf16>
    %154 = arith.truncf %152 : vector<32x64xf32> to vector<32x64xbf16>
    %cst_41 = arith.constant dense<0.000000e+00> : vector<16x64xf32>
    %155 = tpu.matmul %153, %154, %cst_41 {dimension_numbers = #tpu.dot_dimension_numbers<[1], [0], [0], [1], [0, 0, 1, 1], [], []>} : vector<16x32xbf16>, vector<32x64xbf16>, vector<16x64xf32> -> vector<16x64xf32>
    %c256 = arith.constant 256 : index
    %c0_42 = arith.constant 0 : index
    %156 = vector.load %arg2[%c256, %c0_42] : memref<1264x128xf32, #tpu.memory_space<vmem>>, vector<1x64xf32>
    %157 = vector.broadcast %156 : vector<1x64xf32> to vector<16x64xf32>
    %158 = arith.addf %155, %157 : vector<16x64xf32>
    %cst_43 = arith.constant 0.000000e+00 : f32
    %159 = vector.broadcast %cst_43 : f32 to vector<16x64xf32>
    %160 = arith.maximumf %158, %159 : vector<16x64xf32>
    %c264 = arith.constant 264 : index
    %c0_44 = arith.constant 0 : index
    %161 = vector.load %arg2[%c264, %c0_44] : memref<1264x128xf32, #tpu.memory_space<vmem>>, vector<64x32xf32>
    %162 = arith.truncf %160 : vector<16x64xf32> to vector<16x64xbf16>
    %163 = arith.truncf %161 : vector<64x32xf32> to vector<64x32xbf16>
    %cst_45 = arith.constant dense<0.000000e+00> : vector<16x32xf32>
    %164 = tpu.matmul %162, %163, %cst_45 {dimension_numbers = #tpu.dot_dimension_numbers<[1], [0], [0], [1], [0, 0, 1, 1], [], []>} : vector<16x64xbf16>, vector<64x32xbf16>, vector<16x32xf32> -> vector<16x32xf32>
    %c328 = arith.constant 328 : index
    %c0_46 = arith.constant 0 : index
    %165 = vector.load %arg2[%c328, %c0_46] : memref<1264x128xf32, #tpu.memory_space<vmem>>, vector<1x32xf32>
    %166 = vector.broadcast %165 : vector<1x32xf32> to vector<16x32xf32>
    %167 = arith.addf %164, %166 : vector<16x32xf32>
    %c336 = arith.constant 336 : index
    %c0_47 = arith.constant 0 : index
    %168 = vector.load %arg2[%c336, %c0_47] : memref<1264x128xf32, #tpu.memory_space<vmem>>, vector<2x32xf32>
    %169 = arith.addf %151, %167 : vector<16x32xf32>
    %cst_48 = arith.constant dense<0.000000e+00> : vector<16xf32>
    %170 = vector.multi_reduction <add>, %169, %cst_48 [1] : vector<16x32xf32> to vector<16xf32>
    %171 = vector.shape_cast %170 : vector<16xf32> to vector<16x1xf32>
    %cst_49 = arith.constant 3.200000e+01 : f32
    %172 = vector.broadcast %cst_49 : f32 to vector<16x1xf32>
    %173 = arith.divf %171, %172 : vector<16x1xf32>
    %174 = vector.broadcast %173 : vector<16x1xf32> to vector<16x32xf32>
    %175 = arith.subf %169, %174 : vector<16x32xf32>
    %176 = arith.mulf %175, %175 : vector<16x32xf32>
    %cst_50 = arith.constant dense<0.000000e+00> : vector<16xf32>
    %177 = vector.multi_reduction <add>, %176, %cst_50 [1] : vector<16x32xf32> to vector<16xf32>
    %178 = vector.shape_cast %177 : vector<16xf32> to vector<16x1xf32>
    %cst_51 = arith.constant 3.200000e+01 : f32
    %179 = vector.broadcast %cst_51 : f32 to vector<16x1xf32>
    %180 = arith.divf %178, %179 : vector<16x1xf32>
    %181 = vector.broadcast %173 : vector<16x1xf32> to vector<16x32xf32>
    %182 = arith.subf %169, %181 : vector<16x32xf32>
    %cst_52 = arith.constant 9.99999974E-6 : f32
    %183 = vector.broadcast %cst_52 : f32 to vector<16x1xf32>
    %184 = arith.addf %180, %183 : vector<16x1xf32>
    %185 = math.rsqrt %184 : vector<16x1xf32>
    %186 = vector.broadcast %185 : vector<16x1xf32> to vector<16x32xf32>
    %187 = arith.mulf %182, %186 : vector<16x32xf32>
    %188 = vector.extract_strided_slice %168 {offsets = [0, 0], sizes = [1, 32], strides = [1, 1]} : vector<2x32xf32> to vector<1x32xf32>
    %189 = vector.broadcast %188 : vector<1x32xf32> to vector<16x32xf32>
    %190 = arith.mulf %187, %189 : vector<16x32xf32>
    %191 = vector.extract_strided_slice %168 {offsets = [1, 0], sizes = [1, 32], strides = [1, 1]} : vector<2x32xf32> to vector<1x32xf32>
    %192 = vector.broadcast %191 : vector<1x32xf32> to vector<16x32xf32>
    %193 = arith.addf %190, %192 : vector<16x32xf32>
    %c344 = arith.constant 344 : index
    %c0_53 = arith.constant 0 : index
    %194 = vector.load %arg2[%c344, %c0_53] : memref<1264x128xf32, #tpu.memory_space<vmem>>, vector<32x96xf32>
    %195 = arith.truncf %193 : vector<16x32xf32> to vector<16x32xbf16>
    %196 = arith.truncf %194 : vector<32x96xf32> to vector<32x96xbf16>
    %cst_54 = arith.constant dense<0.000000e+00> : vector<16x96xf32>
    %197 = tpu.matmul %195, %196, %cst_54 {dimension_numbers = #tpu.dot_dimension_numbers<[1], [0], [0], [1], [0, 0, 1, 1], [], []>} : vector<16x32xbf16>, vector<32x96xbf16>, vector<16x96xf32> -> vector<16x96xf32>
    %c376 = arith.constant 376 : index
    %c0_55 = arith.constant 0 : index
    %198 = vector.load %arg2[%c376, %c0_55] : memref<1264x128xf32, #tpu.memory_space<vmem>>, vector<1x96xf32>
    %199 = vector.broadcast %198 : vector<1x96xf32> to vector<16x96xf32>
    %200 = arith.addf %197, %199 : vector<16x96xf32>
    %201 = vector.extract_strided_slice %200 {offsets = [0, 0], sizes = [16, 32], strides = [1, 1]} : vector<16x96xf32> to vector<16x32xf32>
    %202 = vector.extract_strided_slice %200 {offsets = [0, 32], sizes = [16, 32], strides = [1, 1]} : vector<16x96xf32> to vector<16x32xf32>
    %203 = vector.extract_strided_slice %200 {offsets = [0, 64], sizes = [16, 32], strides = [1, 1]} : vector<16x96xf32> to vector<16x32xf32>
    %204 = vector.extract_strided_slice %201 {offsets = [0, 0], sizes = [8, 16], strides = [1, 1]} : vector<16x32xf32> to vector<8x16xf32>
    %205 = vector.extract_strided_slice %202 {offsets = [0, 0], sizes = [8, 16], strides = [1, 1]} : vector<16x32xf32> to vector<8x16xf32>
    %206 = vector.extract_strided_slice %203 {offsets = [0, 0], sizes = [8, 16], strides = [1, 1]} : vector<16x32xf32> to vector<8x16xf32>
    %207 = arith.truncf %204 : vector<8x16xf32> to vector<8x16xbf16>
    %208 = arith.truncf %205 : vector<8x16xf32> to vector<8x16xbf16>
    %cst_56 = arith.constant dense<0.000000e+00> : vector<8x8xf32>
    %209 = tpu.matmul %207, %208, %cst_56 {dimension_numbers = #tpu.dot_dimension_numbers<[1], [1], [0], [0], [0, 0, 1, 0], [], []>} : vector<8x16xbf16>, vector<8x16xbf16>, vector<8x8xf32> -> vector<8x8xf32>
    %cst_57 = arith.constant 2.500000e-01 : f32
    %210 = vector.broadcast %cst_57 : f32 to vector<8x8xf32>
    %211 = arith.mulf %209, %210 : vector<8x8xf32>
    %cst_58 = arith.constant dense<0xFF800000> : vector<8xf32>
    %212 = vector.multi_reduction <maximumf>, %211, %cst_58 [1] : vector<8x8xf32> to vector<8xf32>
    %213 = vector.shape_cast %212 : vector<8xf32> to vector<8x1xf32>
    %214 = vector.broadcast %213 : vector<8x1xf32> to vector<8x8xf32>
    %215 = arith.subf %211, %214 : vector<8x8xf32>
    %216 = math.exp %215 : vector<8x8xf32>
    %cst_59 = arith.constant dense<0.000000e+00> : vector<8xf32>
    %217 = vector.multi_reduction <add>, %216, %cst_59 [1] : vector<8x8xf32> to vector<8xf32>
    %218 = vector.shape_cast %217 : vector<8xf32> to vector<8x1xf32>
    %219 = tpu.reciprocal %218 {approx = true} : vector<8x1xf32> -> vector<8x1xf32>
    %220 = vector.broadcast %219 : vector<8x1xf32> to vector<8x8xf32>
    %221 = arith.mulf %216, %220 : vector<8x8xf32>
    %222 = arith.truncf %221 : vector<8x8xf32> to vector<8x8xbf16>
    %223 = arith.truncf %206 : vector<8x16xf32> to vector<8x16xbf16>
    %cst_60 = arith.constant dense<0.000000e+00> : vector<8x16xf32>
    %224 = tpu.matmul %222, %223, %cst_60 {dimension_numbers = #tpu.dot_dimension_numbers<[1], [0], [0], [1], [0, 0, 1, 1], [], []>} : vector<8x8xbf16>, vector<8x16xbf16>, vector<8x16xf32> -> vector<8x16xf32>
    %225 = vector.extract_strided_slice %201 {offsets = [0, 16], sizes = [8, 16], strides = [1, 1]} : vector<16x32xf32> to vector<8x16xf32>
    %226 = vector.extract_strided_slice %202 {offsets = [0, 16], sizes = [8, 16], strides = [1, 1]} : vector<16x32xf32> to vector<8x16xf32>
    %227 = vector.extract_strided_slice %203 {offsets = [0, 16], sizes = [8, 16], strides = [1, 1]} : vector<16x32xf32> to vector<8x16xf32>
    %228 = arith.truncf %225 : vector<8x16xf32> to vector<8x16xbf16>
    %229 = arith.truncf %226 : vector<8x16xf32> to vector<8x16xbf16>
    %cst_61 = arith.constant dense<0.000000e+00> : vector<8x8xf32>
    %230 = tpu.matmul %228, %229, %cst_61 {dimension_numbers = #tpu.dot_dimension_numbers<[1], [1], [0], [0], [0, 0, 1, 0], [], []>} : vector<8x16xbf16>, vector<8x16xbf16>, vector<8x8xf32> -> vector<8x8xf32>
    %cst_62 = arith.constant 2.500000e-01 : f32
    %231 = vector.broadcast %cst_62 : f32 to vector<8x8xf32>
    %232 = arith.mulf %230, %231 : vector<8x8xf32>
    %cst_63 = arith.constant dense<0xFF800000> : vector<8xf32>
    %233 = vector.multi_reduction <maximumf>, %232, %cst_63 [1] : vector<8x8xf32> to vector<8xf32>
    %234 = vector.shape_cast %233 : vector<8xf32> to vector<8x1xf32>
    %235 = vector.broadcast %234 : vector<8x1xf32> to vector<8x8xf32>
    %236 = arith.subf %232, %235 : vector<8x8xf32>
    %237 = math.exp %236 : vector<8x8xf32>
    %cst_64 = arith.constant dense<0.000000e+00> : vector<8xf32>
    %238 = vector.multi_reduction <add>, %237, %cst_64 [1] : vector<8x8xf32> to vector<8xf32>
    %239 = vector.shape_cast %238 : vector<8xf32> to vector<8x1xf32>
    %240 = tpu.reciprocal %239 {approx = true} : vector<8x1xf32> -> vector<8x1xf32>
    %241 = vector.broadcast %240 : vector<8x1xf32> to vector<8x8xf32>
    %242 = arith.mulf %237, %241 : vector<8x8xf32>
    %243 = arith.truncf %242 : vector<8x8xf32> to vector<8x8xbf16>
    %244 = arith.truncf %227 : vector<8x16xf32> to vector<8x16xbf16>
    %cst_65 = arith.constant dense<0.000000e+00> : vector<8x16xf32>
    %245 = tpu.matmul %243, %244, %cst_65 {dimension_numbers = #tpu.dot_dimension_numbers<[1], [0], [0], [1], [0, 0, 1, 1], [], []>} : vector<8x8xbf16>, vector<8x16xbf16>, vector<8x16xf32> -> vector<8x16xf32>
    %246 = tpu.concatenate %224, %245 in 1 : vector<8x16xf32>, vector<8x16xf32> -> vector<8x32xf32>
    %247 = vector.extract_strided_slice %201 {offsets = [8, 0], sizes = [8, 16], strides = [1, 1]} : vector<16x32xf32> to vector<8x16xf32>
    %248 = vector.extract_strided_slice %202 {offsets = [8, 0], sizes = [8, 16], strides = [1, 1]} : vector<16x32xf32> to vector<8x16xf32>
    %249 = vector.extract_strided_slice %203 {offsets = [8, 0], sizes = [8, 16], strides = [1, 1]} : vector<16x32xf32> to vector<8x16xf32>
    %250 = arith.truncf %247 : vector<8x16xf32> to vector<8x16xbf16>
    %251 = arith.truncf %248 : vector<8x16xf32> to vector<8x16xbf16>
    %cst_66 = arith.constant dense<0.000000e+00> : vector<8x8xf32>
    %252 = tpu.matmul %250, %251, %cst_66 {dimension_numbers = #tpu.dot_dimension_numbers<[1], [1], [0], [0], [0, 0, 1, 0], [], []>} : vector<8x16xbf16>, vector<8x16xbf16>, vector<8x8xf32> -> vector<8x8xf32>
    %cst_67 = arith.constant 2.500000e-01 : f32
    %253 = vector.broadcast %cst_67 : f32 to vector<8x8xf32>
    %254 = arith.mulf %252, %253 : vector<8x8xf32>
    %cst_68 = arith.constant dense<0xFF800000> : vector<8xf32>
    %255 = vector.multi_reduction <maximumf>, %254, %cst_68 [1] : vector<8x8xf32> to vector<8xf32>
    %256 = vector.shape_cast %255 : vector<8xf32> to vector<8x1xf32>
    %257 = vector.broadcast %256 : vector<8x1xf32> to vector<8x8xf32>
    %258 = arith.subf %254, %257 : vector<8x8xf32>
    %259 = math.exp %258 : vector<8x8xf32>
    %cst_69 = arith.constant dense<0.000000e+00> : vector<8xf32>
    %260 = vector.multi_reduction <add>, %259, %cst_69 [1] : vector<8x8xf32> to vector<8xf32>
    %261 = vector.shape_cast %260 : vector<8xf32> to vector<8x1xf32>
    %262 = tpu.reciprocal %261 {approx = true} : vector<8x1xf32> -> vector<8x1xf32>
    %263 = vector.broadcast %262 : vector<8x1xf32> to vector<8x8xf32>
    %264 = arith.mulf %259, %263 : vector<8x8xf32>
    %265 = arith.truncf %264 : vector<8x8xf32> to vector<8x8xbf16>
    %266 = arith.truncf %249 : vector<8x16xf32> to vector<8x16xbf16>
    %cst_70 = arith.constant dense<0.000000e+00> : vector<8x16xf32>
    %267 = tpu.matmul %265, %266, %cst_70 {dimension_numbers = #tpu.dot_dimension_numbers<[1], [0], [0], [1], [0, 0, 1, 1], [], []>} : vector<8x8xbf16>, vector<8x16xbf16>, vector<8x16xf32> -> vector<8x16xf32>
    %268 = vector.extract_strided_slice %201 {offsets = [8, 16], sizes = [8, 16], strides = [1, 1]} : vector<16x32xf32> to vector<8x16xf32>
    %269 = vector.extract_strided_slice %202 {offsets = [8, 16], sizes = [8, 16], strides = [1, 1]} : vector<16x32xf32> to vector<8x16xf32>
    %270 = vector.extract_strided_slice %203 {offsets = [8, 16], sizes = [8, 16], strides = [1, 1]} : vector<16x32xf32> to vector<8x16xf32>
    %271 = arith.truncf %268 : vector<8x16xf32> to vector<8x16xbf16>
    %272 = arith.truncf %269 : vector<8x16xf32> to vector<8x16xbf16>
    %cst_71 = arith.constant dense<0.000000e+00> : vector<8x8xf32>
    %273 = tpu.matmul %271, %272, %cst_71 {dimension_numbers = #tpu.dot_dimension_numbers<[1], [1], [0], [0], [0, 0, 1, 0], [], []>} : vector<8x16xbf16>, vector<8x16xbf16>, vector<8x8xf32> -> vector<8x8xf32>
    %cst_72 = arith.constant 2.500000e-01 : f32
    %274 = vector.broadcast %cst_72 : f32 to vector<8x8xf32>
    %275 = arith.mulf %273, %274 : vector<8x8xf32>
    %cst_73 = arith.constant dense<0xFF800000> : vector<8xf32>
    %276 = vector.multi_reduction <maximumf>, %275, %cst_73 [1] : vector<8x8xf32> to vector<8xf32>
    %277 = vector.shape_cast %276 : vector<8xf32> to vector<8x1xf32>
    %278 = vector.broadcast %277 : vector<8x1xf32> to vector<8x8xf32>
    %279 = arith.subf %275, %278 : vector<8x8xf32>
    %280 = math.exp %279 : vector<8x8xf32>
    %cst_74 = arith.constant dense<0.000000e+00> : vector<8xf32>
    %281 = vector.multi_reduction <add>, %280, %cst_74 [1] : vector<8x8xf32> to vector<8xf32>
    %282 = vector.shape_cast %281 : vector<8xf32> to vector<8x1xf32>
    %283 = tpu.reciprocal %282 {approx = true} : vector<8x1xf32> -> vector<8x1xf32>
    %284 = vector.broadcast %283 : vector<8x1xf32> to vector<8x8xf32>
    %285 = arith.mulf %280, %284 : vector<8x8xf32>
    %286 = arith.truncf %285 : vector<8x8xf32> to vector<8x8xbf16>
    %287 = arith.truncf %270 : vector<8x16xf32> to vector<8x16xbf16>
    %cst_75 = arith.constant dense<0.000000e+00> : vector<8x16xf32>
    %288 = tpu.matmul %286, %287, %cst_75 {dimension_numbers = #tpu.dot_dimension_numbers<[1], [0], [0], [1], [0, 0, 1, 1], [], []>} : vector<8x8xbf16>, vector<8x16xbf16>, vector<8x16xf32> -> vector<8x16xf32>
    %289 = tpu.concatenate %267, %288 in 1 : vector<8x16xf32>, vector<8x16xf32> -> vector<8x32xf32>
    %290 = tpu.concatenate %246, %289 in 0 : vector<8x32xf32>, vector<8x32xf32> -> vector<16x32xf32>
    %c384 = arith.constant 384 : index
    %c0_76 = arith.constant 0 : index
    %291 = vector.load %arg2[%c384, %c0_76] : memref<1264x128xf32, #tpu.memory_space<vmem>>, vector<32x32xf32>
    %292 = arith.truncf %290 : vector<16x32xf32> to vector<16x32xbf16>
    %293 = arith.truncf %291 : vector<32x32xf32> to vector<32x32xbf16>
    %cst_77 = arith.constant dense<0.000000e+00> : vector<16x32xf32>
    %294 = tpu.matmul %292, %293, %cst_77 {dimension_numbers = #tpu.dot_dimension_numbers<[1], [0], [0], [1], [0, 0, 1, 1], [], []>} : vector<16x32xbf16>, vector<32x32xbf16>, vector<16x32xf32> -> vector<16x32xf32>
    %c416 = arith.constant 416 : index
    %c0_78 = arith.constant 0 : index
    %295 = vector.load %arg2[%c416, %c0_78] : memref<1264x128xf32, #tpu.memory_space<vmem>>, vector<1x32xf32>
    %296 = vector.broadcast %295 : vector<1x32xf32> to vector<16x32xf32>
    %297 = arith.addf %294, %296 : vector<16x32xf32>
    %c424 = arith.constant 424 : index
    %c0_79 = arith.constant 0 : index
    %298 = vector.load %arg2[%c424, %c0_79] : memref<1264x128xf32, #tpu.memory_space<vmem>>, vector<2x32xf32>
    %299 = arith.addf %193, %297 : vector<16x32xf32>
    %cst_80 = arith.constant dense<0.000000e+00> : vector<16xf32>
    %300 = vector.multi_reduction <add>, %299, %cst_80 [1] : vector<16x32xf32> to vector<16xf32>
    %301 = vector.shape_cast %300 : vector<16xf32> to vector<16x1xf32>
    %cst_81 = arith.constant 3.200000e+01 : f32
    %302 = vector.broadcast %cst_81 : f32 to vector<16x1xf32>
    %303 = arith.divf %301, %302 : vector<16x1xf32>
    %304 = vector.broadcast %303 : vector<16x1xf32> to vector<16x32xf32>
    %305 = arith.subf %299, %304 : vector<16x32xf32>
    %306 = arith.mulf %305, %305 : vector<16x32xf32>
    %cst_82 = arith.constant dense<0.000000e+00> : vector<16xf32>
    %307 = vector.multi_reduction <add>, %306, %cst_82 [1] : vector<16x32xf32> to vector<16xf32>
    %308 = vector.shape_cast %307 : vector<16xf32> to vector<16x1xf32>
    %cst_83 = arith.constant 3.200000e+01 : f32
    %309 = vector.broadcast %cst_83 : f32 to vector<16x1xf32>
    %310 = arith.divf %308, %309 : vector<16x1xf32>
    %311 = vector.broadcast %303 : vector<16x1xf32> to vector<16x32xf32>
    %312 = arith.subf %299, %311 : vector<16x32xf32>
    %cst_84 = arith.constant 9.99999974E-6 : f32
    %313 = vector.broadcast %cst_84 : f32 to vector<16x1xf32>
    %314 = arith.addf %310, %313 : vector<16x1xf32>
    %315 = math.rsqrt %314 : vector<16x1xf32>
    %316 = vector.broadcast %315 : vector<16x1xf32> to vector<16x32xf32>
    %317 = arith.mulf %312, %316 : vector<16x32xf32>
    %318 = vector.extract_strided_slice %298 {offsets = [0, 0], sizes = [1, 32], strides = [1, 1]} : vector<2x32xf32> to vector<1x32xf32>
    %319 = vector.broadcast %318 : vector<1x32xf32> to vector<16x32xf32>
    %320 = arith.mulf %317, %319 : vector<16x32xf32>
    %321 = vector.extract_strided_slice %298 {offsets = [1, 0], sizes = [1, 32], strides = [1, 1]} : vector<2x32xf32> to vector<1x32xf32>
    %322 = vector.broadcast %321 : vector<1x32xf32> to vector<16x32xf32>
    %323 = arith.addf %320, %322 : vector<16x32xf32>
    %c432 = arith.constant 432 : index
    %c0_85 = arith.constant 0 : index
    %324 = vector.load %arg2[%c432, %c0_85] : memref<1264x128xf32, #tpu.memory_space<vmem>>, vector<32x64xf32>
    %325 = arith.truncf %323 : vector<16x32xf32> to vector<16x32xbf16>
    %326 = arith.truncf %324 : vector<32x64xf32> to vector<32x64xbf16>
    %cst_86 = arith.constant dense<0.000000e+00> : vector<16x64xf32>
    %327 = tpu.matmul %325, %326, %cst_86 {dimension_numbers = #tpu.dot_dimension_numbers<[1], [0], [0], [1], [0, 0, 1, 1], [], []>} : vector<16x32xbf16>, vector<32x64xbf16>, vector<16x64xf32> -> vector<16x64xf32>
    %c464 = arith.constant 464 : index
    %c0_87 = arith.constant 0 : index
    %328 = vector.load %arg2[%c464, %c0_87] : memref<1264x128xf32, #tpu.memory_space<vmem>>, vector<1x64xf32>
    %329 = vector.broadcast %328 : vector<1x64xf32> to vector<16x64xf32>
    %330 = arith.addf %327, %329 : vector<16x64xf32>
    %cst_88 = arith.constant 0.000000e+00 : f32
    %331 = vector.broadcast %cst_88 : f32 to vector<16x64xf32>
    %332 = arith.maximumf %330, %331 : vector<16x64xf32>
    %c472 = arith.constant 472 : index
    %c0_89 = arith.constant 0 : index
    %333 = vector.load %arg2[%c472, %c0_89] : memref<1264x128xf32, #tpu.memory_space<vmem>>, vector<64x32xf32>
    %334 = arith.truncf %332 : vector<16x64xf32> to vector<16x64xbf16>
    %335 = arith.truncf %333 : vector<64x32xf32> to vector<64x32xbf16>
    %cst_90 = arith.constant dense<0.000000e+00> : vector<16x32xf32>
    %336 = tpu.matmul %334, %335, %cst_90 {dimension_numbers = #tpu.dot_dimension_numbers<[1], [0], [0], [1], [0, 0, 1, 1], [], []>} : vector<16x64xbf16>, vector<64x32xbf16>, vector<16x32xf32> -> vector<16x32xf32>
    %c536 = arith.constant 536 : index
    %c0_91 = arith.constant 0 : index
    %337 = vector.load %arg2[%c536, %c0_91] : memref<1264x128xf32, #tpu.memory_space<vmem>>, vector<1x32xf32>
    %338 = vector.broadcast %337 : vector<1x32xf32> to vector<16x32xf32>
    %339 = arith.addf %336, %338 : vector<16x32xf32>
    %c544 = arith.constant 544 : index
    %c0_92 = arith.constant 0 : index
    %340 = vector.load %arg2[%c544, %c0_92] : memref<1264x128xf32, #tpu.memory_space<vmem>>, vector<2x32xf32>
    %341 = arith.addf %323, %339 : vector<16x32xf32>
    %cst_93 = arith.constant dense<0.000000e+00> : vector<16xf32>
    %342 = vector.multi_reduction <add>, %341, %cst_93 [1] : vector<16x32xf32> to vector<16xf32>
    %343 = vector.shape_cast %342 : vector<16xf32> to vector<16x1xf32>
    %cst_94 = arith.constant 3.200000e+01 : f32
    %344 = vector.broadcast %cst_94 : f32 to vector<16x1xf32>
    %345 = arith.divf %343, %344 : vector<16x1xf32>
    %346 = vector.broadcast %345 : vector<16x1xf32> to vector<16x32xf32>
    %347 = arith.subf %341, %346 : vector<16x32xf32>
    %348 = arith.mulf %347, %347 : vector<16x32xf32>
    %cst_95 = arith.constant dense<0.000000e+00> : vector<16xf32>
    %349 = vector.multi_reduction <add>, %348, %cst_95 [1] : vector<16x32xf32> to vector<16xf32>
    %350 = vector.shape_cast %349 : vector<16xf32> to vector<16x1xf32>
    %cst_96 = arith.constant 3.200000e+01 : f32
    %351 = vector.broadcast %cst_96 : f32 to vector<16x1xf32>
    %352 = arith.divf %350, %351 : vector<16x1xf32>
    %353 = vector.broadcast %345 : vector<16x1xf32> to vector<16x32xf32>
    %354 = arith.subf %341, %353 : vector<16x32xf32>
    %cst_97 = arith.constant 9.99999974E-6 : f32
    %355 = vector.broadcast %cst_97 : f32 to vector<16x1xf32>
    %356 = arith.addf %352, %355 : vector<16x1xf32>
    %357 = math.rsqrt %356 : vector<16x1xf32>
    %358 = vector.broadcast %357 : vector<16x1xf32> to vector<16x32xf32>
    %359 = arith.mulf %354, %358 : vector<16x32xf32>
    %360 = vector.extract_strided_slice %340 {offsets = [0, 0], sizes = [1, 32], strides = [1, 1]} : vector<2x32xf32> to vector<1x32xf32>
    %361 = vector.broadcast %360 : vector<1x32xf32> to vector<16x32xf32>
    %362 = arith.mulf %359, %361 : vector<16x32xf32>
    %363 = vector.extract_strided_slice %340 {offsets = [1, 0], sizes = [1, 32], strides = [1, 1]} : vector<2x32xf32> to vector<1x32xf32>
    %364 = vector.broadcast %363 : vector<1x32xf32> to vector<16x32xf32>
    %365 = arith.addf %362, %364 : vector<16x32xf32>
    %366 = tpu.iota {dimensions = array<i32: 0>} : vector<8x8xi32>
    %367 = tpu.iota {dimensions = array<i32: 1>} : vector<8x8xi32>
    %368 = arith.cmpi sle, %367, %366 : vector<8x8xi32>
    %c552 = arith.constant 552 : index
    %c0_98 = arith.constant 0 : index
    %369 = vector.load %arg2[%c552, %c0_98] : memref<1264x128xf32, #tpu.memory_space<vmem>>, vector<32x96xf32>
    %370 = arith.truncf %21 : vector<16x32xf32> to vector<16x32xbf16>
    %371 = arith.truncf %369 : vector<32x96xf32> to vector<32x96xbf16>
    %cst_99 = arith.constant dense<0.000000e+00> : vector<16x96xf32>
    %372 = tpu.matmul %370, %371, %cst_99 {dimension_numbers = #tpu.dot_dimension_numbers<[1], [0], [0], [1], [0, 0, 1, 1], [], []>} : vector<16x32xbf16>, vector<32x96xbf16>, vector<16x96xf32> -> vector<16x96xf32>
    %c584 = arith.constant 584 : index
    %c0_100 = arith.constant 0 : index
    %373 = vector.load %arg2[%c584, %c0_100] : memref<1264x128xf32, #tpu.memory_space<vmem>>, vector<1x96xf32>
    %374 = vector.broadcast %373 : vector<1x96xf32> to vector<16x96xf32>
    %375 = arith.addf %372, %374 : vector<16x96xf32>
    %376 = vector.extract_strided_slice %375 {offsets = [0, 0], sizes = [16, 32], strides = [1, 1]} : vector<16x96xf32> to vector<16x32xf32>
    %377 = vector.extract_strided_slice %375 {offsets = [0, 32], sizes = [16, 32], strides = [1, 1]} : vector<16x96xf32> to vector<16x32xf32>
    %378 = vector.extract_strided_slice %375 {offsets = [0, 64], sizes = [16, 32], strides = [1, 1]} : vector<16x96xf32> to vector<16x32xf32>
    %379 = vector.extract_strided_slice %376 {offsets = [0, 0], sizes = [8, 16], strides = [1, 1]} : vector<16x32xf32> to vector<8x16xf32>
    %380 = vector.extract_strided_slice %377 {offsets = [0, 0], sizes = [8, 16], strides = [1, 1]} : vector<16x32xf32> to vector<8x16xf32>
    %381 = vector.extract_strided_slice %378 {offsets = [0, 0], sizes = [8, 16], strides = [1, 1]} : vector<16x32xf32> to vector<8x16xf32>
    %382 = arith.truncf %379 : vector<8x16xf32> to vector<8x16xbf16>
    %383 = arith.truncf %380 : vector<8x16xf32> to vector<8x16xbf16>
    %cst_101 = arith.constant dense<0.000000e+00> : vector<8x8xf32>
    %384 = tpu.matmul %382, %383, %cst_101 {dimension_numbers = #tpu.dot_dimension_numbers<[1], [1], [0], [0], [0, 0, 1, 0], [], []>} : vector<8x16xbf16>, vector<8x16xbf16>, vector<8x8xf32> -> vector<8x8xf32>
    %cst_102 = arith.constant 2.500000e-01 : f32
    %385 = vector.broadcast %cst_102 : f32 to vector<8x8xf32>
    %386 = arith.mulf %384, %385 : vector<8x8xf32>
    %cst_103 = arith.constant -1.000000e+30 : f32
    %387 = vector.broadcast %cst_103 : f32 to vector<8x8xf32>
    %388 = arith.select %368, %386, %387 : vector<8x8xi1>, vector<8x8xf32>
    %cst_104 = arith.constant dense<0xFF800000> : vector<8xf32>
    %389 = vector.multi_reduction <maximumf>, %388, %cst_104 [1] : vector<8x8xf32> to vector<8xf32>
    %390 = vector.shape_cast %389 : vector<8xf32> to vector<8x1xf32>
    %391 = vector.broadcast %390 : vector<8x1xf32> to vector<8x8xf32>
    %392 = arith.subf %388, %391 : vector<8x8xf32>
    %393 = math.exp %392 : vector<8x8xf32>
    %cst_105 = arith.constant dense<0.000000e+00> : vector<8xf32>
    %394 = vector.multi_reduction <add>, %393, %cst_105 [1] : vector<8x8xf32> to vector<8xf32>
    %395 = vector.shape_cast %394 : vector<8xf32> to vector<8x1xf32>
    %396 = tpu.reciprocal %395 {approx = true} : vector<8x1xf32> -> vector<8x1xf32>
    %397 = vector.broadcast %396 : vector<8x1xf32> to vector<8x8xf32>
    %398 = arith.mulf %393, %397 : vector<8x8xf32>
    %399 = arith.truncf %398 : vector<8x8xf32> to vector<8x8xbf16>
    %400 = arith.truncf %381 : vector<8x16xf32> to vector<8x16xbf16>
    %cst_106 = arith.constant dense<0.000000e+00> : vector<8x16xf32>
    %401 = tpu.matmul %399, %400, %cst_106 {dimension_numbers = #tpu.dot_dimension_numbers<[1], [0], [0], [1], [0, 0, 1, 1], [], []>} : vector<8x8xbf16>, vector<8x16xbf16>, vector<8x16xf32> -> vector<8x16xf32>
    %402 = vector.extract_strided_slice %376 {offsets = [0, 16], sizes = [8, 16], strides = [1, 1]} : vector<16x32xf32> to vector<8x16xf32>
    %403 = vector.extract_strided_slice %377 {offsets = [0, 16], sizes = [8, 16], strides = [1, 1]} : vector<16x32xf32> to vector<8x16xf32>
    %404 = vector.extract_strided_slice %378 {offsets = [0, 16], sizes = [8, 16], strides = [1, 1]} : vector<16x32xf32> to vector<8x16xf32>
    %405 = arith.truncf %402 : vector<8x16xf32> to vector<8x16xbf16>
    %406 = arith.truncf %403 : vector<8x16xf32> to vector<8x16xbf16>
    %cst_107 = arith.constant dense<0.000000e+00> : vector<8x8xf32>
    %407 = tpu.matmul %405, %406, %cst_107 {dimension_numbers = #tpu.dot_dimension_numbers<[1], [1], [0], [0], [0, 0, 1, 0], [], []>} : vector<8x16xbf16>, vector<8x16xbf16>, vector<8x8xf32> -> vector<8x8xf32>
    %cst_108 = arith.constant 2.500000e-01 : f32
    %408 = vector.broadcast %cst_108 : f32 to vector<8x8xf32>
    %409 = arith.mulf %407, %408 : vector<8x8xf32>
    %cst_109 = arith.constant -1.000000e+30 : f32
    %410 = vector.broadcast %cst_109 : f32 to vector<8x8xf32>
    %411 = arith.select %368, %409, %410 : vector<8x8xi1>, vector<8x8xf32>
    %cst_110 = arith.constant dense<0xFF800000> : vector<8xf32>
    %412 = vector.multi_reduction <maximumf>, %411, %cst_110 [1] : vector<8x8xf32> to vector<8xf32>
    %413 = vector.shape_cast %412 : vector<8xf32> to vector<8x1xf32>
    %414 = vector.broadcast %413 : vector<8x1xf32> to vector<8x8xf32>
    %415 = arith.subf %411, %414 : vector<8x8xf32>
    %416 = math.exp %415 : vector<8x8xf32>
    %cst_111 = arith.constant dense<0.000000e+00> : vector<8xf32>
    %417 = vector.multi_reduction <add>, %416, %cst_111 [1] : vector<8x8xf32> to vector<8xf32>
    %418 = vector.shape_cast %417 : vector<8xf32> to vector<8x1xf32>
    %419 = tpu.reciprocal %418 {approx = true} : vector<8x1xf32> -> vector<8x1xf32>
    %420 = vector.broadcast %419 : vector<8x1xf32> to vector<8x8xf32>
    %421 = arith.mulf %416, %420 : vector<8x8xf32>
    %422 = arith.truncf %421 : vector<8x8xf32> to vector<8x8xbf16>
    %423 = arith.truncf %404 : vector<8x16xf32> to vector<8x16xbf16>
    %cst_112 = arith.constant dense<0.000000e+00> : vector<8x16xf32>
    %424 = tpu.matmul %422, %423, %cst_112 {dimension_numbers = #tpu.dot_dimension_numbers<[1], [0], [0], [1], [0, 0, 1, 1], [], []>} : vector<8x8xbf16>, vector<8x16xbf16>, vector<8x16xf32> -> vector<8x16xf32>
    %425 = tpu.concatenate %401, %424 in 1 : vector<8x16xf32>, vector<8x16xf32> -> vector<8x32xf32>
    %426 = vector.extract_strided_slice %376 {offsets = [8, 0], sizes = [8, 16], strides = [1, 1]} : vector<16x32xf32> to vector<8x16xf32>
    %427 = vector.extract_strided_slice %377 {offsets = [8, 0], sizes = [8, 16], strides = [1, 1]} : vector<16x32xf32> to vector<8x16xf32>
    %428 = vector.extract_strided_slice %378 {offsets = [8, 0], sizes = [8, 16], strides = [1, 1]} : vector<16x32xf32> to vector<8x16xf32>
    %429 = arith.truncf %426 : vector<8x16xf32> to vector<8x16xbf16>
    %430 = arith.truncf %427 : vector<8x16xf32> to vector<8x16xbf16>
    %cst_113 = arith.constant dense<0.000000e+00> : vector<8x8xf32>
    %431 = tpu.matmul %429, %430, %cst_113 {dimension_numbers = #tpu.dot_dimension_numbers<[1], [1], [0], [0], [0, 0, 1, 0], [], []>} : vector<8x16xbf16>, vector<8x16xbf16>, vector<8x8xf32> -> vector<8x8xf32>
    %cst_114 = arith.constant 2.500000e-01 : f32
    %432 = vector.broadcast %cst_114 : f32 to vector<8x8xf32>
    %433 = arith.mulf %431, %432 : vector<8x8xf32>
    %cst_115 = arith.constant -1.000000e+30 : f32
    %434 = vector.broadcast %cst_115 : f32 to vector<8x8xf32>
    %435 = arith.select %368, %433, %434 : vector<8x8xi1>, vector<8x8xf32>
    %cst_116 = arith.constant dense<0xFF800000> : vector<8xf32>
    %436 = vector.multi_reduction <maximumf>, %435, %cst_116 [1] : vector<8x8xf32> to vector<8xf32>
    %437 = vector.shape_cast %436 : vector<8xf32> to vector<8x1xf32>
    %438 = vector.broadcast %437 : vector<8x1xf32> to vector<8x8xf32>
    %439 = arith.subf %435, %438 : vector<8x8xf32>
    %440 = math.exp %439 : vector<8x8xf32>
    %cst_117 = arith.constant dense<0.000000e+00> : vector<8xf32>
    %441 = vector.multi_reduction <add>, %440, %cst_117 [1] : vector<8x8xf32> to vector<8xf32>
    %442 = vector.shape_cast %441 : vector<8xf32> to vector<8x1xf32>
    %443 = tpu.reciprocal %442 {approx = true} : vector<8x1xf32> -> vector<8x1xf32>
    %444 = vector.broadcast %443 : vector<8x1xf32> to vector<8x8xf32>
    %445 = arith.mulf %440, %444 : vector<8x8xf32>
    %446 = arith.truncf %445 : vector<8x8xf32> to vector<8x8xbf16>
    %447 = arith.truncf %428 : vector<8x16xf32> to vector<8x16xbf16>
    %cst_118 = arith.constant dense<0.000000e+00> : vector<8x16xf32>
    %448 = tpu.matmul %446, %447, %cst_118 {dimension_numbers = #tpu.dot_dimension_numbers<[1], [0], [0], [1], [0, 0, 1, 1], [], []>} : vector<8x8xbf16>, vector<8x16xbf16>, vector<8x16xf32> -> vector<8x16xf32>
    %449 = vector.extract_strided_slice %376 {offsets = [8, 16], sizes = [8, 16], strides = [1, 1]} : vector<16x32xf32> to vector<8x16xf32>
    %450 = vector.extract_strided_slice %377 {offsets = [8, 16], sizes = [8, 16], strides = [1, 1]} : vector<16x32xf32> to vector<8x16xf32>
    %451 = vector.extract_strided_slice %378 {offsets = [8, 16], sizes = [8, 16], strides = [1, 1]} : vector<16x32xf32> to vector<8x16xf32>
    %452 = arith.truncf %449 : vector<8x16xf32> to vector<8x16xbf16>
    %453 = arith.truncf %450 : vector<8x16xf32> to vector<8x16xbf16>
    %cst_119 = arith.constant dense<0.000000e+00> : vector<8x8xf32>
    %454 = tpu.matmul %452, %453, %cst_119 {dimension_numbers = #tpu.dot_dimension_numbers<[1], [1], [0], [0], [0, 0, 1, 0], [], []>} : vector<8x16xbf16>, vector<8x16xbf16>, vector<8x8xf32> -> vector<8x8xf32>
    %cst_120 = arith.constant 2.500000e-01 : f32
    %455 = vector.broadcast %cst_120 : f32 to vector<8x8xf32>
    %456 = arith.mulf %454, %455 : vector<8x8xf32>
    %cst_121 = arith.constant -1.000000e+30 : f32
    %457 = vector.broadcast %cst_121 : f32 to vector<8x8xf32>
    %458 = arith.select %368, %456, %457 : vector<8x8xi1>, vector<8x8xf32>
    %cst_122 = arith.constant dense<0xFF800000> : vector<8xf32>
    %459 = vector.multi_reduction <maximumf>, %458, %cst_122 [1] : vector<8x8xf32> to vector<8xf32>
    %460 = vector.shape_cast %459 : vector<8xf32> to vector<8x1xf32>
    %461 = vector.broadcast %460 : vector<8x1xf32> to vector<8x8xf32>
    %462 = arith.subf %458, %461 : vector<8x8xf32>
    %463 = math.exp %462 : vector<8x8xf32>
    %cst_123 = arith.constant dense<0.000000e+00> : vector<8xf32>
    %464 = vector.multi_reduction <add>, %463, %cst_123 [1] : vector<8x8xf32> to vector<8xf32>
    %465 = vector.shape_cast %464 : vector<8xf32> to vector<8x1xf32>
    %466 = tpu.reciprocal %465 {approx = true} : vector<8x1xf32> -> vector<8x1xf32>
    %467 = vector.broadcast %466 : vector<8x1xf32> to vector<8x8xf32>
    %468 = arith.mulf %463, %467 : vector<8x8xf32>
    %469 = arith.truncf %468 : vector<8x8xf32> to vector<8x8xbf16>
    %470 = arith.truncf %451 : vector<8x16xf32> to vector<8x16xbf16>
    %cst_124 = arith.constant dense<0.000000e+00> : vector<8x16xf32>
    %471 = tpu.matmul %469, %470, %cst_124 {dimension_numbers = #tpu.dot_dimension_numbers<[1], [0], [0], [1], [0, 0, 1, 1], [], []>} : vector<8x8xbf16>, vector<8x16xbf16>, vector<8x16xf32> -> vector<8x16xf32>
    %472 = tpu.concatenate %448, %471 in 1 : vector<8x16xf32>, vector<8x16xf32> -> vector<8x32xf32>
    %473 = tpu.concatenate %425, %472 in 0 : vector<8x32xf32>, vector<8x32xf32> -> vector<16x32xf32>
    %c592 = arith.constant 592 : index
    %c0_125 = arith.constant 0 : index
    %474 = vector.load %arg2[%c592, %c0_125] : memref<1264x128xf32, #tpu.memory_space<vmem>>, vector<32x32xf32>
    %475 = arith.truncf %473 : vector<16x32xf32> to vector<16x32xbf16>
    %476 = arith.truncf %474 : vector<32x32xf32> to vector<32x32xbf16>
    %cst_126 = arith.constant dense<0.000000e+00> : vector<16x32xf32>
    %477 = tpu.matmul %475, %476, %cst_126 {dimension_numbers = #tpu.dot_dimension_numbers<[1], [0], [0], [1], [0, 0, 1, 1], [], []>} : vector<16x32xbf16>, vector<32x32xbf16>, vector<16x32xf32> -> vector<16x32xf32>
    %c624 = arith.constant 624 : index
    %c0_127 = arith.constant 0 : index
    %478 = vector.load %arg2[%c624, %c0_127] : memref<1264x128xf32, #tpu.memory_space<vmem>>, vector<1x32xf32>
    %479 = vector.broadcast %478 : vector<1x32xf32> to vector<16x32xf32>
    %480 = arith.addf %477, %479 : vector<16x32xf32>
    %c632 = arith.constant 632 : index
    %c0_128 = arith.constant 0 : index
    %481 = vector.load %arg2[%c632, %c0_128] : memref<1264x128xf32, #tpu.memory_space<vmem>>, vector<2x32xf32>
    %482 = arith.addf %21, %480 : vector<16x32xf32>
    %cst_129 = arith.constant dense<0.000000e+00> : vector<16xf32>
    %483 = vector.multi_reduction <add>, %482, %cst_129 [1] : vector<16x32xf32> to vector<16xf32>
    %484 = vector.shape_cast %483 : vector<16xf32> to vector<16x1xf32>
    %cst_130 = arith.constant 3.200000e+01 : f32
    %485 = vector.broadcast %cst_130 : f32 to vector<16x1xf32>
    %486 = arith.divf %484, %485 : vector<16x1xf32>
    %487 = vector.broadcast %486 : vector<16x1xf32> to vector<16x32xf32>
    %488 = arith.subf %482, %487 : vector<16x32xf32>
    %489 = arith.mulf %488, %488 : vector<16x32xf32>
    %cst_131 = arith.constant dense<0.000000e+00> : vector<16xf32>
    %490 = vector.multi_reduction <add>, %489, %cst_131 [1] : vector<16x32xf32> to vector<16xf32>
    %491 = vector.shape_cast %490 : vector<16xf32> to vector<16x1xf32>
    %cst_132 = arith.constant 3.200000e+01 : f32
    %492 = vector.broadcast %cst_132 : f32 to vector<16x1xf32>
    %493 = arith.divf %491, %492 : vector<16x1xf32>
    %494 = vector.broadcast %486 : vector<16x1xf32> to vector<16x32xf32>
    %495 = arith.subf %482, %494 : vector<16x32xf32>
    %cst_133 = arith.constant 9.99999974E-6 : f32
    %496 = vector.broadcast %cst_133 : f32 to vector<16x1xf32>
    %497 = arith.addf %493, %496 : vector<16x1xf32>
    %498 = math.rsqrt %497 : vector<16x1xf32>
    %499 = vector.broadcast %498 : vector<16x1xf32> to vector<16x32xf32>
    %500 = arith.mulf %495, %499 : vector<16x32xf32>
    %501 = vector.extract_strided_slice %481 {offsets = [0, 0], sizes = [1, 32], strides = [1, 1]} : vector<2x32xf32> to vector<1x32xf32>
    %502 = vector.broadcast %501 : vector<1x32xf32> to vector<16x32xf32>
    %503 = arith.mulf %500, %502 : vector<16x32xf32>
    %504 = vector.extract_strided_slice %481 {offsets = [1, 0], sizes = [1, 32], strides = [1, 1]} : vector<2x32xf32> to vector<1x32xf32>
    %505 = vector.broadcast %504 : vector<1x32xf32> to vector<16x32xf32>
    %506 = arith.addf %503, %505 : vector<16x32xf32>
    %c640 = arith.constant 640 : index
    %c0_134 = arith.constant 0 : index
    %507 = vector.load %arg2[%c640, %c0_134] : memref<1264x128xf32, #tpu.memory_space<vmem>>, vector<32x32xf32>
    %508 = arith.truncf %506 : vector<16x32xf32> to vector<16x32xbf16>
    %509 = arith.truncf %507 : vector<32x32xf32> to vector<32x32xbf16>
    %cst_135 = arith.constant dense<0.000000e+00> : vector<16x32xf32>
    %510 = tpu.matmul %508, %509, %cst_135 {dimension_numbers = #tpu.dot_dimension_numbers<[1], [0], [0], [1], [0, 0, 1, 1], [], []>} : vector<16x32xbf16>, vector<32x32xbf16>, vector<16x32xf32> -> vector<16x32xf32>
    %c672 = arith.constant 672 : index
    %c0_136 = arith.constant 0 : index
    %511 = vector.load %arg2[%c672, %c0_136] : memref<1264x128xf32, #tpu.memory_space<vmem>>, vector<1x32xf32>
    %512 = vector.broadcast %511 : vector<1x32xf32> to vector<16x32xf32>
    %513 = arith.addf %510, %512 : vector<16x32xf32>
    %c680 = arith.constant 680 : index
    %c0_137 = arith.constant 0 : index
    %514 = vector.load %arg2[%c680, %c0_137] : memref<1264x128xf32, #tpu.memory_space<vmem>>, vector<32x64xf32>
    %515 = arith.truncf %365 : vector<16x32xf32> to vector<16x32xbf16>
    %516 = arith.truncf %514 : vector<32x64xf32> to vector<32x64xbf16>
    %cst_138 = arith.constant dense<0.000000e+00> : vector<16x64xf32>
    %517 = tpu.matmul %515, %516, %cst_138 {dimension_numbers = #tpu.dot_dimension_numbers<[1], [0], [0], [1], [0, 0, 1, 1], [], []>} : vector<16x32xbf16>, vector<32x64xbf16>, vector<16x64xf32> -> vector<16x64xf32>
    %c712 = arith.constant 712 : index
    %c0_139 = arith.constant 0 : index
    %518 = vector.load %arg2[%c712, %c0_139] : memref<1264x128xf32, #tpu.memory_space<vmem>>, vector<1x64xf32>
    %519 = vector.broadcast %518 : vector<1x64xf32> to vector<16x64xf32>
    %520 = arith.addf %517, %519 : vector<16x64xf32>
    %521 = vector.extract_strided_slice %520 {offsets = [0, 0], sizes = [16, 32], strides = [1, 1]} : vector<16x64xf32> to vector<16x32xf32>
    %522 = vector.extract_strided_slice %520 {offsets = [0, 32], sizes = [16, 32], strides = [1, 1]} : vector<16x64xf32> to vector<16x32xf32>
    %523 = vector.extract_strided_slice %513 {offsets = [0, 0], sizes = [8, 16], strides = [1, 1]} : vector<16x32xf32> to vector<8x16xf32>
    %524 = vector.extract_strided_slice %521 {offsets = [0, 0], sizes = [8, 16], strides = [1, 1]} : vector<16x32xf32> to vector<8x16xf32>
    %525 = vector.extract_strided_slice %522 {offsets = [0, 0], sizes = [8, 16], strides = [1, 1]} : vector<16x32xf32> to vector<8x16xf32>
    %526 = arith.truncf %523 : vector<8x16xf32> to vector<8x16xbf16>
    %527 = arith.truncf %524 : vector<8x16xf32> to vector<8x16xbf16>
    %cst_140 = arith.constant dense<0.000000e+00> : vector<8x8xf32>
    %528 = tpu.matmul %526, %527, %cst_140 {dimension_numbers = #tpu.dot_dimension_numbers<[1], [1], [0], [0], [0, 0, 1, 0], [], []>} : vector<8x16xbf16>, vector<8x16xbf16>, vector<8x8xf32> -> vector<8x8xf32>
    %cst_141 = arith.constant 2.500000e-01 : f32
    %529 = vector.broadcast %cst_141 : f32 to vector<8x8xf32>
    %530 = arith.mulf %528, %529 : vector<8x8xf32>
    %cst_142 = arith.constant dense<0xFF800000> : vector<8xf32>
    %531 = vector.multi_reduction <maximumf>, %530, %cst_142 [1] : vector<8x8xf32> to vector<8xf32>
    %532 = vector.shape_cast %531 : vector<8xf32> to vector<8x1xf32>
    %533 = vector.broadcast %532 : vector<8x1xf32> to vector<8x8xf32>
    %534 = arith.subf %530, %533 : vector<8x8xf32>
    %535 = math.exp %534 : vector<8x8xf32>
    %cst_143 = arith.constant dense<0.000000e+00> : vector<8xf32>
    %536 = vector.multi_reduction <add>, %535, %cst_143 [1] : vector<8x8xf32> to vector<8xf32>
    %537 = vector.shape_cast %536 : vector<8xf32> to vector<8x1xf32>
    %538 = tpu.reciprocal %537 {approx = true} : vector<8x1xf32> -> vector<8x1xf32>
    %539 = vector.broadcast %538 : vector<8x1xf32> to vector<8x8xf32>
    %540 = arith.mulf %535, %539 : vector<8x8xf32>
    %541 = arith.truncf %540 : vector<8x8xf32> to vector<8x8xbf16>
    %542 = arith.truncf %525 : vector<8x16xf32> to vector<8x16xbf16>
    %cst_144 = arith.constant dense<0.000000e+00> : vector<8x16xf32>
    %543 = tpu.matmul %541, %542, %cst_144 {dimension_numbers = #tpu.dot_dimension_numbers<[1], [0], [0], [1], [0, 0, 1, 1], [], []>} : vector<8x8xbf16>, vector<8x16xbf16>, vector<8x16xf32> -> vector<8x16xf32>
    %544 = vector.extract_strided_slice %513 {offsets = [0, 16], sizes = [8, 16], strides = [1, 1]} : vector<16x32xf32> to vector<8x16xf32>
    %545 = vector.extract_strided_slice %521 {offsets = [0, 16], sizes = [8, 16], strides = [1, 1]} : vector<16x32xf32> to vector<8x16xf32>
    %546 = vector.extract_strided_slice %522 {offsets = [0, 16], sizes = [8, 16], strides = [1, 1]} : vector<16x32xf32> to vector<8x16xf32>
    %547 = arith.truncf %544 : vector<8x16xf32> to vector<8x16xbf16>
    %548 = arith.truncf %545 : vector<8x16xf32> to vector<8x16xbf16>
    %cst_145 = arith.constant dense<0.000000e+00> : vector<8x8xf32>
    %549 = tpu.matmul %547, %548, %cst_145 {dimension_numbers = #tpu.dot_dimension_numbers<[1], [1], [0], [0], [0, 0, 1, 0], [], []>} : vector<8x16xbf16>, vector<8x16xbf16>, vector<8x8xf32> -> vector<8x8xf32>
    %cst_146 = arith.constant 2.500000e-01 : f32
    %550 = vector.broadcast %cst_146 : f32 to vector<8x8xf32>
    %551 = arith.mulf %549, %550 : vector<8x8xf32>
    %cst_147 = arith.constant dense<0xFF800000> : vector<8xf32>
    %552 = vector.multi_reduction <maximumf>, %551, %cst_147 [1] : vector<8x8xf32> to vector<8xf32>
    %553 = vector.shape_cast %552 : vector<8xf32> to vector<8x1xf32>
    %554 = vector.broadcast %553 : vector<8x1xf32> to vector<8x8xf32>
    %555 = arith.subf %551, %554 : vector<8x8xf32>
    %556 = math.exp %555 : vector<8x8xf32>
    %cst_148 = arith.constant dense<0.000000e+00> : vector<8xf32>
    %557 = vector.multi_reduction <add>, %556, %cst_148 [1] : vector<8x8xf32> to vector<8xf32>
    %558 = vector.shape_cast %557 : vector<8xf32> to vector<8x1xf32>
    %559 = tpu.reciprocal %558 {approx = true} : vector<8x1xf32> -> vector<8x1xf32>
    %560 = vector.broadcast %559 : vector<8x1xf32> to vector<8x8xf32>
    %561 = arith.mulf %556, %560 : vector<8x8xf32>
    %562 = arith.truncf %561 : vector<8x8xf32> to vector<8x8xbf16>
    %563 = arith.truncf %546 : vector<8x16xf32> to vector<8x16xbf16>
    %cst_149 = arith.constant dense<0.000000e+00> : vector<8x16xf32>
    %564 = tpu.matmul %562, %563, %cst_149 {dimension_numbers = #tpu.dot_dimension_numbers<[1], [0], [0], [1], [0, 0, 1, 1], [], []>} : vector<8x8xbf16>, vector<8x16xbf16>, vector<8x16xf32> -> vector<8x16xf32>
    %565 = tpu.concatenate %543, %564 in 1 : vector<8x16xf32>, vector<8x16xf32> -> vector<8x32xf32>
    %566 = vector.extract_strided_slice %513 {offsets = [8, 0], sizes = [8, 16], strides = [1, 1]} : vector<16x32xf32> to vector<8x16xf32>
    %567 = vector.extract_strided_slice %521 {offsets = [8, 0], sizes = [8, 16], strides = [1, 1]} : vector<16x32xf32> to vector<8x16xf32>
    %568 = vector.extract_strided_slice %522 {offsets = [8, 0], sizes = [8, 16], strides = [1, 1]} : vector<16x32xf32> to vector<8x16xf32>
    %569 = arith.truncf %566 : vector<8x16xf32> to vector<8x16xbf16>
    %570 = arith.truncf %567 : vector<8x16xf32> to vector<8x16xbf16>
    %cst_150 = arith.constant dense<0.000000e+00> : vector<8x8xf32>
    %571 = tpu.matmul %569, %570, %cst_150 {dimension_numbers = #tpu.dot_dimension_numbers<[1], [1], [0], [0], [0, 0, 1, 0], [], []>} : vector<8x16xbf16>, vector<8x16xbf16>, vector<8x8xf32> -> vector<8x8xf32>
    %cst_151 = arith.constant 2.500000e-01 : f32
    %572 = vector.broadcast %cst_151 : f32 to vector<8x8xf32>
    %573 = arith.mulf %571, %572 : vector<8x8xf32>
    %cst_152 = arith.constant dense<0xFF800000> : vector<8xf32>
    %574 = vector.multi_reduction <maximumf>, %573, %cst_152 [1] : vector<8x8xf32> to vector<8xf32>
    %575 = vector.shape_cast %574 : vector<8xf32> to vector<8x1xf32>
    %576 = vector.broadcast %575 : vector<8x1xf32> to vector<8x8xf32>
    %577 = arith.subf %573, %576 : vector<8x8xf32>
    %578 = math.exp %577 : vector<8x8xf32>
    %cst_153 = arith.constant dense<0.000000e+00> : vector<8xf32>
    %579 = vector.multi_reduction <add>, %578, %cst_153 [1] : vector<8x8xf32> to vector<8xf32>
    %580 = vector.shape_cast %579 : vector<8xf32> to vector<8x1xf32>
    %581 = tpu.reciprocal %580 {approx = true} : vector<8x1xf32> -> vector<8x1xf32>
    %582 = vector.broadcast %581 : vector<8x1xf32> to vector<8x8xf32>
    %583 = arith.mulf %578, %582 : vector<8x8xf32>
    %584 = arith.truncf %583 : vector<8x8xf32> to vector<8x8xbf16>
    %585 = arith.truncf %568 : vector<8x16xf32> to vector<8x16xbf16>
    %cst_154 = arith.constant dense<0.000000e+00> : vector<8x16xf32>
    %586 = tpu.matmul %584, %585, %cst_154 {dimension_numbers = #tpu.dot_dimension_numbers<[1], [0], [0], [1], [0, 0, 1, 1], [], []>} : vector<8x8xbf16>, vector<8x16xbf16>, vector<8x16xf32> -> vector<8x16xf32>
    %587 = vector.extract_strided_slice %513 {offsets = [8, 16], sizes = [8, 16], strides = [1, 1]} : vector<16x32xf32> to vector<8x16xf32>
    %588 = vector.extract_strided_slice %521 {offsets = [8, 16], sizes = [8, 16], strides = [1, 1]} : vector<16x32xf32> to vector<8x16xf32>
    %589 = vector.extract_strided_slice %522 {offsets = [8, 16], sizes = [8, 16], strides = [1, 1]} : vector<16x32xf32> to vector<8x16xf32>
    %590 = arith.truncf %587 : vector<8x16xf32> to vector<8x16xbf16>
    %591 = arith.truncf %588 : vector<8x16xf32> to vector<8x16xbf16>
    %cst_155 = arith.constant dense<0.000000e+00> : vector<8x8xf32>
    %592 = tpu.matmul %590, %591, %cst_155 {dimension_numbers = #tpu.dot_dimension_numbers<[1], [1], [0], [0], [0, 0, 1, 0], [], []>} : vector<8x16xbf16>, vector<8x16xbf16>, vector<8x8xf32> -> vector<8x8xf32>
    %cst_156 = arith.constant 2.500000e-01 : f32
    %593 = vector.broadcast %cst_156 : f32 to vector<8x8xf32>
    %594 = arith.mulf %592, %593 : vector<8x8xf32>
    %cst_157 = arith.constant dense<0xFF800000> : vector<8xf32>
    %595 = vector.multi_reduction <maximumf>, %594, %cst_157 [1] : vector<8x8xf32> to vector<8xf32>
    %596 = vector.shape_cast %595 : vector<8xf32> to vector<8x1xf32>
    %597 = vector.broadcast %596 : vector<8x1xf32> to vector<8x8xf32>
    %598 = arith.subf %594, %597 : vector<8x8xf32>
    %599 = math.exp %598 : vector<8x8xf32>
    %cst_158 = arith.constant dense<0.000000e+00> : vector<8xf32>
    %600 = vector.multi_reduction <add>, %599, %cst_158 [1] : vector<8x8xf32> to vector<8xf32>
    %601 = vector.shape_cast %600 : vector<8xf32> to vector<8x1xf32>
    %602 = tpu.reciprocal %601 {approx = true} : vector<8x1xf32> -> vector<8x1xf32>
    %603 = vector.broadcast %602 : vector<8x1xf32> to vector<8x8xf32>
    %604 = arith.mulf %599, %603 : vector<8x8xf32>
    %605 = arith.truncf %604 : vector<8x8xf32> to vector<8x8xbf16>
    %606 = arith.truncf %589 : vector<8x16xf32> to vector<8x16xbf16>
    %cst_159 = arith.constant dense<0.000000e+00> : vector<8x16xf32>
    %607 = tpu.matmul %605, %606, %cst_159 {dimension_numbers = #tpu.dot_dimension_numbers<[1], [0], [0], [1], [0, 0, 1, 1], [], []>} : vector<8x8xbf16>, vector<8x16xbf16>, vector<8x16xf32> -> vector<8x16xf32>
    %608 = tpu.concatenate %586, %607 in 1 : vector<8x16xf32>, vector<8x16xf32> -> vector<8x32xf32>
    %609 = tpu.concatenate %565, %608 in 0 : vector<8x32xf32>, vector<8x32xf32> -> vector<16x32xf32>
    %c720 = arith.constant 720 : index
    %c0_160 = arith.constant 0 : index
    %610 = vector.load %arg2[%c720, %c0_160] : memref<1264x128xf32, #tpu.memory_space<vmem>>, vector<32x32xf32>
    %611 = arith.truncf %609 : vector<16x32xf32> to vector<16x32xbf16>
    %612 = arith.truncf %610 : vector<32x32xf32> to vector<32x32xbf16>
    %cst_161 = arith.constant dense<0.000000e+00> : vector<16x32xf32>
    %613 = tpu.matmul %611, %612, %cst_161 {dimension_numbers = #tpu.dot_dimension_numbers<[1], [0], [0], [1], [0, 0, 1, 1], [], []>} : vector<16x32xbf16>, vector<32x32xbf16>, vector<16x32xf32> -> vector<16x32xf32>
    %c752 = arith.constant 752 : index
    %c0_162 = arith.constant 0 : index
    %614 = vector.load %arg2[%c752, %c0_162] : memref<1264x128xf32, #tpu.memory_space<vmem>>, vector<1x32xf32>
    %615 = vector.broadcast %614 : vector<1x32xf32> to vector<16x32xf32>
    %616 = arith.addf %613, %615 : vector<16x32xf32>
    %c760 = arith.constant 760 : index
    %c0_163 = arith.constant 0 : index
    %617 = vector.load %arg2[%c760, %c0_163] : memref<1264x128xf32, #tpu.memory_space<vmem>>, vector<2x32xf32>
    %618 = arith.addf %506, %616 : vector<16x32xf32>
    %cst_164 = arith.constant dense<0.000000e+00> : vector<16xf32>
    %619 = vector.multi_reduction <add>, %618, %cst_164 [1] : vector<16x32xf32> to vector<16xf32>
    %620 = vector.shape_cast %619 : vector<16xf32> to vector<16x1xf32>
    %cst_165 = arith.constant 3.200000e+01 : f32
    %621 = vector.broadcast %cst_165 : f32 to vector<16x1xf32>
    %622 = arith.divf %620, %621 : vector<16x1xf32>
    %623 = vector.broadcast %622 : vector<16x1xf32> to vector<16x32xf32>
    %624 = arith.subf %618, %623 : vector<16x32xf32>
    %625 = arith.mulf %624, %624 : vector<16x32xf32>
    %cst_166 = arith.constant dense<0.000000e+00> : vector<16xf32>
    %626 = vector.multi_reduction <add>, %625, %cst_166 [1] : vector<16x32xf32> to vector<16xf32>
    %627 = vector.shape_cast %626 : vector<16xf32> to vector<16x1xf32>
    %cst_167 = arith.constant 3.200000e+01 : f32
    %628 = vector.broadcast %cst_167 : f32 to vector<16x1xf32>
    %629 = arith.divf %627, %628 : vector<16x1xf32>
    %630 = vector.broadcast %622 : vector<16x1xf32> to vector<16x32xf32>
    %631 = arith.subf %618, %630 : vector<16x32xf32>
    %cst_168 = arith.constant 9.99999974E-6 : f32
    %632 = vector.broadcast %cst_168 : f32 to vector<16x1xf32>
    %633 = arith.addf %629, %632 : vector<16x1xf32>
    %634 = math.rsqrt %633 : vector<16x1xf32>
    %635 = vector.broadcast %634 : vector<16x1xf32> to vector<16x32xf32>
    %636 = arith.mulf %631, %635 : vector<16x32xf32>
    %637 = vector.extract_strided_slice %617 {offsets = [0, 0], sizes = [1, 32], strides = [1, 1]} : vector<2x32xf32> to vector<1x32xf32>
    %638 = vector.broadcast %637 : vector<1x32xf32> to vector<16x32xf32>
    %639 = arith.mulf %636, %638 : vector<16x32xf32>
    %640 = vector.extract_strided_slice %617 {offsets = [1, 0], sizes = [1, 32], strides = [1, 1]} : vector<2x32xf32> to vector<1x32xf32>
    %641 = vector.broadcast %640 : vector<1x32xf32> to vector<16x32xf32>
    %642 = arith.addf %639, %641 : vector<16x32xf32>
    %c768 = arith.constant 768 : index
    %c0_169 = arith.constant 0 : index
    %643 = vector.load %arg2[%c768, %c0_169] : memref<1264x128xf32, #tpu.memory_space<vmem>>, vector<32x64xf32>
    %644 = arith.truncf %642 : vector<16x32xf32> to vector<16x32xbf16>
    %645 = arith.truncf %643 : vector<32x64xf32> to vector<32x64xbf16>
    %cst_170 = arith.constant dense<0.000000e+00> : vector<16x64xf32>
    %646 = tpu.matmul %644, %645, %cst_170 {dimension_numbers = #tpu.dot_dimension_numbers<[1], [0], [0], [1], [0, 0, 1, 1], [], []>} : vector<16x32xbf16>, vector<32x64xbf16>, vector<16x64xf32> -> vector<16x64xf32>
    %c800 = arith.constant 800 : index
    %c0_171 = arith.constant 0 : index
    %647 = vector.load %arg2[%c800, %c0_171] : memref<1264x128xf32, #tpu.memory_space<vmem>>, vector<1x64xf32>
    %648 = vector.broadcast %647 : vector<1x64xf32> to vector<16x64xf32>
    %649 = arith.addf %646, %648 : vector<16x64xf32>
    %cst_172 = arith.constant 0.000000e+00 : f32
    %650 = vector.broadcast %cst_172 : f32 to vector<16x64xf32>
    %651 = arith.maximumf %649, %650 : vector<16x64xf32>
    %c808 = arith.constant 808 : index
    %c0_173 = arith.constant 0 : index
    %652 = vector.load %arg2[%c808, %c0_173] : memref<1264x128xf32, #tpu.memory_space<vmem>>, vector<64x32xf32>
    %653 = arith.truncf %651 : vector<16x64xf32> to vector<16x64xbf16>
    %654 = arith.truncf %652 : vector<64x32xf32> to vector<64x32xbf16>
    %cst_174 = arith.constant dense<0.000000e+00> : vector<16x32xf32>
    %655 = tpu.matmul %653, %654, %cst_174 {dimension_numbers = #tpu.dot_dimension_numbers<[1], [0], [0], [1], [0, 0, 1, 1], [], []>} : vector<16x64xbf16>, vector<64x32xbf16>, vector<16x32xf32> -> vector<16x32xf32>
    %c872 = arith.constant 872 : index
    %c0_175 = arith.constant 0 : index
    %656 = vector.load %arg2[%c872, %c0_175] : memref<1264x128xf32, #tpu.memory_space<vmem>>, vector<1x32xf32>
    %657 = vector.broadcast %656 : vector<1x32xf32> to vector<16x32xf32>
    %658 = arith.addf %655, %657 : vector<16x32xf32>
    %c880 = arith.constant 880 : index
    %c0_176 = arith.constant 0 : index
    %659 = vector.load %arg2[%c880, %c0_176] : memref<1264x128xf32, #tpu.memory_space<vmem>>, vector<2x32xf32>
    %660 = arith.addf %642, %658 : vector<16x32xf32>
    %cst_177 = arith.constant dense<0.000000e+00> : vector<16xf32>
    %661 = vector.multi_reduction <add>, %660, %cst_177 [1] : vector<16x32xf32> to vector<16xf32>
    %662 = vector.shape_cast %661 : vector<16xf32> to vector<16x1xf32>
    %cst_178 = arith.constant 3.200000e+01 : f32
    %663 = vector.broadcast %cst_178 : f32 to vector<16x1xf32>
    %664 = arith.divf %662, %663 : vector<16x1xf32>
    %665 = vector.broadcast %664 : vector<16x1xf32> to vector<16x32xf32>
    %666 = arith.subf %660, %665 : vector<16x32xf32>
    %667 = arith.mulf %666, %666 : vector<16x32xf32>
    %cst_179 = arith.constant dense<0.000000e+00> : vector<16xf32>
    %668 = vector.multi_reduction <add>, %667, %cst_179 [1] : vector<16x32xf32> to vector<16xf32>
    %669 = vector.shape_cast %668 : vector<16xf32> to vector<16x1xf32>
    %cst_180 = arith.constant 3.200000e+01 : f32
    %670 = vector.broadcast %cst_180 : f32 to vector<16x1xf32>
    %671 = arith.divf %669, %670 : vector<16x1xf32>
    %672 = vector.broadcast %664 : vector<16x1xf32> to vector<16x32xf32>
    %673 = arith.subf %660, %672 : vector<16x32xf32>
    %cst_181 = arith.constant 9.99999974E-6 : f32
    %674 = vector.broadcast %cst_181 : f32 to vector<16x1xf32>
    %675 = arith.addf %671, %674 : vector<16x1xf32>
    %676 = math.rsqrt %675 : vector<16x1xf32>
    %677 = vector.broadcast %676 : vector<16x1xf32> to vector<16x32xf32>
    %678 = arith.mulf %673, %677 : vector<16x32xf32>
    %679 = vector.extract_strided_slice %659 {offsets = [0, 0], sizes = [1, 32], strides = [1, 1]} : vector<2x32xf32> to vector<1x32xf32>
    %680 = vector.broadcast %679 : vector<1x32xf32> to vector<16x32xf32>
    %681 = arith.mulf %678, %680 : vector<16x32xf32>
    %682 = vector.extract_strided_slice %659 {offsets = [1, 0], sizes = [1, 32], strides = [1, 1]} : vector<2x32xf32> to vector<1x32xf32>
    %683 = vector.broadcast %682 : vector<1x32xf32> to vector<16x32xf32>
    %684 = arith.addf %681, %683 : vector<16x32xf32>
    %c888 = arith.constant 888 : index
    %c0_182 = arith.constant 0 : index
    %685 = vector.load %arg2[%c888, %c0_182] : memref<1264x128xf32, #tpu.memory_space<vmem>>, vector<32x96xf32>
    %686 = arith.truncf %684 : vector<16x32xf32> to vector<16x32xbf16>
    %687 = arith.truncf %685 : vector<32x96xf32> to vector<32x96xbf16>
    %cst_183 = arith.constant dense<0.000000e+00> : vector<16x96xf32>
    %688 = tpu.matmul %686, %687, %cst_183 {dimension_numbers = #tpu.dot_dimension_numbers<[1], [0], [0], [1], [0, 0, 1, 1], [], []>} : vector<16x32xbf16>, vector<32x96xbf16>, vector<16x96xf32> -> vector<16x96xf32>
    %c920 = arith.constant 920 : index
    %c0_184 = arith.constant 0 : index
    %689 = vector.load %arg2[%c920, %c0_184] : memref<1264x128xf32, #tpu.memory_space<vmem>>, vector<1x96xf32>
    %690 = vector.broadcast %689 : vector<1x96xf32> to vector<16x96xf32>
    %691 = arith.addf %688, %690 : vector<16x96xf32>
    %692 = vector.extract_strided_slice %691 {offsets = [0, 0], sizes = [16, 32], strides = [1, 1]} : vector<16x96xf32> to vector<16x32xf32>
    %693 = vector.extract_strided_slice %691 {offsets = [0, 32], sizes = [16, 32], strides = [1, 1]} : vector<16x96xf32> to vector<16x32xf32>
    %694 = vector.extract_strided_slice %691 {offsets = [0, 64], sizes = [16, 32], strides = [1, 1]} : vector<16x96xf32> to vector<16x32xf32>
    %695 = vector.extract_strided_slice %692 {offsets = [0, 0], sizes = [8, 16], strides = [1, 1]} : vector<16x32xf32> to vector<8x16xf32>
    %696 = vector.extract_strided_slice %693 {offsets = [0, 0], sizes = [8, 16], strides = [1, 1]} : vector<16x32xf32> to vector<8x16xf32>
    %697 = vector.extract_strided_slice %694 {offsets = [0, 0], sizes = [8, 16], strides = [1, 1]} : vector<16x32xf32> to vector<8x16xf32>
    %698 = arith.truncf %695 : vector<8x16xf32> to vector<8x16xbf16>
    %699 = arith.truncf %696 : vector<8x16xf32> to vector<8x16xbf16>
    %cst_185 = arith.constant dense<0.000000e+00> : vector<8x8xf32>
    %700 = tpu.matmul %698, %699, %cst_185 {dimension_numbers = #tpu.dot_dimension_numbers<[1], [1], [0], [0], [0, 0, 1, 0], [], []>} : vector<8x16xbf16>, vector<8x16xbf16>, vector<8x8xf32> -> vector<8x8xf32>
    %cst_186 = arith.constant 2.500000e-01 : f32
    %701 = vector.broadcast %cst_186 : f32 to vector<8x8xf32>
    %702 = arith.mulf %700, %701 : vector<8x8xf32>
    %cst_187 = arith.constant -1.000000e+30 : f32
    %703 = vector.broadcast %cst_187 : f32 to vector<8x8xf32>
    %704 = arith.select %368, %702, %703 : vector<8x8xi1>, vector<8x8xf32>
    %cst_188 = arith.constant dense<0xFF800000> : vector<8xf32>
    %705 = vector.multi_reduction <maximumf>, %704, %cst_188 [1] : vector<8x8xf32> to vector<8xf32>
    %706 = vector.shape_cast %705 : vector<8xf32> to vector<8x1xf32>
    %707 = vector.broadcast %706 : vector<8x1xf32> to vector<8x8xf32>
    %708 = arith.subf %704, %707 : vector<8x8xf32>
    %709 = math.exp %708 : vector<8x8xf32>
    %cst_189 = arith.constant dense<0.000000e+00> : vector<8xf32>
    %710 = vector.multi_reduction <add>, %709, %cst_189 [1] : vector<8x8xf32> to vector<8xf32>
    %711 = vector.shape_cast %710 : vector<8xf32> to vector<8x1xf32>
    %712 = tpu.reciprocal %711 {approx = true} : vector<8x1xf32> -> vector<8x1xf32>
    %713 = vector.broadcast %712 : vector<8x1xf32> to vector<8x8xf32>
    %714 = arith.mulf %709, %713 : vector<8x8xf32>
    %715 = arith.truncf %714 : vector<8x8xf32> to vector<8x8xbf16>
    %716 = arith.truncf %697 : vector<8x16xf32> to vector<8x16xbf16>
    %cst_190 = arith.constant dense<0.000000e+00> : vector<8x16xf32>
    %717 = tpu.matmul %715, %716, %cst_190 {dimension_numbers = #tpu.dot_dimension_numbers<[1], [0], [0], [1], [0, 0, 1, 1], [], []>} : vector<8x8xbf16>, vector<8x16xbf16>, vector<8x16xf32> -> vector<8x16xf32>
    %718 = vector.extract_strided_slice %692 {offsets = [0, 16], sizes = [8, 16], strides = [1, 1]} : vector<16x32xf32> to vector<8x16xf32>
    %719 = vector.extract_strided_slice %693 {offsets = [0, 16], sizes = [8, 16], strides = [1, 1]} : vector<16x32xf32> to vector<8x16xf32>
    %720 = vector.extract_strided_slice %694 {offsets = [0, 16], sizes = [8, 16], strides = [1, 1]} : vector<16x32xf32> to vector<8x16xf32>
    %721 = arith.truncf %718 : vector<8x16xf32> to vector<8x16xbf16>
    %722 = arith.truncf %719 : vector<8x16xf32> to vector<8x16xbf16>
    %cst_191 = arith.constant dense<0.000000e+00> : vector<8x8xf32>
    %723 = tpu.matmul %721, %722, %cst_191 {dimension_numbers = #tpu.dot_dimension_numbers<[1], [1], [0], [0], [0, 0, 1, 0], [], []>} : vector<8x16xbf16>, vector<8x16xbf16>, vector<8x8xf32> -> vector<8x8xf32>
    %cst_192 = arith.constant 2.500000e-01 : f32
    %724 = vector.broadcast %cst_192 : f32 to vector<8x8xf32>
    %725 = arith.mulf %723, %724 : vector<8x8xf32>
    %cst_193 = arith.constant -1.000000e+30 : f32
    %726 = vector.broadcast %cst_193 : f32 to vector<8x8xf32>
    %727 = arith.select %368, %725, %726 : vector<8x8xi1>, vector<8x8xf32>
    %cst_194 = arith.constant dense<0xFF800000> : vector<8xf32>
    %728 = vector.multi_reduction <maximumf>, %727, %cst_194 [1] : vector<8x8xf32> to vector<8xf32>
    %729 = vector.shape_cast %728 : vector<8xf32> to vector<8x1xf32>
    %730 = vector.broadcast %729 : vector<8x1xf32> to vector<8x8xf32>
    %731 = arith.subf %727, %730 : vector<8x8xf32>
    %732 = math.exp %731 : vector<8x8xf32>
    %cst_195 = arith.constant dense<0.000000e+00> : vector<8xf32>
    %733 = vector.multi_reduction <add>, %732, %cst_195 [1] : vector<8x8xf32> to vector<8xf32>
    %734 = vector.shape_cast %733 : vector<8xf32> to vector<8x1xf32>
    %735 = tpu.reciprocal %734 {approx = true} : vector<8x1xf32> -> vector<8x1xf32>
    %736 = vector.broadcast %735 : vector<8x1xf32> to vector<8x8xf32>
    %737 = arith.mulf %732, %736 : vector<8x8xf32>
    %738 = arith.truncf %737 : vector<8x8xf32> to vector<8x8xbf16>
    %739 = arith.truncf %720 : vector<8x16xf32> to vector<8x16xbf16>
    %cst_196 = arith.constant dense<0.000000e+00> : vector<8x16xf32>
    %740 = tpu.matmul %738, %739, %cst_196 {dimension_numbers = #tpu.dot_dimension_numbers<[1], [0], [0], [1], [0, 0, 1, 1], [], []>} : vector<8x8xbf16>, vector<8x16xbf16>, vector<8x16xf32> -> vector<8x16xf32>
    %741 = tpu.concatenate %717, %740 in 1 : vector<8x16xf32>, vector<8x16xf32> -> vector<8x32xf32>
    %742 = vector.extract_strided_slice %692 {offsets = [8, 0], sizes = [8, 16], strides = [1, 1]} : vector<16x32xf32> to vector<8x16xf32>
    %743 = vector.extract_strided_slice %693 {offsets = [8, 0], sizes = [8, 16], strides = [1, 1]} : vector<16x32xf32> to vector<8x16xf32>
    %744 = vector.extract_strided_slice %694 {offsets = [8, 0], sizes = [8, 16], strides = [1, 1]} : vector<16x32xf32> to vector<8x16xf32>
    %745 = arith.truncf %742 : vector<8x16xf32> to vector<8x16xbf16>
    %746 = arith.truncf %743 : vector<8x16xf32> to vector<8x16xbf16>
    %cst_197 = arith.constant dense<0.000000e+00> : vector<8x8xf32>
    %747 = tpu.matmul %745, %746, %cst_197 {dimension_numbers = #tpu.dot_dimension_numbers<[1], [1], [0], [0], [0, 0, 1, 0], [], []>} : vector<8x16xbf16>, vector<8x16xbf16>, vector<8x8xf32> -> vector<8x8xf32>
    %cst_198 = arith.constant 2.500000e-01 : f32
    %748 = vector.broadcast %cst_198 : f32 to vector<8x8xf32>
    %749 = arith.mulf %747, %748 : vector<8x8xf32>
    %cst_199 = arith.constant -1.000000e+30 : f32
    %750 = vector.broadcast %cst_199 : f32 to vector<8x8xf32>
    %751 = arith.select %368, %749, %750 : vector<8x8xi1>, vector<8x8xf32>
    %cst_200 = arith.constant dense<0xFF800000> : vector<8xf32>
    %752 = vector.multi_reduction <maximumf>, %751, %cst_200 [1] : vector<8x8xf32> to vector<8xf32>
    %753 = vector.shape_cast %752 : vector<8xf32> to vector<8x1xf32>
    %754 = vector.broadcast %753 : vector<8x1xf32> to vector<8x8xf32>
    %755 = arith.subf %751, %754 : vector<8x8xf32>
    %756 = math.exp %755 : vector<8x8xf32>
    %cst_201 = arith.constant dense<0.000000e+00> : vector<8xf32>
    %757 = vector.multi_reduction <add>, %756, %cst_201 [1] : vector<8x8xf32> to vector<8xf32>
    %758 = vector.shape_cast %757 : vector<8xf32> to vector<8x1xf32>
    %759 = tpu.reciprocal %758 {approx = true} : vector<8x1xf32> -> vector<8x1xf32>
    %760 = vector.broadcast %759 : vector<8x1xf32> to vector<8x8xf32>
    %761 = arith.mulf %756, %760 : vector<8x8xf32>
    %762 = arith.truncf %761 : vector<8x8xf32> to vector<8x8xbf16>
    %763 = arith.truncf %744 : vector<8x16xf32> to vector<8x16xbf16>
    %cst_202 = arith.constant dense<0.000000e+00> : vector<8x16xf32>
    %764 = tpu.matmul %762, %763, %cst_202 {dimension_numbers = #tpu.dot_dimension_numbers<[1], [0], [0], [1], [0, 0, 1, 1], [], []>} : vector<8x8xbf16>, vector<8x16xbf16>, vector<8x16xf32> -> vector<8x16xf32>
    %765 = vector.extract_strided_slice %692 {offsets = [8, 16], sizes = [8, 16], strides = [1, 1]} : vector<16x32xf32> to vector<8x16xf32>
    %766 = vector.extract_strided_slice %693 {offsets = [8, 16], sizes = [8, 16], strides = [1, 1]} : vector<16x32xf32> to vector<8x16xf32>
    %767 = vector.extract_strided_slice %694 {offsets = [8, 16], sizes = [8, 16], strides = [1, 1]} : vector<16x32xf32> to vector<8x16xf32>
    %768 = arith.truncf %765 : vector<8x16xf32> to vector<8x16xbf16>
    %769 = arith.truncf %766 : vector<8x16xf32> to vector<8x16xbf16>
    %cst_203 = arith.constant dense<0.000000e+00> : vector<8x8xf32>
    %770 = tpu.matmul %768, %769, %cst_203 {dimension_numbers = #tpu.dot_dimension_numbers<[1], [1], [0], [0], [0, 0, 1, 0], [], []>} : vector<8x16xbf16>, vector<8x16xbf16>, vector<8x8xf32> -> vector<8x8xf32>
    %cst_204 = arith.constant 2.500000e-01 : f32
    %771 = vector.broadcast %cst_204 : f32 to vector<8x8xf32>
    %772 = arith.mulf %770, %771 : vector<8x8xf32>
    %cst_205 = arith.constant -1.000000e+30 : f32
    %773 = vector.broadcast %cst_205 : f32 to vector<8x8xf32>
    %774 = arith.select %368, %772, %773 : vector<8x8xi1>, vector<8x8xf32>
    %cst_206 = arith.constant dense<0xFF800000> : vector<8xf32>
    %775 = vector.multi_reduction <maximumf>, %774, %cst_206 [1] : vector<8x8xf32> to vector<8xf32>
    %776 = vector.shape_cast %775 : vector<8xf32> to vector<8x1xf32>
    %777 = vector.broadcast %776 : vector<8x1xf32> to vector<8x8xf32>
    %778 = arith.subf %774, %777 : vector<8x8xf32>
    %779 = math.exp %778 : vector<8x8xf32>
    %cst_207 = arith.constant dense<0.000000e+00> : vector<8xf32>
    %780 = vector.multi_reduction <add>, %779, %cst_207 [1] : vector<8x8xf32> to vector<8xf32>
    %781 = vector.shape_cast %780 : vector<8xf32> to vector<8x1xf32>
    %782 = tpu.reciprocal %781 {approx = true} : vector<8x1xf32> -> vector<8x1xf32>
    %783 = vector.broadcast %782 : vector<8x1xf32> to vector<8x8xf32>
    %784 = arith.mulf %779, %783 : vector<8x8xf32>
    %785 = arith.truncf %784 : vector<8x8xf32> to vector<8x8xbf16>
    %786 = arith.truncf %767 : vector<8x16xf32> to vector<8x16xbf16>
    %cst_208 = arith.constant dense<0.000000e+00> : vector<8x16xf32>
    %787 = tpu.matmul %785, %786, %cst_208 {dimension_numbers = #tpu.dot_dimension_numbers<[1], [0], [0], [1], [0, 0, 1, 1], [], []>} : vector<8x8xbf16>, vector<8x16xbf16>, vector<8x16xf32> -> vector<8x16xf32>
    %788 = tpu.concatenate %764, %787 in 1 : vector<8x16xf32>, vector<8x16xf32> -> vector<8x32xf32>
    %789 = tpu.concatenate %741, %788 in 0 : vector<8x32xf32>, vector<8x32xf32> -> vector<16x32xf32>
    %c928 = arith.constant 928 : index
    %c0_209 = arith.constant 0 : index
    %790 = vector.load %arg2[%c928, %c0_209] : memref<1264x128xf32, #tpu.memory_space<vmem>>, vector<32x32xf32>
    %791 = arith.truncf %789 : vector<16x32xf32> to vector<16x32xbf16>
    %792 = arith.truncf %790 : vector<32x32xf32> to vector<32x32xbf16>
    %cst_210 = arith.constant dense<0.000000e+00> : vector<16x32xf32>
    %793 = tpu.matmul %791, %792, %cst_210 {dimension_numbers = #tpu.dot_dimension_numbers<[1], [0], [0], [1], [0, 0, 1, 1], [], []>} : vector<16x32xbf16>, vector<32x32xbf16>, vector<16x32xf32> -> vector<16x32xf32>
    %c960 = arith.constant 960 : index
    %c0_211 = arith.constant 0 : index
    %794 = vector.load %arg2[%c960, %c0_211] : memref<1264x128xf32, #tpu.memory_space<vmem>>, vector<1x32xf32>
    %795 = vector.broadcast %794 : vector<1x32xf32> to vector<16x32xf32>
    %796 = arith.addf %793, %795 : vector<16x32xf32>
    %c968 = arith.constant 968 : index
    %c0_212 = arith.constant 0 : index
    %797 = vector.load %arg2[%c968, %c0_212] : memref<1264x128xf32, #tpu.memory_space<vmem>>, vector<2x32xf32>
    %798 = arith.addf %684, %796 : vector<16x32xf32>
    %cst_213 = arith.constant dense<0.000000e+00> : vector<16xf32>
    %799 = vector.multi_reduction <add>, %798, %cst_213 [1] : vector<16x32xf32> to vector<16xf32>
    %800 = vector.shape_cast %799 : vector<16xf32> to vector<16x1xf32>
    %cst_214 = arith.constant 3.200000e+01 : f32
    %801 = vector.broadcast %cst_214 : f32 to vector<16x1xf32>
    %802 = arith.divf %800, %801 : vector<16x1xf32>
    %803 = vector.broadcast %802 : vector<16x1xf32> to vector<16x32xf32>
    %804 = arith.subf %798, %803 : vector<16x32xf32>
    %805 = arith.mulf %804, %804 : vector<16x32xf32>
    %cst_215 = arith.constant dense<0.000000e+00> : vector<16xf32>
    %806 = vector.multi_reduction <add>, %805, %cst_215 [1] : vector<16x32xf32> to vector<16xf32>
    %807 = vector.shape_cast %806 : vector<16xf32> to vector<16x1xf32>
    %cst_216 = arith.constant 3.200000e+01 : f32
    %808 = vector.broadcast %cst_216 : f32 to vector<16x1xf32>
    %809 = arith.divf %807, %808 : vector<16x1xf32>
    %810 = vector.broadcast %802 : vector<16x1xf32> to vector<16x32xf32>
    %811 = arith.subf %798, %810 : vector<16x32xf32>
    %cst_217 = arith.constant 9.99999974E-6 : f32
    %812 = vector.broadcast %cst_217 : f32 to vector<16x1xf32>
    %813 = arith.addf %809, %812 : vector<16x1xf32>
    %814 = math.rsqrt %813 : vector<16x1xf32>
    %815 = vector.broadcast %814 : vector<16x1xf32> to vector<16x32xf32>
    %816 = arith.mulf %811, %815 : vector<16x32xf32>
    %817 = vector.extract_strided_slice %797 {offsets = [0, 0], sizes = [1, 32], strides = [1, 1]} : vector<2x32xf32> to vector<1x32xf32>
    %818 = vector.broadcast %817 : vector<1x32xf32> to vector<16x32xf32>
    %819 = arith.mulf %816, %818 : vector<16x32xf32>
    %820 = vector.extract_strided_slice %797 {offsets = [1, 0], sizes = [1, 32], strides = [1, 1]} : vector<2x32xf32> to vector<1x32xf32>
    %821 = vector.broadcast %820 : vector<1x32xf32> to vector<16x32xf32>
    %822 = arith.addf %819, %821 : vector<16x32xf32>
    %c976 = arith.constant 976 : index
    %c0_218 = arith.constant 0 : index
    %823 = vector.load %arg2[%c976, %c0_218] : memref<1264x128xf32, #tpu.memory_space<vmem>>, vector<32x32xf32>
    %824 = arith.truncf %822 : vector<16x32xf32> to vector<16x32xbf16>
    %825 = arith.truncf %823 : vector<32x32xf32> to vector<32x32xbf16>
    %cst_219 = arith.constant dense<0.000000e+00> : vector<16x32xf32>
    %826 = tpu.matmul %824, %825, %cst_219 {dimension_numbers = #tpu.dot_dimension_numbers<[1], [0], [0], [1], [0, 0, 1, 1], [], []>} : vector<16x32xbf16>, vector<32x32xbf16>, vector<16x32xf32> -> vector<16x32xf32>
    %c1008 = arith.constant 1008 : index
    %c0_220 = arith.constant 0 : index
    %827 = vector.load %arg2[%c1008, %c0_220] : memref<1264x128xf32, #tpu.memory_space<vmem>>, vector<1x32xf32>
    %828 = vector.broadcast %827 : vector<1x32xf32> to vector<16x32xf32>
    %829 = arith.addf %826, %828 : vector<16x32xf32>
    %c1016 = arith.constant 1016 : index
    %c0_221 = arith.constant 0 : index
    %830 = vector.load %arg2[%c1016, %c0_221] : memref<1264x128xf32, #tpu.memory_space<vmem>>, vector<32x64xf32>
    %831 = arith.truncf %365 : vector<16x32xf32> to vector<16x32xbf16>
    %832 = arith.truncf %830 : vector<32x64xf32> to vector<32x64xbf16>
    %cst_222 = arith.constant dense<0.000000e+00> : vector<16x64xf32>
    %833 = tpu.matmul %831, %832, %cst_222 {dimension_numbers = #tpu.dot_dimension_numbers<[1], [0], [0], [1], [0, 0, 1, 1], [], []>} : vector<16x32xbf16>, vector<32x64xbf16>, vector<16x64xf32> -> vector<16x64xf32>
    %c1048 = arith.constant 1048 : index
    %c0_223 = arith.constant 0 : index
    %834 = vector.load %arg2[%c1048, %c0_223] : memref<1264x128xf32, #tpu.memory_space<vmem>>, vector<1x64xf32>
    %835 = vector.broadcast %834 : vector<1x64xf32> to vector<16x64xf32>
    %836 = arith.addf %833, %835 : vector<16x64xf32>
    %837 = vector.extract_strided_slice %836 {offsets = [0, 0], sizes = [16, 32], strides = [1, 1]} : vector<16x64xf32> to vector<16x32xf32>
    %838 = vector.extract_strided_slice %836 {offsets = [0, 32], sizes = [16, 32], strides = [1, 1]} : vector<16x64xf32> to vector<16x32xf32>
    %839 = vector.extract_strided_slice %829 {offsets = [0, 0], sizes = [8, 16], strides = [1, 1]} : vector<16x32xf32> to vector<8x16xf32>
    %840 = vector.extract_strided_slice %837 {offsets = [0, 0], sizes = [8, 16], strides = [1, 1]} : vector<16x32xf32> to vector<8x16xf32>
    %841 = vector.extract_strided_slice %838 {offsets = [0, 0], sizes = [8, 16], strides = [1, 1]} : vector<16x32xf32> to vector<8x16xf32>
    %842 = arith.truncf %839 : vector<8x16xf32> to vector<8x16xbf16>
    %843 = arith.truncf %840 : vector<8x16xf32> to vector<8x16xbf16>
    %cst_224 = arith.constant dense<0.000000e+00> : vector<8x8xf32>
    %844 = tpu.matmul %842, %843, %cst_224 {dimension_numbers = #tpu.dot_dimension_numbers<[1], [1], [0], [0], [0, 0, 1, 0], [], []>} : vector<8x16xbf16>, vector<8x16xbf16>, vector<8x8xf32> -> vector<8x8xf32>
    %cst_225 = arith.constant 2.500000e-01 : f32
    %845 = vector.broadcast %cst_225 : f32 to vector<8x8xf32>
    %846 = arith.mulf %844, %845 : vector<8x8xf32>
    %cst_226 = arith.constant dense<0xFF800000> : vector<8xf32>
    %847 = vector.multi_reduction <maximumf>, %846, %cst_226 [1] : vector<8x8xf32> to vector<8xf32>
    %848 = vector.shape_cast %847 : vector<8xf32> to vector<8x1xf32>
    %849 = vector.broadcast %848 : vector<8x1xf32> to vector<8x8xf32>
    %850 = arith.subf %846, %849 : vector<8x8xf32>
    %851 = math.exp %850 : vector<8x8xf32>
    %cst_227 = arith.constant dense<0.000000e+00> : vector<8xf32>
    %852 = vector.multi_reduction <add>, %851, %cst_227 [1] : vector<8x8xf32> to vector<8xf32>
    %853 = vector.shape_cast %852 : vector<8xf32> to vector<8x1xf32>
    %854 = tpu.reciprocal %853 {approx = true} : vector<8x1xf32> -> vector<8x1xf32>
    %855 = vector.broadcast %854 : vector<8x1xf32> to vector<8x8xf32>
    %856 = arith.mulf %851, %855 : vector<8x8xf32>
    %857 = arith.truncf %856 : vector<8x8xf32> to vector<8x8xbf16>
    %858 = arith.truncf %841 : vector<8x16xf32> to vector<8x16xbf16>
    %cst_228 = arith.constant dense<0.000000e+00> : vector<8x16xf32>
    %859 = tpu.matmul %857, %858, %cst_228 {dimension_numbers = #tpu.dot_dimension_numbers<[1], [0], [0], [1], [0, 0, 1, 1], [], []>} : vector<8x8xbf16>, vector<8x16xbf16>, vector<8x16xf32> -> vector<8x16xf32>
    %860 = vector.extract_strided_slice %829 {offsets = [0, 16], sizes = [8, 16], strides = [1, 1]} : vector<16x32xf32> to vector<8x16xf32>
    %861 = vector.extract_strided_slice %837 {offsets = [0, 16], sizes = [8, 16], strides = [1, 1]} : vector<16x32xf32> to vector<8x16xf32>
    %862 = vector.extract_strided_slice %838 {offsets = [0, 16], sizes = [8, 16], strides = [1, 1]} : vector<16x32xf32> to vector<8x16xf32>
    %863 = arith.truncf %860 : vector<8x16xf32> to vector<8x16xbf16>
    %864 = arith.truncf %861 : vector<8x16xf32> to vector<8x16xbf16>
    %cst_229 = arith.constant dense<0.000000e+00> : vector<8x8xf32>
    %865 = tpu.matmul %863, %864, %cst_229 {dimension_numbers = #tpu.dot_dimension_numbers<[1], [1], [0], [0], [0, 0, 1, 0], [], []>} : vector<8x16xbf16>, vector<8x16xbf16>, vector<8x8xf32> -> vector<8x8xf32>
    %cst_230 = arith.constant 2.500000e-01 : f32
    %866 = vector.broadcast %cst_230 : f32 to vector<8x8xf32>
    %867 = arith.mulf %865, %866 : vector<8x8xf32>
    %cst_231 = arith.constant dense<0xFF800000> : vector<8xf32>
    %868 = vector.multi_reduction <maximumf>, %867, %cst_231 [1] : vector<8x8xf32> to vector<8xf32>
    %869 = vector.shape_cast %868 : vector<8xf32> to vector<8x1xf32>
    %870 = vector.broadcast %869 : vector<8x1xf32> to vector<8x8xf32>
    %871 = arith.subf %867, %870 : vector<8x8xf32>
    %872 = math.exp %871 : vector<8x8xf32>
    %cst_232 = arith.constant dense<0.000000e+00> : vector<8xf32>
    %873 = vector.multi_reduction <add>, %872, %cst_232 [1] : vector<8x8xf32> to vector<8xf32>
    %874 = vector.shape_cast %873 : vector<8xf32> to vector<8x1xf32>
    %875 = tpu.reciprocal %874 {approx = true} : vector<8x1xf32> -> vector<8x1xf32>
    %876 = vector.broadcast %875 : vector<8x1xf32> to vector<8x8xf32>
    %877 = arith.mulf %872, %876 : vector<8x8xf32>
    %878 = arith.truncf %877 : vector<8x8xf32> to vector<8x8xbf16>
    %879 = arith.truncf %862 : vector<8x16xf32> to vector<8x16xbf16>
    %cst_233 = arith.constant dense<0.000000e+00> : vector<8x16xf32>
    %880 = tpu.matmul %878, %879, %cst_233 {dimension_numbers = #tpu.dot_dimension_numbers<[1], [0], [0], [1], [0, 0, 1, 1], [], []>} : vector<8x8xbf16>, vector<8x16xbf16>, vector<8x16xf32> -> vector<8x16xf32>
    %881 = tpu.concatenate %859, %880 in 1 : vector<8x16xf32>, vector<8x16xf32> -> vector<8x32xf32>
    %882 = vector.extract_strided_slice %829 {offsets = [8, 0], sizes = [8, 16], strides = [1, 1]} : vector<16x32xf32> to vector<8x16xf32>
    %883 = vector.extract_strided_slice %837 {offsets = [8, 0], sizes = [8, 16], strides = [1, 1]} : vector<16x32xf32> to vector<8x16xf32>
    %884 = vector.extract_strided_slice %838 {offsets = [8, 0], sizes = [8, 16], strides = [1, 1]} : vector<16x32xf32> to vector<8x16xf32>
    %885 = arith.truncf %882 : vector<8x16xf32> to vector<8x16xbf16>
    %886 = arith.truncf %883 : vector<8x16xf32> to vector<8x16xbf16>
    %cst_234 = arith.constant dense<0.000000e+00> : vector<8x8xf32>
    %887 = tpu.matmul %885, %886, %cst_234 {dimension_numbers = #tpu.dot_dimension_numbers<[1], [1], [0], [0], [0, 0, 1, 0], [], []>} : vector<8x16xbf16>, vector<8x16xbf16>, vector<8x8xf32> -> vector<8x8xf32>
    %cst_235 = arith.constant 2.500000e-01 : f32
    %888 = vector.broadcast %cst_235 : f32 to vector<8x8xf32>
    %889 = arith.mulf %887, %888 : vector<8x8xf32>
    %cst_236 = arith.constant dense<0xFF800000> : vector<8xf32>
    %890 = vector.multi_reduction <maximumf>, %889, %cst_236 [1] : vector<8x8xf32> to vector<8xf32>
    %891 = vector.shape_cast %890 : vector<8xf32> to vector<8x1xf32>
    %892 = vector.broadcast %891 : vector<8x1xf32> to vector<8x8xf32>
    %893 = arith.subf %889, %892 : vector<8x8xf32>
    %894 = math.exp %893 : vector<8x8xf32>
    %cst_237 = arith.constant dense<0.000000e+00> : vector<8xf32>
    %895 = vector.multi_reduction <add>, %894, %cst_237 [1] : vector<8x8xf32> to vector<8xf32>
    %896 = vector.shape_cast %895 : vector<8xf32> to vector<8x1xf32>
    %897 = tpu.reciprocal %896 {approx = true} : vector<8x1xf32> -> vector<8x1xf32>
    %898 = vector.broadcast %897 : vector<8x1xf32> to vector<8x8xf32>
    %899 = arith.mulf %894, %898 : vector<8x8xf32>
    %900 = arith.truncf %899 : vector<8x8xf32> to vector<8x8xbf16>
    %901 = arith.truncf %884 : vector<8x16xf32> to vector<8x16xbf16>
    %cst_238 = arith.constant dense<0.000000e+00> : vector<8x16xf32>
    %902 = tpu.matmul %900, %901, %cst_238 {dimension_numbers = #tpu.dot_dimension_numbers<[1], [0], [0], [1], [0, 0, 1, 1], [], []>} : vector<8x8xbf16>, vector<8x16xbf16>, vector<8x16xf32> -> vector<8x16xf32>
    %903 = vector.extract_strided_slice %829 {offsets = [8, 16], sizes = [8, 16], strides = [1, 1]} : vector<16x32xf32> to vector<8x16xf32>
    %904 = vector.extract_strided_slice %837 {offsets = [8, 16], sizes = [8, 16], strides = [1, 1]} : vector<16x32xf32> to vector<8x16xf32>
    %905 = vector.extract_strided_slice %838 {offsets = [8, 16], sizes = [8, 16], strides = [1, 1]} : vector<16x32xf32> to vector<8x16xf32>
    %906 = arith.truncf %903 : vector<8x16xf32> to vector<8x16xbf16>
    %907 = arith.truncf %904 : vector<8x16xf32> to vector<8x16xbf16>
    %cst_239 = arith.constant dense<0.000000e+00> : vector<8x8xf32>
    %908 = tpu.matmul %906, %907, %cst_239 {dimension_numbers = #tpu.dot_dimension_numbers<[1], [1], [0], [0], [0, 0, 1, 0], [], []>} : vector<8x16xbf16>, vector<8x16xbf16>, vector<8x8xf32> -> vector<8x8xf32>
    %cst_240 = arith.constant 2.500000e-01 : f32
    %909 = vector.broadcast %cst_240 : f32 to vector<8x8xf32>
    %910 = arith.mulf %908, %909 : vector<8x8xf32>
    %cst_241 = arith.constant dense<0xFF800000> : vector<8xf32>
    %911 = vector.multi_reduction <maximumf>, %910, %cst_241 [1] : vector<8x8xf32> to vector<8xf32>
    %912 = vector.shape_cast %911 : vector<8xf32> to vector<8x1xf32>
    %913 = vector.broadcast %912 : vector<8x1xf32> to vector<8x8xf32>
    %914 = arith.subf %910, %913 : vector<8x8xf32>
    %915 = math.exp %914 : vector<8x8xf32>
    %cst_242 = arith.constant dense<0.000000e+00> : vector<8xf32>
    %916 = vector.multi_reduction <add>, %915, %cst_242 [1] : vector<8x8xf32> to vector<8xf32>
    %917 = vector.shape_cast %916 : vector<8xf32> to vector<8x1xf32>
    %918 = tpu.reciprocal %917 {approx = true} : vector<8x1xf32> -> vector<8x1xf32>
    %919 = vector.broadcast %918 : vector<8x1xf32> to vector<8x8xf32>
    %920 = arith.mulf %915, %919 : vector<8x8xf32>
    %921 = arith.truncf %920 : vector<8x8xf32> to vector<8x8xbf16>
    %922 = arith.truncf %905 : vector<8x16xf32> to vector<8x16xbf16>
    %cst_243 = arith.constant dense<0.000000e+00> : vector<8x16xf32>
    %923 = tpu.matmul %921, %922, %cst_243 {dimension_numbers = #tpu.dot_dimension_numbers<[1], [0], [0], [1], [0, 0, 1, 1], [], []>} : vector<8x8xbf16>, vector<8x16xbf16>, vector<8x16xf32> -> vector<8x16xf32>
    %924 = tpu.concatenate %902, %923 in 1 : vector<8x16xf32>, vector<8x16xf32> -> vector<8x32xf32>
    %925 = tpu.concatenate %881, %924 in 0 : vector<8x32xf32>, vector<8x32xf32> -> vector<16x32xf32>
    %c1056 = arith.constant 1056 : index
    %c0_244 = arith.constant 0 : index
    %926 = vector.load %arg2[%c1056, %c0_244] : memref<1264x128xf32, #tpu.memory_space<vmem>>, vector<32x32xf32>
    %927 = arith.truncf %925 : vector<16x32xf32> to vector<16x32xbf16>
    %928 = arith.truncf %926 : vector<32x32xf32> to vector<32x32xbf16>
    %cst_245 = arith.constant dense<0.000000e+00> : vector<16x32xf32>
    %929 = tpu.matmul %927, %928, %cst_245 {dimension_numbers = #tpu.dot_dimension_numbers<[1], [0], [0], [1], [0, 0, 1, 1], [], []>} : vector<16x32xbf16>, vector<32x32xbf16>, vector<16x32xf32> -> vector<16x32xf32>
    %c1088 = arith.constant 1088 : index
    %c0_246 = arith.constant 0 : index
    %930 = vector.load %arg2[%c1088, %c0_246] : memref<1264x128xf32, #tpu.memory_space<vmem>>, vector<1x32xf32>
    %931 = vector.broadcast %930 : vector<1x32xf32> to vector<16x32xf32>
    %932 = arith.addf %929, %931 : vector<16x32xf32>
    %c1096 = arith.constant 1096 : index
    %c0_247 = arith.constant 0 : index
    %933 = vector.load %arg2[%c1096, %c0_247] : memref<1264x128xf32, #tpu.memory_space<vmem>>, vector<2x32xf32>
    %934 = arith.addf %822, %932 : vector<16x32xf32>
    %cst_248 = arith.constant dense<0.000000e+00> : vector<16xf32>
    %935 = vector.multi_reduction <add>, %934, %cst_248 [1] : vector<16x32xf32> to vector<16xf32>
    %936 = vector.shape_cast %935 : vector<16xf32> to vector<16x1xf32>
    %cst_249 = arith.constant 3.200000e+01 : f32
    %937 = vector.broadcast %cst_249 : f32 to vector<16x1xf32>
    %938 = arith.divf %936, %937 : vector<16x1xf32>
    %939 = vector.broadcast %938 : vector<16x1xf32> to vector<16x32xf32>
    %940 = arith.subf %934, %939 : vector<16x32xf32>
    %941 = arith.mulf %940, %940 : vector<16x32xf32>
    %cst_250 = arith.constant dense<0.000000e+00> : vector<16xf32>
    %942 = vector.multi_reduction <add>, %941, %cst_250 [1] : vector<16x32xf32> to vector<16xf32>
    %943 = vector.shape_cast %942 : vector<16xf32> to vector<16x1xf32>
    %cst_251 = arith.constant 3.200000e+01 : f32
    %944 = vector.broadcast %cst_251 : f32 to vector<16x1xf32>
    %945 = arith.divf %943, %944 : vector<16x1xf32>
    %946 = vector.broadcast %938 : vector<16x1xf32> to vector<16x32xf32>
    %947 = arith.subf %934, %946 : vector<16x32xf32>
    %cst_252 = arith.constant 9.99999974E-6 : f32
    %948 = vector.broadcast %cst_252 : f32 to vector<16x1xf32>
    %949 = arith.addf %945, %948 : vector<16x1xf32>
    %950 = math.rsqrt %949 : vector<16x1xf32>
    %951 = vector.broadcast %950 : vector<16x1xf32> to vector<16x32xf32>
    %952 = arith.mulf %947, %951 : vector<16x32xf32>
    %953 = vector.extract_strided_slice %933 {offsets = [0, 0], sizes = [1, 32], strides = [1, 1]} : vector<2x32xf32> to vector<1x32xf32>
    %954 = vector.broadcast %953 : vector<1x32xf32> to vector<16x32xf32>
    %955 = arith.mulf %952, %954 : vector<16x32xf32>
    %956 = vector.extract_strided_slice %933 {offsets = [1, 0], sizes = [1, 32], strides = [1, 1]} : vector<2x32xf32> to vector<1x32xf32>
    %957 = vector.broadcast %956 : vector<1x32xf32> to vector<16x32xf32>
    %958 = arith.addf %955, %957 : vector<16x32xf32>
    %c1104 = arith.constant 1104 : index
    %c0_253 = arith.constant 0 : index
    %959 = vector.load %arg2[%c1104, %c0_253] : memref<1264x128xf32, #tpu.memory_space<vmem>>, vector<32x64xf32>
    %960 = arith.truncf %958 : vector<16x32xf32> to vector<16x32xbf16>
    %961 = arith.truncf %959 : vector<32x64xf32> to vector<32x64xbf16>
    %cst_254 = arith.constant dense<0.000000e+00> : vector<16x64xf32>
    %962 = tpu.matmul %960, %961, %cst_254 {dimension_numbers = #tpu.dot_dimension_numbers<[1], [0], [0], [1], [0, 0, 1, 1], [], []>} : vector<16x32xbf16>, vector<32x64xbf16>, vector<16x64xf32> -> vector<16x64xf32>
    %c1136 = arith.constant 1136 : index
    %c0_255 = arith.constant 0 : index
    %963 = vector.load %arg2[%c1136, %c0_255] : memref<1264x128xf32, #tpu.memory_space<vmem>>, vector<1x64xf32>
    %964 = vector.broadcast %963 : vector<1x64xf32> to vector<16x64xf32>
    %965 = arith.addf %962, %964 : vector<16x64xf32>
    %cst_256 = arith.constant 0.000000e+00 : f32
    %966 = vector.broadcast %cst_256 : f32 to vector<16x64xf32>
    %967 = arith.maximumf %965, %966 : vector<16x64xf32>
    %c1144 = arith.constant 1144 : index
    %c0_257 = arith.constant 0 : index
    %968 = vector.load %arg2[%c1144, %c0_257] : memref<1264x128xf32, #tpu.memory_space<vmem>>, vector<64x32xf32>
    %969 = arith.truncf %967 : vector<16x64xf32> to vector<16x64xbf16>
    %970 = arith.truncf %968 : vector<64x32xf32> to vector<64x32xbf16>
    %cst_258 = arith.constant dense<0.000000e+00> : vector<16x32xf32>
    %971 = tpu.matmul %969, %970, %cst_258 {dimension_numbers = #tpu.dot_dimension_numbers<[1], [0], [0], [1], [0, 0, 1, 1], [], []>} : vector<16x64xbf16>, vector<64x32xbf16>, vector<16x32xf32> -> vector<16x32xf32>
    %c1208 = arith.constant 1208 : index
    %c0_259 = arith.constant 0 : index
    %972 = vector.load %arg2[%c1208, %c0_259] : memref<1264x128xf32, #tpu.memory_space<vmem>>, vector<1x32xf32>
    %973 = vector.broadcast %972 : vector<1x32xf32> to vector<16x32xf32>
    %974 = arith.addf %971, %973 : vector<16x32xf32>
    %c1216 = arith.constant 1216 : index
    %c0_260 = arith.constant 0 : index
    %975 = vector.load %arg2[%c1216, %c0_260] : memref<1264x128xf32, #tpu.memory_space<vmem>>, vector<2x32xf32>
    %976 = arith.addf %958, %974 : vector<16x32xf32>
    %cst_261 = arith.constant dense<0.000000e+00> : vector<16xf32>
    %977 = vector.multi_reduction <add>, %976, %cst_261 [1] : vector<16x32xf32> to vector<16xf32>
    %978 = vector.shape_cast %977 : vector<16xf32> to vector<16x1xf32>
    %cst_262 = arith.constant 3.200000e+01 : f32
    %979 = vector.broadcast %cst_262 : f32 to vector<16x1xf32>
    %980 = arith.divf %978, %979 : vector<16x1xf32>
    %981 = vector.broadcast %980 : vector<16x1xf32> to vector<16x32xf32>
    %982 = arith.subf %976, %981 : vector<16x32xf32>
    %983 = arith.mulf %982, %982 : vector<16x32xf32>
    %cst_263 = arith.constant dense<0.000000e+00> : vector<16xf32>
    %984 = vector.multi_reduction <add>, %983, %cst_263 [1] : vector<16x32xf32> to vector<16xf32>
    %985 = vector.shape_cast %984 : vector<16xf32> to vector<16x1xf32>
    %cst_264 = arith.constant 3.200000e+01 : f32
    %986 = vector.broadcast %cst_264 : f32 to vector<16x1xf32>
    %987 = arith.divf %985, %986 : vector<16x1xf32>
    %988 = vector.broadcast %980 : vector<16x1xf32> to vector<16x32xf32>
    %989 = arith.subf %976, %988 : vector<16x32xf32>
    %cst_265 = arith.constant 9.99999974E-6 : f32
    %990 = vector.broadcast %cst_265 : f32 to vector<16x1xf32>
    %991 = arith.addf %987, %990 : vector<16x1xf32>
    %992 = math.rsqrt %991 : vector<16x1xf32>
    %993 = vector.broadcast %992 : vector<16x1xf32> to vector<16x32xf32>
    %994 = arith.mulf %989, %993 : vector<16x32xf32>
    %995 = vector.extract_strided_slice %975 {offsets = [0, 0], sizes = [1, 32], strides = [1, 1]} : vector<2x32xf32> to vector<1x32xf32>
    %996 = vector.broadcast %995 : vector<1x32xf32> to vector<16x32xf32>
    %997 = arith.mulf %994, %996 : vector<16x32xf32>
    %998 = vector.extract_strided_slice %975 {offsets = [1, 0], sizes = [1, 32], strides = [1, 1]} : vector<2x32xf32> to vector<1x32xf32>
    %999 = vector.broadcast %998 : vector<1x32xf32> to vector<16x32xf32>
    %1000 = arith.addf %997, %999 : vector<16x32xf32>
    %c1224 = arith.constant 1224 : index
    %c0_266 = arith.constant 0 : index
    %1001 = vector.load %arg2[%c1224, %c0_266] : memref<1264x128xf32, #tpu.memory_space<vmem>>, vector<32x64xf32>
    %1002 = arith.truncf %1000 : vector<16x32xf32> to vector<16x32xbf16>
    %1003 = arith.truncf %1001 : vector<32x64xf32> to vector<32x64xbf16>
    %cst_267 = arith.constant dense<0.000000e+00> : vector<16x64xf32>
    %1004 = tpu.matmul %1002, %1003, %cst_267 {dimension_numbers = #tpu.dot_dimension_numbers<[1], [0], [0], [1], [0, 0, 1, 1], [], []>} : vector<16x32xbf16>, vector<32x64xbf16>, vector<16x64xf32> -> vector<16x64xf32>
    %c1256 = arith.constant 1256 : index
    %c0_268 = arith.constant 0 : index
    %1005 = vector.load %arg2[%c1256, %c0_268] : memref<1264x128xf32, #tpu.memory_space<vmem>>, vector<1x64xf32>
    %1006 = vector.broadcast %1005 : vector<1x64xf32> to vector<16x64xf32>
    %1007 = arith.addf %1004, %1006 : vector<16x64xf32>
    %c0_269 = arith.constant 0 : index
    %c0_270 = arith.constant 0 : index
    %1008 = vector.load %arg3[%c0_269, %c0_270] : memref<16x64xf32, #tpu.memory_space<vmem>>, vector<16x64xf32>
    tpu.vector_store %arg3[%c0_269, %c0_270], %1007 {strides = array<i32>} : memref<16x64xf32, #tpu.memory_space<vmem>>, vector<16x64xf32>,
    return
  }
}

</mosaic_0001>

<bundles_post_ra>
// kernel: transformer_forward.1
= control target key start
LH: loop header
LB: loop body
LE: loop exit
PB: predicated region body
PF: predicated region fallthrough
CT: control target
= control target key end

     0   :  { %8 = vsyncpa [#allocation3], 0  ;;  %s6582_s0 = inlined_call_operand.vmem [shape: s32[16,1], index: 0, kind: input, shape index: {}]   ;;  %s6583_s1 = inlined_call_operand.vmem [shape: s32[16,1], index: 1, kind: input, shape index: {}]   ;;  %s6584_s2 = inlined_call_operand.hbm [shape: f32[1264,128], index: 2, kind: input, shape index: {}]   ;;  %s6585_s3 = inlined_call_operand.hbm [shape: f32[16,64], index: 3, kind: output, shape index: {}]  }
   0x1   :  { %9 = vsyncpa [#allocation4], 0  ;;  %s5742_s12 = smov [#allocation2]   ;;  %s5694_s16 = scalar_lea.hbm %s6584_s2, 20224 }
   0x2   :  { %s19_s13 = sshll.u32 %s5742_s12, 4  ;;  %p5695_p0 = scmp.ne.s32.totalorder %s6584_s2, %s5694_s16  ;;  %s20_s13 = int_to_ptr.vmem [resolvable:$true] %s19_s13 }
   0x3   :  { %p5698_p1 = scmp.lt.u32.totalorder %s5694_s16, %s6584_s2 }
   0x5   :  { %p5700_p2 = pnand %p5698_p1, %p5695_p0 }
   0x7   :  { %5703 = shalt.err (!%p5700_p2)
}
   0x8   :  { %s5704_s21 = scalar_lea.vmem %s20_s13, 20224  ;;  %p5709_p4 = scmp.lt.s32.totalorder %s20_s13, %s20_s13 }
   0x9   :  { %p5705_p3 = scmp.ne.s32.totalorder %s20_s13, %s5704_s21  ;;  %p5710_p5 = scmp.lt.s32.totalorder %s5704_s21, %s5704_s21 }
   0xb   :  { %p5711_p6 = por %p5710_p5, %p5709_p4 }
   0xd   :  { %p5712_p7 = pnand %p5711_p6, %p5705_p3 }
   0xf   :  { %5715 = shalt.err (!%p5712_p7)
}
  0x10   :  { %s5743_s22 = smov 128   ;;  %s5744_s23 = smov 8  }
  0x11   :  { %25 = dma.hbm_to_vmem [thread:$0]  %s6584_s2, 20224, %s20_s13, [#allocation3], %s5743_s22, %s5743_s22, %s5744_s23  }
  0x12   :  { %5738 = dma.done.wait [#allocation3], 20224  }
  0x13   :  { %5739 = vsyncadd [#allocation3], 4294947072  ;;  %v5745_v0 = vmov 0   ;;  %v30_v1 = vld [vmem:[%s6582_s0] sm:$0xff]  ;;  %v63_v3 = vld [vmem:[#allocation2 + $0x8] sm:$0xff]  ;;  %v36_v27 = vlaneseq  ;;  %v5746_v30 = vmov 1.0  }
  0x14   :  { %5525 = vset.pattern.permute.xlu0 %v5745_v0  ;;  %5526 = vset.pattern.permute.xlu1 %v5745_v0  ;;  %v62_v2 = vld [vmem:[#allocation2] sm:$0xff]  ;;  %v64_v4 = vld [vmem:[#allocation2 + $0x10] sm:$0xff]  ;;  %v65_v5 = vld [vmem:[#allocation2 + $0x18] sm:$0xff]  ;;  %v5747_v35 = vmov 0.0   ;;  %vm5748_vm2 = vmmov 0   ;;  %vm184_vm3 = vcmask 261120  }
  0x15   :  { %39 = vperm.xlu0 %5525, %v30_v1   ;;  %v31_v6 = vld [vmem:[%s6582_s0 + $0x8] sm:$0xff]  ;;  %v5479_v7 = vpack.c.bf16 %v63_v3, %v62_v2  ;;  %v5483_v8 = vpack.c.bf16 %v65_v5, %v64_v4  ;;  %v66_v9 = vld [vmem:[#allocation2 + $0x20] sm:$0xff]  ;;  %v68_v12 = vld [vmem:[#allocation2 + $0x30] sm:$0xff]  ;;  %v5798_v28 = vand.u32 127, %v36_v27  ;;  %4991 = vmatprep.subr.bf16.mxu1 %v5747_v35  ;;  %s5749_s0 = smov 96   ;;  %vm233_vm4 = vcmask 130048  }
  0x16   :  { %v67_v10 = vld [vmem:[#allocation2 + $0x28] sm:$0xff]  ;;  %v69_v13 = vld [vmem:[#allocation2 + $0x38] sm:$0xff]  ;;  %v70_v15 = vld [vmem:[#allocation2 + $0x40] sm:$0xff]  ;;  %4995 = vmatprep.mubr.msk.bf16.mxu1 %vm5748_vm2, %v5747_v35  ;;  %vm281_vm5 = vcmask 64512   ;;  %s5750_s2 = smov 80   ;;  %s5751_s30 = smov 112  }
  0x17   :  { %5480 = vmatprep.subr.bf16.mxu0 %v5479_v7  ;;  %v5487_v11 = vpack.c.bf16 %v67_v10, %v66_v9  ;;  %v5491_v14 = vpack.c.bf16 %v69_v13, %v68_v12  ;;  %v71_v16 = vld [vmem:[#allocation2 + $0x48] sm:$0xff]  ;;  %v72_v18 = vld [vmem:[#allocation2 + $0x50] sm:$0xff]  ;;  %v73_v19 = vld [vmem:[#allocation2 + $0x58] sm:$0xff]  ;;  %s5752_s4 = smov 64   ;;  %vm299_vm6 = vcmask 1043456   ;;  %s5753_s7 = smov 48  }
  0x18   :  { %5482 = vmatpush3.bf16.msra.mxu0 %v5479_v7  ;;  %v5495_v17 = vpack.c.bf16 %v71_v16, %v70_v15  ;;  %v5499_v20 = vpack.c.bf16 %v73_v19, %v72_v18  ;;  %v74_v21 = vld [vmem:[#allocation2 + $0x60] sm:$0xff]  ;;  %v75_v22 = vld [vmem:[#allocation2 + $0x68] sm:$0xff]  ;;  %v76_v24 = vld [vmem:[#allocation2 + $0x70] sm:$0xff]  ;;  %vm860_vm9 = vcmask 523264   ;;  %s5755_s10 = smov [#allocation5]  }
  0x19   :  { %42 = vperm.xlu0 %5525, %v31_v6   ;;  %5484 = vmatprep.subr.bf16.mxu0 %v5483_v8  ;;  %v5503_v23 = vpack.c.bf16 %v75_v22, %v74_v21  ;;  %v77_v25 = vld [vmem:[#allocation2 + $0x78] sm:$0xff]  ;;  %v172_v32 = vld [vmem:[#allocation2 + $0x88] sm:$0xff]  ;;  %v173_v33 = vld [vmem:[#allocation2 + $0x90] sm:$0xff]  ;;  %s4646_s11 = sshll.u32 %s5755_s10, 4  ;;  %s4647_s11 = int_to_ptr.vmem [resolvable:$true] %s4646_s11 }
  0x1a   :  { %v5507_v26 = vpack.c.bf16 %v77_v25, %v76_v24  ;;  %v177_v34 = vpack.c.bf16 %v173_v33, %v172_v32  ;;  %v174_v36 = vld [vmem:[#allocation2 + $0x98] sm:$0xff]  ;;  %v175_v37 = vld [vmem:[#allocation2 + $0xa0] sm:$0xff]  ;;  %v4666_v47 = vld [vmem:[#allocation2 + $0xa8] ss:$0 sm:$0xff]  ;;  %s5716_s12 = scalar_lea.vmem %s4647_s11, 256  ;;  %p5721_p9 = scmp.lt.s32.totalorder %s4647_s11, %s4647_s11 }
  0x1b   :  { %v178_v38 = vpack.c.bf16 %v175_v37, %v174_v36  ;;  %v163_v40 = vld [vmem:[#allocation2 + $0x80] sm:$0xff]  ;;  %p5717_p8 = scmp.ne.s32.totalorder %s4647_s11, %s5716_s12  ;;  %p5722_p10 = scmp.lt.s32.totalorder %s5716_s12, %s5716_s12 }
  0x1c   :  { %5486 = vmatpush3.bf16.msra.mxu0 %v5483_v8  ;;  %4992 = vmatpush3.bf16.msra.mxu1 %v177_v34 }
  0x1d   :  { %5488 = vmatprep.subr.bf16.mxu0 %v5487_v11  ;;  %4993 = vmatprep.subr.bf16.mxu1 %v5747_v35  ;;  %p5723_p11 = por %p5722_p10, %p5721_p9 }
  0x1f   :  { %p5724_p12 = pnand %p5723_p11, %p5717_p8 }
  0x20   :  { %5490 = vmatpush3.bf16.msra.mxu0 %v5487_v11  ;;  %4994 = vmatpush3.bf16.msra.mxu1 %v178_v38 }
  0x21   :  { %5492 = vmatprep.subr.bf16.mxu0 %v5491_v14  ;;  %4999 = vmatprep.subr.bf16.mxu1 %v5747_v35 }
  0x24   :  { %5494 = vmatpush3.bf16.msra.mxu0 %v5491_v14 }
  0x25   :  { %5496 = vmatprep.subr.bf16.mxu0 %v5495_v17 }
  0x28   :  { %5498 = vmatpush3.bf16.msra.mxu0 %v5495_v17 }
  0x29   :  { %5500 = vmatprep.subr.bf16.mxu0 %v5499_v20 }
  0x2c   :  { %5502 = vmatpush3.bf16.msra.mxu0 %v5499_v20 }
  0x2d   :  { %5504 = vmatprep.subr.bf16.mxu0 %v5503_v23 }
  0x30   :  { %5506 = vmatpush3.bf16.msra.mxu0 %v5503_v23 }
  0x31   :  { %5508 = vmatprep.subr.bf16.mxu0 %v5507_v26 }
  0x34   :  { %5510 = vmatpush3.bf16.msra.mxu0 %v5507_v26 }
  0x35   :  { %5017 = vmatprep.subr.bf16.mxu0 %v5747_v35 }
  0x94   :  { %v40_v29 = vpop.permute.xlu0 %39 }
  0x95   :  { %vm50_vm0 = vcmp.eq.s32.totalorder %v40_v29, %v5798_v28 }
  0x96   :  { %4985 = vmatprep.mubr.msk.f32.mxu0 %vm50_vm0, %v5746_v30 }
  0x98   :  { %v43_v31 = vpop.permute.xlu0 %42 }
  0x99   :  { %vm51_vm1 = vcmp.eq.s32.totalorder %v43_v31, %v5798_v28 }
  0x9a   :  { %4986 = vmatmul.mubr.msk.f32.vlgmr.msra.gmra.mrb[0].mxu0 %vm51_vm1, %v5746_v30 }
 0x16d   :  { %v4987_v39 = vpop.f32.mrb[0].mxu0 }
 0x16e   :  { %v165_v41 = vmul.f32 5.656854, %v4987_v39  ;;  %v144_v42 = vpop.f32.mrb[1].mxu0  ;;  %v32_v39 = vld [vmem:[%s6583_s1] sm:$0xff] }
 0x16f   :  { %v164_v43 = vmul.f32 5.656854, %v144_v42 }
 0x170   :  { %v5810_v44 = vadd.f32 %v165_v41, %v163_v40 }
 0x171   :  { %v5812_v45 = vadd.f32 %v164_v43, %v163_v40  ;;  %v34_v43 = vadd.s32 64, %v32_v39 }
 0x173   :  { %v176_v46 = vpack.c.bf16 %v5810_v44, %v5812_v45 }
 0x175   :  { %4996 = vmatmul.mubr.msk.bf16.vlgmr.msra.gmra.mrb[0].mxu1 %vm184_vm3, %v176_v46 }
 0x176   :  { %5001 = vmatprep.mubr.msk.bf16.mxu1 %vm5748_vm2, %v5747_v35 }
 0x248   :  { %v222_v48 = vpop.f32.mrb[0].mxu1 }
 0x249   :  { %v223_v49 = vadd.f32 %v4666_v47, %v222_v48  ;;  %v4997_v50 = vpop.f32.mrb[1].mxu1 }
 0x24a   :  { %v225_v51 = vpop.f32.mrb[2].mxu1 }
 0x24b   :  { %v5819_v52 = vpack.c.bf16 %v223_v49, %v223_v49  ;;  %v226_v53 = vadd.f32 %v4666_v47, %v225_v51  ;;  %v4998_v54 = vpop.f32.mrb[3].mxu1 }
 0x24d   :  { %231 = vrot.lane.b32.xlu1 %v5819_v52, %s5749_s0  ;;  %v5834_v63 = vpack.c.bf16 %v226_v53, %v226_v53 }
 0x2bf   :  { %v232_v55 = vpop.permute.xlu1 %231 }
 0x2c0   :  { %v238_v56 = vsel %vm233_vm4, %v232_v55, 0 }
 0x2c1   :  { %5000 = vmatpush3.bf16.xpose.msra.mxu1 %v238_v56 }
 0x2c2   :  { %5005 = vmatprep.subr.bf16.mxu1 %v5747_v35 }
 0x2c8   :  { %5002 = vmatmul.mubr.msk.bf16.vlgmr.msra.gmra.mrb[4].mxu1 %vm233_vm4, %v5819_v52 }
 0x2c9   :  { %5007 = vmatprep.mubr.msk.bf16.mxu1 %vm5748_vm2, %v5747_v35 }
 0x39b   :  { %v274_v57 = vpop.f32.mrb[4].mxu1 }
 0x39c   :  { %v280_v58 = vmul.f32 0.25, %v274_v57  ;;  %v5003_v59 = vpop.f32.mrb[5].mxu1 }
 0x39d   :  { %v277_v60 = vpop.f32.mrb[6].mxu1 }
 0x39e   :  { %v5004_v61 = vpop.f32.mrb[7].mxu1  ;;  %v282_v62 = vsel %vm281_vm5, %v280_v58, -inf }
 0x39f   :  { %283 = vmax.xlane.f32.xlu1 %v282_v62 }
 0x3b0   :  { %345 = vrot.lane.b32.xlu1 %v5819_v52, %s5750_s2 }
 0x3b4   :  { %343 = vrot.lane.b32.xlu1 %v5819_v52, %s5751_s30 }
 0x3b8   :  { %572 = vrot.lane.b32.xlu1 %v5834_v63, %s5750_s2 }
 0x42c   :  { %v284_v0 = vpop.xlane.xlu1 %283 }
 0x42d   :  { %v285_v1 = vsub.f32 %v280_v58, %v284_v0 }
 0x42f   :  { %v286_v2 = vmul.f32 1.442695, %v285_v1 }
 0x430   :  { %v346_v10 = vpop.permute.xlu1 %345 }
 0x431   :  { %5557 = vpow2.f32 %v286_v2  ;;  %v351_v12 = vsel %vm233_vm4, %v346_v10, 0 }
 0x434   :  { %v344_v14 = vpop.permute.xlu1 %343 }
 0x438   :  { %v573_v16 = vpop.permute.xlu1 %572 }
 0x439   :  { %v578_v17 = vsel %vm233_vm4, %v573_v16, 0 }
 0x43b   :  { %v5558_v3 = vpop.eup %5557 }
 0x43c   :  { %v288_v4 = vsel %vm281_vm5, %v5558_v3, 0.0 }
 0x43d   :  { %289 = vadd.xlane.f32.xlu0 %v288_v4 }
 0x453   :  { %294 = vrot.lane.b32.xlu0 %v5819_v52, %s5752_s4 }
 0x457   :  { %461 = vrot.lane.b32.xlu0 %v5834_v63, %s5749_s0 }
 0x45b   :  { %570 = vrot.lane.b32.xlu0 %v5834_v63, %s5751_s30 }
 0x4ca   :  { %v290_v5 = vpop.xlane.xlu0 %289 }
 0x4cb   :  { %5559 = vrcp.f32 %v290_v5 }
 0x4ce   :  { %v295_v6 = vpop.permute.xlu0 %294 }
 0x4cf   :  { %v301_v7 = vsel %vm299_vm6, %v295_v6, 0 }
 0x4d0   :  { %5006 = vmatpush3.bf16.msra.mxu1 %v301_v7 }
 0x4d1   :  { %5011 = vmatprep.subr.bf16.mxu1 %v5747_v35 }
 0x4d2   :  { %v462_v13 = vpop.permute.xlu0 %461 }
 0x4d3   :  { %v467_v15 = vsel %vm233_vm4, %v462_v13, 0 }
 0x4d5   :  { %v5560_v8 = vpop.eup %5559 }
 0x4d6   :  { %v292_v9 = vmul.f32 %v5560_v8, %v5558_v3  ;;  %v571_v18 = vpop.permute.xlu0 %570  ;;  %v33_v3 = vld [vmem:[%s6583_s1 + $0x8] sm:$0xff]  ;;  %s5754_s1 = smov 16  }
 0x4d7   :  { %v35_v4 = vadd.s32 64, %v33_v3 }
 0x4d8   :  { %v293_v11 = vpack.c.bf16 %v292_v9, %v292_v9 }
 0x4da   :  { %5008 = vmatmul.mubr.msk.bf16.vlgmr.msra.gmra.mrb[8].mxu1 %vm281_vm5, %v293_v11 }
 0x4db   :  { %5012 = vmatpush3.bf16.xpose.msra.mxu1 %v351_v12  ;;  %5013 = vmatprep.mubr.msk.bf16.mxu1 %vm5748_vm2, %v5747_v35 }
 0x4dc   :  { %5023 = vmatprep.subr.bf16.mxu1 %v5747_v35 }
 0x4e2   :  { %5014 = vmatmul.mubr.msk.bf16.vlgmr.msra.gmra.mrb[12].mxu1 %vm233_vm4, %v344_v14 }
 0x4e3   :  { %5024 = vmatpush3.bf16.xpose.msra.mxu1 %v467_v15  ;;  %5025 = vmatprep.mubr.msk.bf16.mxu1 %vm5748_vm2, %v5747_v35 }
 0x4e4   :  { %5035 = vmatprep.subr.bf16.mxu1 %v5747_v35 }
 0x4ea   :  { %5026 = vmatmul.mubr.msk.bf16.vlgmr.msra.gmra.mrb[16].mxu1 %vm233_vm4, %v5834_v63 }
 0x4eb   :  { %5036 = vmatpush3.bf16.xpose.msra.mxu1 %v578_v17  ;;  %5037 = vmatprep.mubr.msk.bf16.mxu1 %vm5748_vm2, %v5747_v35 }
 0x4ec   :  { %5047 = vmatprep.subr.bf16.mxu1 %v5747_v35 }
 0x4f2   :  { %5038 = vmatmul.mubr.msk.bf16.vlgmr.msra.gmra.mrb[20].mxu1 %vm233_vm4, %v571_v18 }
 0x4f3   :  { %5051 = vmatprep.mubr.msk.bf16.mxu1 %vm5748_vm2, %v5747_v35 }
 0x5ad   :  { %v5866_v19 = vpop.f32.mrb[8].mxu1 }
 0x5ae   :  { %v5009_v20 = vpop.f32.mrb[9].mxu1 }
 0x5af   :  { %v340_v21 = vpop.f32.mrb[10].mxu1 }
 0x5b0   :  { %v5010_v22 = vpop.f32.mrb[11].mxu1 }
 0x5b1   :  { %v686_v22 = vld [vmem:[#allocation2 + $0xb0] sm:$0xff] }
 0x5b5   :  { %v387_v23 = vpop.f32.mrb[12].mxu1 }
 0x5b6   :  { %v393_v24 = vmul.f32 0.25, %v387_v23  ;;  %v5015_v25 = vpop.f32.mrb[13].mxu1  ;;  %v687_v23 = vld [vmem:[#allocation2 + $0xb8] sm:$0xff] }
 0x5b7   :  { %v390_v26 = vpop.f32.mrb[14].mxu1 }
 0x5b8   :  { %v5016_v29 = vpop.f32.mrb[15].mxu1  ;;  %v394_v31 = vsel %vm281_vm5, %v393_v24, -inf }
 0x5b9   :  { %395 = vmax.xlane.f32.xlu1 %v394_v31 }
 0x5bd   :  { %v503_v32 = vpop.f32.mrb[16].mxu1 }
 0x5be   :  { %v509_v33 = vmul.f32 0.25, %v503_v32  ;;  %v5027_v34 = vpop.f32.mrb[17].mxu1 }
 0x5bf   :  { %v506_v36 = vpop.f32.mrb[18].mxu1  ;;  %v688_v34 = vld [vmem:[#allocation2 + $0xc0] sm:$0xff] }
 0x5c0   :  { %v5028_v37 = vpop.f32.mrb[19].mxu1  ;;  %v510_v38 = vsel %vm281_vm5, %v509_v33, -inf  ;;  %v689_v36 = vld [vmem:[#allocation2 + $0xc8] sm:$0xff] }
 0x5c1   :  { %511 = vmax.xlane.f32.xlu0 %v510_v38  ;;  %v692_v37 = vpack.c.bf16 %v689_v36, %v688_v34  ;;  %v742_v34 = vld [vmem:[#allocation2 + $0xd8] sm:$0x3] }
 0x5c5   :  { %v614_v40 = vpop.f32.mrb[20].mxu1 }
 0x5c6   :  { %v620_v41 = vmul.f32 0.25, %v614_v40  ;;  %v5039_v42 = vpop.f32.mrb[21].mxu1 }
 0x5c7   :  { %v617_v46 = vpop.f32.mrb[22].mxu1 }
 0x5c8   :  { %v5040_v47 = vpop.f32.mrb[23].mxu1  ;;  %v621_v48 = vsel %vm281_vm5, %v620_v41, -inf }
 0x5c9   :  { %622 = vmax.xlane.f32.xlu0 %v621_v48 }
 0x5ca   :  { %45 = vperm.xlu1 %5526, %v34_v43  }
 0x646   :  { %v396_v49 = vpop.xlane.xlu1 %395 }
 0x647   :  { %v397_v50 = vsub.f32 %v393_v24, %v396_v49  ;;  %v691_v24 = vpack.c.bf16 %v687_v23, %v686_v22 }
 0x649   :  { %v398_v51 = vmul.f32 1.442695, %v397_v50  ;;  %5048 = vmatpush3.bf16.msra.mxu1 %v691_v24 }
 0x64a   :  { %v46_v53 = vpop.permute.xlu1 %45  ;;  %5049 = vmatprep.subr.bf16.mxu1 %v5747_v35 }
 0x64b   :  { %5561 = vpow2.f32 %v398_v51  ;;  %vm52_vm7 = vcmp.eq.s32.totalorder %v46_v53, %v5798_v28 }
 0x64c   :  { %4988 = vmatprep.mubr.msk.f32.mxu0 %vm52_vm7, %v5746_v30 }
 0x64d   :  { %5050 = vmatpush3.bf16.msra.mxu1 %v692_v37 }
 0x64e   :  { %v512_v54 = vpop.xlane.xlu0 %511  ;;  %5063 = vmatprep.subr.bf16.mxu1 %v5747_v35 }
 0x64f   :  { %v513_v55 = vsub.f32 %v509_v33, %v512_v54 }
 0x651   :  { %v514_v56 = vmul.f32 1.442695, %v513_v55 }
 0x653   :  { %5563 = vpow2.f32 %v514_v56  ;;  %v4676_v56 = vld [vmem:[#allocation2 + $0xd0] ss:$0 sm:$0xff] }
 0x655   :  { %v5562_v57 = vpop.eup %5561 }
 0x656   :  { %v623_v58 = vpop.xlane.xlu0 %622  ;;  %v400_v59 = vsel %vm281_vm5, %v5562_v57, 0.0 }
 0x657   :  { %v624_v60 = vsub.f32 %v620_v41, %v623_v58  ;;  %401 = vadd.xlane.f32.xlu1 %v400_v59 }
 0x659   :  { %v625_v61 = vmul.f32 1.442695, %v624_v60 }
 0x65b   :  { %5565 = vpow2.f32 %v625_v61 }
 0x65d   :  { %v5564_v62 = vpop.eup %5563 }
 0x65e   :  { %v516_v0 = vsel %vm281_vm5, %v5564_v62, 0.0 }
 0x65f   :  { %517 = vadd.xlane.f32.xlu0 %v516_v0 }
 0x665   :  { %v5566_v1 = vpop.eup %5565 }
 0x666   :  { %v627_v2 = vsel %vm281_vm5, %v5566_v1, 0.0 }
 0x667   :  { %628 = vadd.xlane.f32.xlu0 %v627_v2 }
 0x668   :  { %406 = vrot.lane.b32.xlu1 %v5819_v52, %s5753_s7 }
 0x66c   :  { %522 = vrot.lane.b32.xlu1 %v5834_v63, %s5752_s4 }
 0x670   :  { %633 = vrot.lane.b32.xlu1 %v5834_v63, %s5753_s7 }
 0x67d   :  { %48 = vperm.xlu0 %5525, %v35_v4  }
 0x6e4   :  { %v402_v5 = vpop.xlane.xlu1 %401 }
 0x6e5   :  { %5567 = vrcp.f32 %v402_v5 }
 0x6e8   :  { %v407_v6 = vpop.permute.xlu1 %406 }
 0x6e9   :  { %v412_v7 = vsel %vm299_vm6, %v407_v6, 0 }
 0x6ea   :  { %5018 = vmatpush3.bf16.msra.mxu0 %v412_v7 }
 0x6eb   :  { %5029 = vmatprep.subr.bf16.mxu0 %v5747_v35 }
 0x6ec   :  { %v518_v52 = vpop.xlane.xlu0 %517  ;;  %v523_v11 = vpop.permute.xlu1 %522 }
 0x6ed   :  { %5569 = vrcp.f32 %v518_v52  ;;  %v528_v14 = vsel %vm299_vm6, %v523_v11, 0 }
 0x6ef   :  { %v5568_v9 = vpop.eup %5567 }
 0x6f0   :  { %v404_v10 = vmul.f32 %v5568_v9, %v5562_v57  ;;  %v634_v16 = vpop.permute.xlu1 %633 }
 0x6f1   :  { %v639_v18 = vsel %vm299_vm6, %v634_v16, 0  ;;  %v843_v16 = vld [vmem:[#allocation2 + $0x110] sm:$0xff] }
 0x6f2   :  { %v405_v12 = vpack.c.bf16 %v404_v10, %v404_v10 }
 0x6f4   :  { %v629_v8 = vpop.xlane.xlu0 %628 }
 0x6f5   :  { %5571 = vrcp.f32 %v629_v8 }
 0x6f7   :  { %v5570_v13 = vpop.eup %5569 }
 0x6f8   :  { %v520_v15 = vmul.f32 %v5570_v13, %v5564_v62  ;;  %v787_v13 = vld [vmem:[#allocation2 + $0xf8] sm:$0xff] }
 0x6fc   :  { %v49_v63 = vpop.permute.xlu0 %48 }
 0x6fd   :  { %vm53_vm8 = vcmp.eq.s32.totalorder %v49_v63, %v5798_v28  ;;  %v784_v63 = vld [vmem:[#allocation2 + $0xe0] sm:$0xff] }
 0x6fe   :  { %4989 = vmatmul.mubr.msk.f32.gmra.mrb[2].mxu0 %vm53_vm8, %v5746_v30  ;;  %v521_v30 = vpack.c.bf16 %v520_v15, %v520_v15  ;;  %v842_v15 = vld [vmem:[#allocation2 + $0x108] sm:$0xff] }
 0x6ff   :  { %5019 = vmatprep.mubr.msk.bf16.mxu0 %vm5748_vm2, %v5747_v35  ;;  %v5572_v17 = vpop.eup %5571 }
 0x700   :  { %v631_v20 = vmul.f32 %v5572_v17, %v5566_v1  ;;  %v851_v17 = vpack.c.bf16 %v843_v16, %v842_v15 }
 0x702   :  { %5020 = vmatmul.mubr.msk.bf16.vlgmr.msra.gmra.mrb[4].mxu0 %vm281_vm5, %v405_v12  ;;  %v632_v21 = vpack.c.bf16 %v631_v20, %v631_v20  ;;  %v786_v12 = vld [vmem:[#allocation2 + $0xf0] sm:$0xff] }
 0x703   :  { %5030 = vmatpush3.bf16.msra.mxu0 %v528_v14  ;;  %5031 = vmatprep.mubr.msk.bf16.mxu0 %vm5748_vm2, %v5747_v35  ;;  %v790_v14 = vpack.c.bf16 %v787_v13, %v786_v12 }
 0x704   :  { %5041 = vmatprep.subr.bf16.mxu0 %v5747_v35 }
 0x70a   :  { %5032 = vmatmul.mubr.msk.bf16.vlgmr.msra.gmra.mrb[8].mxu0 %vm281_vm5, %v521_v30  ;;  %v844_v30 = vld [vmem:[#allocation2 + $0x118] sm:$0xff] }
 0x70b   :  { %5042 = vmatpush3.bf16.msra.mxu0 %v639_v18  ;;  %5043 = vmatprep.mubr.msk.bf16.mxu0 %vm5748_vm2, %v5747_v35  ;;  %v845_v18 = vld [vmem:[#allocation2 + $0x120] sm:$0xff] }
 0x70c   :  { %5055 = vmatprep.subr.bf16.mxu0 %v5747_v35  ;;  %v852_v20 = vpack.c.bf16 %v845_v18, %v844_v30  ;;  %v946_v18 = vld [vmem:[#allocation2 + $0x158] sm:$0xff] }
 0x712   :  { %5044 = vmatmul.mubr.msk.bf16.vlgmr.msra.gmra.mrb[12].mxu0 %vm281_vm5, %v632_v21 }
 0x713   :  { %5059 = vmatprep.mubr.msk.bf16.mxu0 %vm5748_vm2, %v5747_v35 }
 0x7d1   :  { %v5908_v25 = vpop.f32.mrb[2].mxu0 }
 0x7d2   :  { %v5910_v26 = vpop.f32.mrb[3].mxu0 }
 0x7d5   :  { %v448_v29 = vpop.f32.mrb[4].mxu0 }
 0x7d6   :  { %v5021_v31 = vpop.f32.mrb[5].mxu0 }
 0x7d7   :  { %v451_v32 = vpop.f32.mrb[6].mxu0 }
 0x7d8   :  { %v5022_v33 = vpop.f32.mrb[7].mxu0  ;;  %v5931_v32 = vshrl.u32 %v36_v27, 7 }
 0x7da   :  { %v5934_v33 = vsub.s32 0, %v5931_v32  ;;  %v5937_v36 = vsub.s32 1, %v5931_v32  ;;  %vm6134_vm10 = vcmp.le.s32.totalorder %v5798_v28, %v5931_v32 }
 0x7dc   :  { %v775_v37 = vrot.slane %v742_v34, %v5934_v33 }
 0x7dd   :  { %v564_v38 = vpop.f32.mrb[8].mxu0 }
 0x7de   :  { %v5033_v39 = vpop.f32.mrb[9].mxu0 }
 0x7df   :  { %v567_v40 = vpop.f32.mrb[10].mxu0 }
 0x7e0   :  { %v5034_v41 = vpop.f32.mrb[11].mxu0 }
 0x7e5   :  { %v675_v42 = vpop.f32.mrb[12].mxu0 }
 0x7e6   :  { %v5527_v43 = vpack.i.bf16 %v675_v42, %v448_v29  ;;  %v5045_v46 = vpop.f32.mrb[13].mxu0 }
 0x7e7   :  { %v678_v47 = vpop.f32.mrb[14].mxu0 }
 0x7e8   :  { %5528 = vrot.lane.b32.xlu0 %v5527_v43, %s5754_s1  ;;  %v5046_v48 = vpop.f32.mrb[15].mxu0  ;;  %v781_v43 = vrot.slane %v742_v34, %v5937_v36 }
 0x85a   :  { %v5529_v49 = vpop.permute.xlu0 %5528 }
 0x85b   :  { %v5531_v50 = vunpack.i.h.bf16 %v5529_v49  ;;  %v5530_v51 = vunpack.i.l.bf16 %v5529_v49  ;;  %v846_v49 = vld [vmem:[#allocation2 + $0x128] sm:$0xff] }
 0x85d   :  { %v685_v53 = vsel %vm233_vm4, %v564_v38, %v5531_v50  ;;  %v458_v54 = vsel %vm233_vm4, %v5866_v19, %v5530_v51  ;;  %v847_v50 = vld [vmem:[#allocation2 + $0x130] sm:$0xff] }
 0x85e   :  { %v690_v55 = vpack.c.bf16 %v685_v53, %v458_v54  ;;  %v853_v51 = vpack.c.bf16 %v847_v50, %v846_v49  ;;  %v848_v53 = vld [vmem:[#allocation2 + $0x138] sm:$0xff]  ;;  %v849_v54 = vld [vmem:[#allocation2 + $0x140] sm:$0xff] }
 0x860   :  { %5052 = vmatmul.mubr.msk.bf16.vlgmr.msra.gmra.mrb[24].mxu1 %vm184_vm3, %v690_v55  ;;  %v854_v55 = vpack.c.bf16 %v849_v54, %v848_v53  ;;  %v4682_v54 = vld [vmem:[#allocation2 + $0x178] ss:$0 sm:$0xff] }
 0x861   :  { %5071 = vmatprep.mubr.msk.bf16.mxu1 %vm5748_vm2, %v5747_v35  ;;  %5064 = vmatpush3.bf16.msra.mxu1 %v851_v17 }
 0x862   :  { %5065 = vmatprep.subr.bf16.mxu1 %v5747_v35 }
 0x865   :  { %5066 = vmatpush3.bf16.msra.mxu1 %v852_v20  ;;  %v947_v20 = vld [vmem:[#allocation2 + $0x160] sm:$0xff] }
 0x866   :  { %5067 = vmatprep.subr.bf16.mxu1 %v5747_v35 }
 0x869   :  { %5068 = vmatpush3.bf16.msra.mxu1 %v853_v51 }
 0x86a   :  { %5069 = vmatprep.subr.bf16.mxu1 %v5747_v35 }
 0x86d   :  { %5070 = vmatpush3.bf16.msra.mxu1 %v854_v55 }
 0x86e   :  { %5089 = vmatprep.subr.bf16.mxu1 %v5747_v35 }
 0x933   :  { %v735_v57 = vpop.f32.mrb[24].mxu1 }
 0x934   :  { %v736_v58 = vadd.f32 %v4676_v56, %v735_v57  ;;  %v5053_v59 = vpop.f32.mrb[25].mxu1 }
 0x935   :  { %v738_v60 = vpop.f32.mrb[26].mxu1 }
 0x936   :  { %v739_v61 = vadd.f32 %v4676_v56, %v738_v60  ;;  %v5054_v62 = vpop.f32.mrb[27].mxu1  ;;  %v743_v0 = vadd.f32 %v736_v58, %v5812_v45  ;;  %v4678_v56 = vld [vmem:[#allocation2 + $0x100] ss:$0 sm:$0xff] }
 0x938   :  { %v745_v1 = vsel %vm184_vm3, %v743_v0, 0.0  ;;  %v744_v2 = vadd.f32 %v739_v61, %v5810_v44  ;;  %v785_v44 = vld [vmem:[#allocation2 + $0xe8] sm:$0xff] }
 0x939   :  { %746 = vadd.xlane.f32.xlu1 %v745_v1  ;;  %v789_v11 = vpack.c.bf16 %v785_v44, %v784_v63 }
 0x93a   :  { %v748_v19 = vsel %vm184_vm3, %v744_v2, 0.0 }
 0x93b   :  { %749 = vadd.xlane.f32.xlu0 %v748_v19  ;;  %5056 = vmatpush3.bf16.msra.mxu0 %v789_v11  ;;  %v4680_v19 = vld [vmem:[#allocation2 + $0x148] ss:$0 sm:$0xff] }
 0x93c   :  { %5057 = vmatprep.subr.bf16.mxu0 %v5747_v35 }
 0x93f   :  { %5058 = vmatpush3.bf16.msra.mxu0 %v790_v14 }
 0x940   :  { %5075 = vmatprep.subr.bf16.mxu0 %v5747_v35 }
 0x9c6   :  { %v747_v3 = vpop.xlane.xlu1 %746 }
 0x9c7   :  { %v752_v4 = vmul.f32 0.03125, %v747_v3 }
 0x9c8   :  { %v750_v5 = vpop.xlane.xlu0 %749 }
 0x9c9   :  { %v754_v6 = vsub.f32 %v743_v0, %v752_v4  ;;  %v753_v7 = vmul.f32 0.03125, %v750_v5 }
 0x9cb   :  { %v755_v52 = vsub.f32 %v744_v2, %v753_v7  ;;  %v756_v8 = vmul.f32 %v754_v6, %v754_v6 }
 0x9cd   :  { %v758_v9 = vsel %vm184_vm3, %v756_v8, 0.0  ;;  %v757_v10 = vmul.f32 %v755_v52, %v755_v52 }
 0x9ce   :  { %759 = vadd.xlane.f32.xlu0 %v758_v9 }
 0x9cf   :  { %v761_v45 = vsel %vm184_vm3, %v757_v10, 0.0 }
 0x9d0   :  { %762 = vadd.xlane.f32.xlu1 %v761_v45 }
 0xa5b   :  { %v760_v21 = vpop.xlane.xlu0 %759 }
 0xa5c   :  { %v764_v22 = vmul.f32 0.03125, %v760_v21  ;;  %v951_v21 = vpack.c.bf16 %v947_v20, %v946_v18 }
 0xa5d   :  { %v763_v23 = vpop.xlane.xlu1 %762 }
 0xa5e   :  { %v766_v24 = vadd.f32 1e-05, %v764_v22  ;;  %v765_v29 = vmul.f32 0.03125, %v763_v23  ;;  %v948_v22 = vld [vmem:[#allocation2 + $0x168] sm:$0xff]  ;;  %v949_v23 = vld [vmem:[#allocation2 + $0x170] sm:$0xff] }
 0xa60   :  { %5573 = vrsqrt.f32 %v766_v24  ;;  %v767_v31 = vadd.f32 1e-05, %v765_v29  ;;  %v952_v24 = vpack.c.bf16 %v949_v23, %v948_v22 }
 0xa62   :  { %5575 = vrsqrt.f32 %v767_v31 }
 0xa6a   :  { %v5574_v38 = vpop.eup %5573 }
 0xa6b   :  { %v770_v39 = vmul.f32 %v5574_v38, %v754_v6 }
 0xa6c   :  { %v5576_v40 = vpop.eup %5575 }
 0xa6d   :  { %v776_v41 = vmul.f32 %v775_v37, %v770_v39  ;;  %v771_v42 = vmul.f32 %v5576_v40, %v755_v52  ;;  %v905_v40 = vld [vmem:[#allocation2 + $0x150] sm:$0x3] }
 0xa6f   :  { %v777_v46 = vmul.f32 %v775_v37, %v771_v42  ;;  %v782_v27 = vadd.f32 %v781_v43, %v776_v41  ;;  %v937_v41 = vrot.slane %v905_v40, %v5934_v33 }
 0xa71   :  { %v783_v47 = vadd.f32 %v781_v43, %v777_v46 }
 0xa73   :  { %v788_v48 = vpack.c.bf16 %v783_v47, %v782_v27 }
 0xa75   :  { %5060 = vmatmul.mubr.msk.bf16.vlgmr.msra.gmra.mrb[16].mxu0 %vm184_vm3, %v788_v48  ;;  %v943_v48 = vrot.slane %v905_v40, %v5937_v36 }
 0xa76   :  { %5079 = vmatprep.mubr.msk.bf16.mxu0 %vm5748_vm2, %v5747_v35  ;;  %5076 = vmatpush3.bf16.msra.mxu0 %v951_v21 }
 0xa77   :  { %5077 = vmatprep.subr.bf16.mxu0 %v5747_v35 }
 0xa7a   :  { %5078 = vmatpush3.bf16.msra.mxu0 %v952_v24 }
 0xa7b   :  { %5083 = vmatprep.subr.bf16.mxu0 %v5747_v35 }
 0xb48   :  { %v833_v57 = vpop.f32.mrb[16].mxu0 }
 0xb49   :  { %v834_v58 = vadd.f32 %v4678_v56, %v833_v57  ;;  %v5061_v59 = vpop.f32.mrb[17].mxu0 }
 0xb4a   :  { %v836_v60 = vpop.f32.mrb[18].mxu0 }
 0xb4b   :  { %v837_v61 = vadd.f32 %v4678_v56, %v836_v60  ;;  %v5062_v62 = vpop.f32.mrb[19].mxu0  ;;  %v840_v0 = vmax.f32 %v834_v58, 0.0 }
 0xb4d   :  { %v841_v1 = vmax.f32 %v837_v61, 0.0 }
 0xb4f   :  { %v850_v2 = vpack.c.bf16 %v841_v1, %v840_v0 }
 0xb51   :  { %5072 = vmatmul.mubr.msk.bf16.vlgmr.msra.gmra.mrb[28].mxu1 %vm860_vm9, %v850_v2 }
 0xb52   :  { %5091 = vmatprep.mubr.msk.bf16.mxu1 %vm5748_vm2, %v5747_v35 }
 0xc24   :  { %v898_v3 = vpop.f32.mrb[28].mxu1 }
 0xc25   :  { %v899_v4 = vadd.f32 %v4680_v19, %v898_v3  ;;  %v5073_v5 = vpop.f32.mrb[29].mxu1 }
 0xc26   :  { %v901_v6 = vpop.f32.mrb[30].mxu1 }
 0xc27   :  { %v902_v7 = vadd.f32 %v4680_v19, %v901_v6  ;;  %v5074_v52 = vpop.f32.mrb[31].mxu1  ;;  %v906_v8 = vadd.f32 %v899_v4, %v782_v27 }
 0xc29   :  { %v908_v9 = vsel %vm184_vm3, %v906_v8, 0.0  ;;  %v907_v10 = vadd.f32 %v902_v7, %v783_v47 }
 0xc2a   :  { %909 = vadd.xlane.f32.xlu0 %v908_v9 }
 0xc2b   :  { %v911_v45 = vsel %vm184_vm3, %v907_v10, 0.0 }
 0xc2c   :  { %912 = vadd.xlane.f32.xlu1 %v911_v45 }
 0xcb7   :  { %v910_v63 = vpop.xlane.xlu0 %909 }
 0xcb8   :  { %v914_v44 = vmul.f32 0.03125, %v910_v63 }
 0xcb9   :  { %v913_v11 = vpop.xlane.xlu1 %912 }
 0xcba   :  { %v916_v12 = vsub.f32 %v906_v8, %v914_v44  ;;  %v915_v13 = vmul.f32 0.03125, %v913_v11 }
 0xcbc   :  { %v917_v14 = vsub.f32 %v907_v10, %v915_v13  ;;  %v918_v15 = vmul.f32 %v916_v12, %v916_v12 }
 0xcbe   :  { %v920_v16 = vsel %vm184_vm3, %v918_v15, 0.0  ;;  %v919_v30 = vmul.f32 %v917_v14, %v917_v14 }
 0xcbf   :  { %921 = vadd.xlane.f32.xlu0 %v920_v16 }
 0xcc0   :  { %v923_v17 = vsel %vm184_vm3, %v919_v30, 0.0 }
 0xcc1   :  { %924 = vadd.xlane.f32.xlu1 %v923_v17 }
 0xd4c   :  { %v922_v29 = vpop.xlane.xlu0 %921 }
 0xd4d   :  { %v926_v31 = vmul.f32 0.03125, %v922_v29 }
 0xd4e   :  { %v925_v34 = vpop.xlane.xlu1 %924 }
 0xd4f   :  { %v928_v37 = vadd.f32 1e-05, %v926_v31  ;;  %v927_v38 = vmul.f32 0.03125, %v925_v34 }
 0xd51   :  { %5577 = vrsqrt.f32 %v928_v37  ;;  %v929_v39 = vadd.f32 1e-05, %v927_v38 }
 0xd53   :  { %5579 = vrsqrt.f32 %v929_v39 }
 0xd5b   :  { %v5578_v42 = vpop.eup %5577 }
 0xd5c   :  { %v932_v43 = vmul.f32 %v5578_v42, %v916_v12 }
 0xd5d   :  { %v5580_v46 = vpop.eup %5579 }
 0xd5e   :  { %v938_v27 = vmul.f32 %v937_v41, %v932_v43  ;;  %v933_v47 = vmul.f32 %v5580_v46, %v917_v14 }
 0xd60   :  { %v939_v49 = vmul.f32 %v937_v41, %v933_v47  ;;  %v5957_v50 = vadd.f32 %v943_v48, %v938_v27 }
 0xd62   :  { %v5959_v51 = vadd.f32 %v943_v48, %v939_v49 }
 0xd64   :  { %v950_v53 = vpack.c.bf16 %v5959_v51, %v5957_v50 }
 0xd66   :  { %5080 = vmatmul.mubr.msk.bf16.vlgmr.msra.gmra.mrb[20].mxu0 %vm184_vm3, %v950_v53 }
 0xd67   :  { %5085 = vmatprep.mubr.msk.bf16.mxu0 %vm5748_vm2, %v5747_v35 }
 0xe39   :  { %v995_v55 = vpop.f32.mrb[20].mxu0 }
 0xe3a   :  { %v996_v56 = vadd.f32 %v4682_v54, %v995_v55  ;;  %v5081_v57 = vpop.f32.mrb[21].mxu0 }
 0xe3b   :  { %v998_v58 = vpop.f32.mrb[22].mxu0 }
 0xe3c   :  { %v5966_v59 = vpack.c.bf16 %v996_v56, %v996_v56  ;;  %v999_v60 = vadd.f32 %v4682_v54, %v998_v58  ;;  %v5082_v61 = vpop.f32.mrb[23].mxu0 }
 0xe3e   :  { %1115 = vrot.lane.b32.xlu1 %v5966_v59, %s5750_s2  ;;  %1004 = vrot.lane.b32.xlu0 %v5966_v59, %s5749_s0  ;;  %v5972_v62 = vpack.c.bf16 %v999_v60, %v999_v60 }
 0xe42   :  { %1113 = vrot.lane.b32.xlu1 %v5966_v59, %s5751_s30  ;;  %1231 = vrot.lane.b32.xlu0 %v5972_v62, %s5749_s0 }
 0xe46   :  { %1342 = vrot.lane.b32.xlu1 %v5972_v62, %s5750_s2  ;;  %1340 = vrot.lane.b32.xlu0 %v5972_v62, %s5751_s30 }
 0xeb0   :  { %v1005_v0 = vpop.permute.xlu0 %1004  ;;  %v1116_v2 = vpop.permute.xlu1 %1115 }
 0xeb1   :  { %v1010_v1 = vsel %vm233_vm4, %v1005_v0, 0  ;;  %v1121_v19 = vsel %vm233_vm4, %v1116_v2, 0 }
 0xeb2   :  { %5084 = vmatpush3.bf16.xpose.msra.mxu0 %v1010_v1 }
 0xeb3   :  { %5095 = vmatprep.subr.bf16.mxu0 %v5747_v35 }
 0xeb4   :  { %v1232_v3 = vpop.permute.xlu0 %1231  ;;  %v1114_v4 = vpop.permute.xlu1 %1113 }
 0xeb5   :  { %v1237_v5 = vsel %vm233_vm4, %v1232_v3, 0 }
 0xeb8   :  { %v1343_v6 = vpop.permute.xlu1 %1342  ;;  %v1341_v52 = vpop.permute.xlu0 %1340 }
 0xeb9   :  { %5086 = vmatmul.mubr.msk.bf16.vlgmr.msra.gmra.mrb[24].mxu0 %vm233_vm4, %v5966_v59  ;;  %v1348_v7 = vsel %vm233_vm4, %v1343_v6, 0 }
 0xeba   :  { %5096 = vmatpush3.bf16.xpose.msra.mxu0 %v1121_v19  ;;  %5097 = vmatprep.mubr.msk.bf16.mxu0 %vm5748_vm2, %v5747_v35 }
 0xebb   :  { %5107 = vmatprep.subr.bf16.mxu0 %v5747_v35 }
 0xec1   :  { %5098 = vmatmul.mubr.msk.bf16.vlgmr.msra.gmra.mrb[28].mxu0 %vm233_vm4, %v1114_v4 }
 0xec2   :  { %5108 = vmatpush3.bf16.xpose.msra.mxu0 %v1237_v5  ;;  %5109 = vmatprep.mubr.msk.bf16.mxu0 %vm5748_vm2, %v5747_v35 }
 0xec3   :  { %5119 = vmatprep.subr.bf16.mxu0 %v5747_v35 }
 0xec9   :  { %5110 = vmatmul.mubr.msk.bf16.vlgmr.msra.gmra.mrb[32].mxu0 %vm233_vm4, %v5972_v62 }
 0xeca   :  { %5120 = vmatpush3.bf16.xpose.msra.mxu0 %v1348_v7  ;;  %5121 = vmatprep.mubr.msk.bf16.mxu0 %vm5748_vm2, %v5747_v35 }
 0xecb   :  { %5131 = vmatprep.subr.bf16.mxu0 %v5747_v35 }
 0xed1   :  { %5122 = vmatmul.mubr.msk.bf16.vlgmr.msra.gmra.mrb[36].mxu0 %vm233_vm4, %v1341_v52 }
 0xed2   :  { %5135 = vmatprep.mubr.msk.bf16.mxu0 %vm5748_vm2, %v5747_v35 }
 0xf8c   :  { %v1046_v8 = vpop.f32.mrb[24].mxu0 }
 0xf8d   :  { %v1052_v9 = vmul.f32 0.25, %v1046_v8  ;;  %v5087_v10 = vpop.f32.mrb[25].mxu0 }
 0xf8e   :  { %v1049_v45 = vpop.f32.mrb[26].mxu0 }
 0xf8f   :  { %v5088_v63 = vpop.f32.mrb[27].mxu0  ;;  %v1053_v44 = vsel %vm281_vm5, %v1052_v9, -inf }
 0xf90   :  { %1054 = vmax.xlane.f32.xlu1 %v1053_v44 }
 0xf94   :  { %v1157_v11 = vpop.f32.mrb[28].mxu0 }
 0xf95   :  { %v1163_v12 = vmul.f32 0.25, %v1157_v11  ;;  %v5099_v13 = vpop.f32.mrb[29].mxu0 }
 0xf96   :  { %v1160_v14 = vpop.f32.mrb[30].mxu0 }
 0xf97   :  { %v5100_v15 = vpop.f32.mrb[31].mxu0  ;;  %v1164_v16 = vsel %vm281_vm5, %v1163_v12, -inf }
 0xf98   :  { %1165 = vmax.xlane.f32.xlu0 %v1164_v16 }
 0xf9c   :  { %v1273_v30 = vpop.f32.mrb[32].mxu0 }
 0xf9d   :  { %v1279_v17 = vmul.f32 0.25, %v1273_v30  ;;  %v5111_v18 = vpop.f32.mrb[33].mxu0 }
 0xf9e   :  { %v1276_v20 = vpop.f32.mrb[34].mxu0  ;;  %v1457_v18 = vld [vmem:[#allocation2 + $0x188] sm:$0xff] }
 0xf9f   :  { %v5112_v21 = vpop.f32.mrb[35].mxu0  ;;  %v1280_v22 = vsel %vm281_vm5, %v1279_v17, -inf }
 0xfa0   :  { %1281 = vmax.xlane.f32.xlu0 %v1280_v22 }
 0xfa4   :  { %v1384_v23 = vpop.f32.mrb[36].mxu0 }
 0xfa5   :  { %v1390_v24 = vmul.f32 0.25, %v1384_v23  ;;  %v5123_v29 = vpop.f32.mrb[37].mxu0 }
 0xfa6   :  { %v1387_v31 = vpop.f32.mrb[38].mxu0 }
 0xfa7   :  { %v5124_v34 = vpop.f32.mrb[39].mxu0  ;;  %v1391_v37 = vsel %vm281_vm5, %v1390_v24, -inf }
 0xfa8   :  { %1392 = vmax.xlane.f32.xlu1 %v1391_v37 }
0x101d   :  { %v1055_v38 = vpop.xlane.xlu1 %1054 }
0x101e   :  { %v1056_v39 = vsub.f32 %v1052_v9, %v1055_v38  ;;  %v1458_v38 = vld [vmem:[#allocation2 + $0x190] sm:$0xff] }
0x1020   :  { %v1057_v40 = vmul.f32 1.442695, %v1056_v39  ;;  %v1459_v39 = vld [vmem:[#allocation2 + $0x198] sm:$0xff] }
0x1022   :  { %5581 = vpow2.f32 %v1057_v40  ;;  %v1462_v40 = vpack.c.bf16 %v1459_v39, %v1458_v38  ;;  %v1512_v38 = vld [vmem:[#allocation2 + $0x1a8] sm:$0x3] }
0x1025   :  { %v1166_v41 = vpop.xlane.xlu0 %1165 }
0x1026   :  { %v1167_v42 = vsub.f32 %v1163_v12, %v1166_v41 }
0x1028   :  { %v1168_v43 = vmul.f32 1.442695, %v1167_v42 }
0x102a   :  { %5583 = vpow2.f32 %v1168_v43 }
0x102c   :  { %v5582_v46 = vpop.eup %5581 }
0x102d   :  { %v1282_v27 = vpop.xlane.xlu0 %1281  ;;  %v1059_v47 = vsel %vm281_vm5, %v5582_v46, 0.0 }
0x102e   :  { %v1283_v48 = vsub.f32 %v1279_v17, %v1282_v27  ;;  %1060 = vadd.xlane.f32.xlu0 %v1059_v47  ;;  %v1456_v17 = vld [vmem:[#allocation2 + $0x180] sm:$0xff] }
0x102f   :  { %v1461_v20 = vpack.c.bf16 %v1457_v18, %v1456_v17  ;;  %v1612_v17 = vld [vmem:[#allocation2 + $0x1e0] sm:$0xff]  ;;  %v1613_v18 = vld [vmem:[#allocation2 + $0x1e8] sm:$0xff] }
0x1030   :  { %v1284_v49 = vmul.f32 1.442695, %v1283_v48 }
0x1031   :  { %5132 = vmatpush3.bf16.msra.mxu0 %v1461_v20 }
0x1032   :  { %5585 = vpow2.f32 %v1284_v49  ;;  %5133 = vmatprep.subr.bf16.mxu0 %v5747_v35 }
0x1034   :  { %v5584_v53 = vpop.eup %5583 }
0x1035   :  { %v1170_v54 = vsel %vm281_vm5, %v5584_v53, 0.0  ;;  %v1393_v57 = vpop.xlane.xlu1 %1392  ;;  %5134 = vmatpush3.bf16.msra.mxu0 %v1462_v40  ;;  %v1544_v40 = vrot.slane %v1512_v38, %v5934_v33 }
0x1036   :  { %1171 = vadd.xlane.f32.xlu1 %v1170_v54  ;;  %v1394_v58 = vsub.f32 %v1390_v24, %v1393_v57  ;;  %5147 = vmatprep.subr.bf16.mxu0 %v5747_v35 }
0x1038   :  { %v1395_v60 = vmul.f32 1.442695, %v1394_v58 }
0x103a   :  { %5587 = vpow2.f32 %v1395_v60 }
0x103c   :  { %v5586_v55 = vpop.eup %5585 }
0x103d   :  { %v1286_v56 = vsel %vm281_vm5, %v5586_v55, 0.0 }
0x103e   :  { %1287 = vadd.xlane.f32.xlu0 %v1286_v56 }
0x1044   :  { %v5588_v61 = vpop.eup %5587 }
0x1045   :  { %v1397_v0 = vsel %vm281_vm5, %v5588_v61, 0.0 }
0x1047   :  { %1176 = vrot.lane.b32.xlu1 %v5966_v59, %s5753_s7 }
0x1054   :  { %1065 = vrot.lane.b32.xlu0 %v5966_v59, %s5752_s4 }
0x1058   :  { %1403 = vrot.lane.b32.xlu0 %v5972_v62, %s5753_s7 }
0x106b   :  { %1398 = vadd.xlane.f32.xlu1 %v1397_v0 }
0x107c   :  { %1292 = vrot.lane.b32.xlu1 %v5972_v62, %s5752_s4 }
0x10bb   :  { %v1061_v1 = vpop.xlane.xlu0 %1060 }
0x10bc   :  { %5589 = vrcp.f32 %v1061_v1 }
0x10c3   :  { %v1172_v2 = vpop.xlane.xlu1 %1171 }
0x10c4   :  { %5591 = vrcp.f32 %v1172_v2 }
0x10c6   :  { %v5590_v19 = vpop.eup %5589 }
0x10c7   :  { %v1063_v59 = vmul.f32 %v5590_v19, %v5582_v46  ;;  %v1177_v6 = vpop.permute.xlu1 %1176 }
0x10c8   :  { %v1182_v8 = vsel %vm299_vm6, %v1177_v6, 0 }
0x10c9   :  { %v1064_v7 = vpack.c.bf16 %v1063_v59, %v1063_v59 }
0x10cb   :  { %v1288_v3 = vpop.xlane.xlu0 %1287 }
0x10cc   :  { %5593 = vrcp.f32 %v1288_v3 }
0x10ce   :  { %v5592_v52 = vpop.eup %5591 }
0x10cf   :  { %v1066_v4 = vpop.permute.xlu0 %1065  ;;  %v1174_v62 = vmul.f32 %v5592_v52, %v5584_v53 }
0x10d0   :  { %v1071_v5 = vsel %vm299_vm6, %v1066_v4, 0 }
0x10d1   :  { %5090 = vmatpush3.bf16.msra.mxu1 %v1071_v5  ;;  %v1175_v9 = vpack.c.bf16 %v1174_v62, %v1174_v62 }
0x10d2   :  { %5101 = vmatprep.subr.bf16.mxu1 %v5747_v35 }
0x10d3   :  { %v1404_v12 = vpop.permute.xlu0 %1403 }
0x10d4   :  { %5092 = vmatmul.mubr.msk.bf16.vlgmr.msra.gmra.mrb[32].mxu1 %vm281_vm5, %v1064_v7  ;;  %v1409_v14 = vsel %vm299_vm6, %v1404_v12, 0  ;;  %v1553_v12 = vld [vmem:[#allocation2 + $0x1b0] sm:$0xff] }
0x10d5   :  { %5102 = vmatpush3.bf16.msra.mxu1 %v1182_v8  ;;  %5103 = vmatprep.mubr.msk.bf16.mxu1 %vm5748_vm2, %v5747_v35 }
0x10d6   :  { %5113 = vmatprep.subr.bf16.mxu1 %v5747_v35  ;;  %v5594_v10 = vpop.eup %5593 }
0x10d7   :  { %v1290_v63 = vmul.f32 %v5594_v10, %v5586_v55 }
0x10d9   :  { %v1291_v13 = vpack.c.bf16 %v1290_v63, %v1290_v63 }
0x10dc   :  { %5104 = vmatmul.mubr.msk.bf16.vlgmr.msra.gmra.mrb[36].mxu1 %vm281_vm5, %v1175_v9 }
0x10dd   :  { %5115 = vmatprep.mubr.msk.bf16.mxu1 %vm5748_vm2, %v5747_v35 }
0x10f8   :  { %v1399_v45 = vpop.xlane.xlu1 %1398 }
0x10f9   :  { %5595 = vrcp.f32 %v1399_v45 }
0x10fc   :  { %v1293_v44 = vpop.permute.xlu1 %1292 }
0x10fd   :  { %v1298_v11 = vsel %vm299_vm6, %v1293_v44, 0 }
0x10fe   :  { %5114 = vmatpush3.bf16.msra.mxu1 %v1298_v11 }
0x10ff   :  { %5125 = vmatprep.subr.bf16.mxu1 %v5747_v35 }
0x1101   :  { %5116 = vmatmul.mubr.msk.bf16.vlgmr.msra.gmra.mrb[40].mxu1 %vm281_vm5, %v1291_v13 }
0x1102   :  { %5126 = vmatpush3.bf16.msra.mxu1 %v1409_v14  ;;  %5127 = vmatprep.mubr.msk.bf16.mxu1 %vm5748_vm2, %v5747_v35  ;;  %v1555_v14 = vld [vmem:[#allocation2 + $0x1c0] sm:$0xff] }
0x1103   :  { %v5596_v15 = vpop.eup %5595  ;;  %5139 = vmatprep.subr.bf16.mxu1 %v5747_v35 }
0x1104   :  { %v1401_v16 = vmul.f32 %v5596_v15, %v5588_v61  ;;  %v4692_v61 = vld [vmem:[#allocation2 + $0x1a0] ss:$0 sm:$0xff]  ;;  %v1556_v15 = vld [vmem:[#allocation2 + $0x1c8] sm:$0xff] }
0x1106   :  { %v1402_v30 = vpack.c.bf16 %v1401_v16, %v1401_v16  ;;  %v1559_v16 = vpack.c.bf16 %v1556_v15, %v1555_v14 }
0x1109   :  { %5128 = vmatmul.mubr.msk.bf16.vlgmr.msra.gmra.mrb[44].mxu1 %vm281_vm5, %v1402_v30  ;;  %v1611_v30 = vld [vmem:[#allocation2 + $0x1d8] sm:$0xff] }
0x110a   :  { %5143 = vmatprep.mubr.msk.bf16.mxu1 %vm5748_vm2, %v5747_v35  ;;  %v1620_v20 = vpack.c.bf16 %v1612_v17, %v1611_v30 }
0x11a7   :  { %v1107_v21 = vpop.f32.mrb[32].mxu1 }
0x11a8   :  { %v5093_v22 = vpop.f32.mrb[33].mxu1 }
0x11a9   :  { %v1110_v23 = vpop.f32.mrb[34].mxu1 }
0x11aa   :  { %v5094_v24 = vpop.f32.mrb[35].mxu1 }
0x11af   :  { %v1218_v29 = vpop.f32.mrb[36].mxu1 }
0x11b0   :  { %v5105_v31 = vpop.f32.mrb[37].mxu1 }
0x11b1   :  { %v1221_v34 = vpop.f32.mrb[38].mxu1 }
0x11b2   :  { %v5106_v37 = vpop.f32.mrb[39].mxu1 }
0x11d4   :  { %v1334_v41 = vpop.f32.mrb[40].mxu1 }
0x11d5   :  { %v5117_v42 = vpop.f32.mrb[41].mxu1 }
0x11d6   :  { %v1337_v43 = vpop.f32.mrb[42].mxu1 }
0x11d7   :  { %v5118_v46 = vpop.f32.mrb[43].mxu1 }
0x11dc   :  { %v1445_v27 = vpop.f32.mrb[44].mxu1 }
0x11dd   :  { %v5532_v47 = vpack.i.bf16 %v1445_v27, %v1218_v29  ;;  %v5129_v48 = vpop.f32.mrb[45].mxu1  ;;  %v1550_v27 = vrot.slane %v1512_v38, %v5937_v36 }
0x11de   :  { %v1448_v49 = vpop.f32.mrb[46].mxu1  ;;  %v1717_v48 = vld [vmem:[#allocation2 + $0x228] sm:$0xff] }
0x11df   :  { %5533 = vrot.lane.b32.xlu1 %v5532_v47, %s5754_s1  ;;  %v5130_v53 = vpop.f32.mrb[47].mxu1  ;;  %v1718_v49 = vld [vmem:[#allocation2 + $0x230] sm:$0xff] }
0x1251   :  { %v5534_v54 = vpop.permute.xlu1 %5533 }
0x1252   :  { %v5536_v55 = vunpack.i.h.bf16 %v5534_v54  ;;  %v5535_v56 = vunpack.i.l.bf16 %v5534_v54 }
0x1254   :  { %v1455_v57 = vsel %vm233_vm4, %v1334_v41, %v5536_v55  ;;  %v1228_v58 = vsel %vm233_vm4, %v1107_v21, %v5535_v56  ;;  %v1614_v21 = vld [vmem:[#allocation2 + $0x1f0] sm:$0xff]  ;;  %v1722_v55 = vpack.c.bf16 %v1718_v49, %v1717_v48  ;;  %v169_v56 = vmul.f32 5.656854, %v5908_v25 }
0x1255   :  { %v1460_v60 = vpack.c.bf16 %v1455_v57, %v1228_v58  ;;  %v1621_v22 = vpack.c.bf16 %v1614_v21, %v1613_v18  ;;  %v168_v57 = vmul.f32 5.656854, %v5910_v26  ;;  %v1615_v26 = vld [vmem:[#allocation2 + $0x1f8] sm:$0xff] }
0x1257   :  { %5136 = vmatmul.mubr.msk.bf16.vlgmr.msra.gmra.mrb[40].mxu0 %vm184_vm3, %v1460_v60  ;;  %v1719_v60 = vld [vmem:[#allocation2 + $0x238] sm:$0xff] }
0x1258   :  { %5155 = vmatprep.mubr.msk.bf16.mxu0 %vm5748_vm2, %v5747_v35  ;;  %5148 = vmatpush3.bf16.msra.mxu0 %v1620_v20 }
0x1259   :  { %5149 = vmatprep.subr.bf16.mxu0 %v5747_v35 }
0x125c   :  { %5150 = vmatpush3.bf16.msra.mxu0 %v1621_v22 }
0x125d   :  { %5151 = vmatprep.subr.bf16.mxu0 %v5747_v35 }
0x132a   :  { %v1505_v0 = vpop.f32.mrb[40].mxu0 }
0x132b   :  { %v1506_v1 = vadd.f32 %v4692_v61, %v1505_v0  ;;  %v5137_v2 = vpop.f32.mrb[41].mxu0 }
0x132c   :  { %v1508_v19 = vpop.f32.mrb[42].mxu0 }
0x132d   :  { %v1509_v3 = vadd.f32 %v4692_v61, %v1508_v19  ;;  %v5138_v59 = vpop.f32.mrb[43].mxu0  ;;  %v1513_v4 = vadd.f32 %v1506_v1, %v5957_v50  ;;  %v1720_v61 = vld [vmem:[#allocation2 + $0x240] sm:$0xff] }
0x132e   :  { %v1723_v0 = vpack.c.bf16 %v1720_v61, %v1719_v60  ;;  %v5693_v1 = vld [vmem:[#allocation2 + $0x80] sm:$0xff] }
0x132f   :  { %v1515_v5 = vsel %vm184_vm3, %v1513_v4, 0.0  ;;  %v1514_v6 = vadd.f32 %v1509_v3, %v5959_v51  ;;  %v1554_v51 = vld [vmem:[#allocation2 + $0x1b8] sm:$0xff]  ;;  %v6071_v2 = vadd.f32 %v5693_v1, %v169_v56  ;;  %v6073_v19 = vadd.f32 %v5693_v1, %v168_v57  ;;  %v1616_v3 = vld [vmem:[#allocation2 + $0x200] sm:$0xff] }
0x1330   :  { %1516 = vadd.xlane.f32.xlu0 %v1515_v5  ;;  %v1558_v13 = vpack.c.bf16 %v1554_v51, %v1553_v12  ;;  %v1622_v59 = vpack.c.bf16 %v1616_v3, %v1615_v26  ;;  %v1618_v5 = vld [vmem:[#allocation2 + $0x210] sm:$0xff] }
0x1331   :  { %v1518_v7 = vsel %vm184_vm3, %v1514_v6, 0.0  ;;  %v1721_v25 = vpack.c.bf16 %v6071_v2, %v6073_v19 }
0x1332   :  { %1519 = vadd.xlane.f32.xlu1 %v1518_v7  ;;  %5140 = vmatpush3.bf16.msra.mxu1 %v1558_v13  ;;  %v4694_v7 = vld [vmem:[#allocation2 + $0x1d0] ss:$0 sm:$0xff] }
0x1333   :  { %5141 = vmatprep.subr.bf16.mxu1 %v5747_v35  ;;  %5152 = vmatpush3.bf16.msra.mxu0 %v1622_v59 }
0x1334   :  { %5153 = vmatprep.subr.bf16.mxu0 %v5747_v35 }
0x1336   :  { %5142 = vmatpush3.bf16.msra.mxu1 %v1559_v16 }
0x1337   :  { %5159 = vmatprep.subr.bf16.mxu1 %v5747_v35 }
0x13bd   :  { %v1517_v52 = vpop.xlane.xlu0 %1516 }
0x13be   :  { %v1521_v8 = vmul.f32 0.03125, %v1517_v52 }
0x13bf   :  { %v1520_v62 = vpop.xlane.xlu1 %1519 }
0x13c0   :  { %v1523_v9 = vsub.f32 %v1513_v4, %v1521_v8  ;;  %v1522_v10 = vmul.f32 0.03125, %v1520_v62  ;;  %v1617_v4 = vld [vmem:[#allocation2 + $0x208] sm:$0xff] }
0x13c2   :  { %v1524_v45 = vsub.f32 %v1514_v6, %v1522_v10  ;;  %v1525_v63 = vmul.f32 %v1523_v9, %v1523_v9  ;;  %v1623_v6 = vpack.c.bf16 %v1618_v5, %v1617_v4 }
0x13c4   :  { %v1527_v44 = vsel %vm184_vm3, %v1525_v63, 0.0  ;;  %v1526_v11 = vmul.f32 %v1524_v45, %v1524_v45  ;;  %5154 = vmatpush3.bf16.msra.mxu0 %v1623_v6 }
0x13c5   :  { %1528 = vadd.xlane.f32.xlu0 %v1527_v44  ;;  %5173 = vmatprep.subr.bf16.mxu0 %v5747_v35 }
0x13c6   :  { %v1530_v50 = vsel %vm184_vm3, %v1526_v11, 0.0  ;;  %v4698_v11 = vld [vmem:[#allocation2 + $0x248] ss:$0 sm:$0xff] }
0x13c9   :  { %1531 = vadd.xlane.f32.xlu0 %v1530_v50 }
0x1452   :  { %v1529_v23 = vpop.xlane.xlu0 %1528 }
0x1453   :  { %v1533_v24 = vmul.f32 0.03125, %v1529_v23 }
0x1455   :  { %v1535_v29 = vadd.f32 1e-05, %v1533_v24 }
0x1456   :  { %v1532_v31 = vpop.xlane.xlu0 %1531 }
0x1457   :  { %5597 = vrsqrt.f32 %v1535_v29  ;;  %v1534_v34 = vmul.f32 0.03125, %v1532_v31 }
0x1459   :  { %v1536_v37 = vadd.f32 1e-05, %v1534_v34 }
0x145b   :  { %5599 = vrsqrt.f32 %v1536_v37 }
0x1461   :  { %v5598_v39 = vpop.eup %5597 }
0x1462   :  { %v1539_v41 = vmul.f32 %v5598_v39, %v1523_v9 }
0x1464   :  { %v1545_v43 = vmul.f32 %v1544_v40, %v1539_v41 }
0x1465   :  { %v5600_v42 = vpop.eup %5599 }
0x1466   :  { %v1540_v46 = vmul.f32 %v5600_v42, %v1524_v45  ;;  %v6060_v53 = vadd.f32 %v1550_v27, %v1545_v43 }
0x1468   :  { %v1546_v47 = vmul.f32 %v1544_v40, %v1540_v46  ;;  %v6127_v40 = vld [vmem:[#allocation2 + $0x218] ss:$0 sm:$0xff] }
0x146a   :  { %v6062_v54 = vadd.f32 %v1550_v27, %v1546_v47 }
0x146c   :  { %v1557_v58 = vpack.c.bf16 %v6062_v54, %v6060_v53 }
0x146e   :  { %5144 = vmatmul.mubr.msk.bf16.vlgmr.msra.gmra.mrb[48].mxu1 %vm184_vm3, %v1557_v58 }
0x146f   :  { %5160 = vmatpush3.bf16.msra.mxu1 %v1722_v55  ;;  %5163 = vmatprep.mubr.msk.bf16.mxu1 %vm5748_vm2, %v5747_v35 }
0x1470   :  { %5161 = vmatprep.subr.bf16.mxu1 %v5747_v35 }
0x1473   :  { %5162 = vmatpush3.bf16.msra.mxu1 %v1723_v0 }
0x1474   :  { %5167 = vmatprep.subr.bf16.mxu1 %v5747_v35 }
0x1476   :  { %5164 = vmatmul.mubr.msk.bf16.vlgmr.msra.gmra.mrb[52].mxu1 %vm184_vm3, %v1721_v25 }
0x1477   :  { %5169 = vmatprep.mubr.msk.bf16.mxu1 %vm5748_vm2, %v5747_v35 }
0x1541   :  { %v1602_v52 = vpop.f32.mrb[48].mxu1 }
0x1542   :  { %v1603_v8 = vadd.f32 %v4694_v7, %v1602_v52  ;;  %v5145_v62 = vpop.f32.mrb[49].mxu1 }
0x1543   :  { %v1605_v9 = vpop.f32.mrb[50].mxu1 }
0x1544   :  { %v1606_v10 = vadd.f32 %v4694_v7, %v1605_v9  ;;  %v5146_v45 = vpop.f32.mrb[51].mxu1  ;;  %v1609_v63 = vmax.f32 %v1603_v8, 0.0 }
0x1546   :  { %v1610_v44 = vmax.f32 %v1606_v10, 0.0 }
0x1548   :  { %v1619_v50 = vpack.c.bf16 %v1610_v44, %v1609_v63 }
0x1549   :  { %v1766_v12 = vpop.f32.mrb[52].mxu1 }
0x154a   :  { %v1767_v51 = vadd.f32 %v4698_v11, %v1766_v12  ;;  %5156 = vmatmul.mubr.msk.bf16.vlgmr.msra.gmra.mrb[44].mxu0 %vm860_vm9, %v1619_v50  ;;  %v5165_v13 = vpop.f32.mrb[53].mxu1 }
0x154b   :  { %v1769_v14 = vpop.f32.mrb[54].mxu1  ;;  %5175 = vmatprep.mubr.msk.bf16.mxu0 %vm5748_vm2, %v5747_v35 }
0x154c   :  { %v6087_v15 = vpack.c.bf16 %v1767_v51, %v1767_v51  ;;  %v1770_v16 = vadd.f32 %v4698_v11, %v1769_v14  ;;  %v5166_v30 = vpop.f32.mrb[55].mxu1 }
0x154e   :  { %1887 = vrot.lane.b32.xlu0 %v6087_v15, %s5750_s2  ;;  %1775 = vrot.lane.b32.xlu1 %v6087_v15, %s5749_s0  ;;  %v6093_v17 = vpack.c.bf16 %v1770_v16, %v1770_v16 }
0x1552   :  { %1885 = vrot.lane.b32.xlu1 %v6087_v15, %s5751_s30  ;;  %2116 = vrot.lane.b32.xlu0 %v6093_v17, %s5750_s2 }
0x1556   :  { %2004 = vrot.lane.b32.xlu1 %v6093_v17, %s5749_s0 }
0x155a   :  { %2114 = vrot.lane.b32.xlu1 %v6093_v17, %s5751_s30 }
0x15c0   :  { %v1776_v18 = vpop.permute.xlu1 %1775  ;;  %v1888_v21 = vpop.permute.xlu0 %1887 }
0x15c1   :  { %v1781_v20 = vsel %vm233_vm4, %v1776_v18, 0  ;;  %v1893_v23 = vsel %vm233_vm4, %v1888_v21, 0 }
0x15c2   :  { %5168 = vmatpush3.bf16.xpose.msra.mxu1 %v1781_v20 }
0x15c3   :  { %5179 = vmatprep.subr.bf16.mxu1 %v5747_v35 }
0x15c4   :  { %v1886_v22 = vpop.permute.xlu1 %1885  ;;  %v2117_v31 = vpop.permute.xlu0 %2116 }
0x15c5   :  { %v2122_v34 = vsel %vm233_vm4, %v2117_v31, 0 }
0x15c8   :  { %v2005_v24 = vpop.permute.xlu1 %2004 }
0x15c9   :  { %5170 = vmatmul.mubr.msk.bf16.vlgmr.msra.gmra.mrb[56].mxu1 %vm233_vm4, %v6087_v15  ;;  %v2010_v29 = vsel %vm233_vm4, %v2005_v24, 0 }
0x15ca   :  { %5180 = vmatpush3.bf16.xpose.msra.mxu1 %v1893_v23  ;;  %5181 = vmatprep.mubr.msk.bf16.mxu1 %vm5748_vm2, %v5747_v35 }
0x15cb   :  { %5191 = vmatprep.subr.bf16.mxu1 %v5747_v35 }
0x15cc   :  { %v2115_v37 = vpop.permute.xlu1 %2114 }
0x15d1   :  { %5182 = vmatmul.mubr.msk.bf16.vlgmr.msra.gmra.mrb[60].mxu1 %vm233_vm4, %v1886_v22 }
0x15d2   :  { %5192 = vmatpush3.bf16.xpose.msra.mxu1 %v2010_v29  ;;  %5193 = vmatprep.mubr.msk.bf16.mxu1 %vm5748_vm2, %v5747_v35 }
0x15d3   :  { %5203 = vmatprep.subr.bf16.mxu1 %v5747_v35 }
0x15d9   :  { %5194 = vmatmul.mubr.msk.bf16.vlgmr.msra.gmra.mrb[64].mxu1 %vm233_vm4, %v6093_v17 }
0x15da   :  { %5204 = vmatpush3.bf16.xpose.msra.mxu1 %v2122_v34  ;;  %5205 = vmatprep.mubr.msk.bf16.mxu1 %vm5748_vm2, %v5747_v35 }
0x15db   :  { %5215 = vmatprep.subr.bf16.mxu1 %v5747_v35 }
0x15e1   :  { %5206 = vmatmul.mubr.msk.bf16.vlgmr.msra.gmra.mrb[68].mxu1 %vm233_vm4, %v2115_v37 }
0x15e2   :  { %5219 = vmatprep.mubr.msk.bf16.mxu1 %vm5748_vm2, %v5747_v35 }
0x161d   :  { %v6125_v38 = vpop.f32.mrb[44].mxu0 }
0x161e   :  { %v5157_v39 = vpop.f32.mrb[45].mxu0 }
0x161f   :  { %v1669_v41 = vpop.f32.mrb[46].mxu0  ;;  %v1667_v39 = vadd.f32 %v6127_v40, %v6125_v38 }
0x1620   :  { %v6130_v42 = vadd.f32 %v6127_v40, %v1669_v41  ;;  %v5158_v43 = vpop.f32.mrb[47].mxu0 }
0x1621   :  { %v6165_v41 = vadd.f32 %v1667_v39, %v6060_v53 }
0x1623   :  { %v1676_v43 = vsel %vm184_vm3, %v6165_v41, 0.0 }
0x169c   :  { %v1817_v46 = vpop.f32.mrb[56].mxu1 }
0x169d   :  { %v1823_v47 = vmul.f32 0.25, %v1817_v46  ;;  %v5171_v48 = vpop.f32.mrb[57].mxu1 }
0x169e   :  { %v1820_v49 = vpop.f32.mrb[58].mxu1 }
0x169f   :  { %v5172_v55 = vpop.f32.mrb[59].mxu1  ;;  %v1824_v56 = vsel %vm6134_vm10, %v1823_v47, -1e+30 }
0x16a0   :  { %v1825_v57 = vsel %vm281_vm5, %v1824_v56, -inf }
0x16a1   :  { %1826 = vmax.xlane.f32.xlu0 %v1825_v57 }
0x16a4   :  { %v1929_v58 = vpop.f32.mrb[60].mxu1 }
0x16a5   :  { %v1935_v60 = vmul.f32 0.25, %v1929_v58  ;;  %v5183_v61 = vpop.f32.mrb[61].mxu1 }
0x16a6   :  { %v1932_v0 = vpop.f32.mrb[62].mxu1 }
0x16a7   :  { %v5184_v1 = vpop.f32.mrb[63].mxu1  ;;  %v1936_v28 = vsel %vm6134_vm10, %v1935_v60, -1e+30 }
0x16a8   :  { %v1937_v32 = vsel %vm281_vm5, %v1936_v28, -inf }
0x16a9   :  { %1938 = vmax.xlane.f32.xlu1 %v1937_v32 }
0x16ac   :  { %v2046_v25 = vpop.f32.mrb[64].mxu1 }
0x16ad   :  { %v2052_v26 = vmul.f32 0.25, %v2046_v25  ;;  %v5195_v3 = vpop.f32.mrb[65].mxu1 }
0x16ae   :  { %v2049_v59 = vpop.f32.mrb[66].mxu1 }
0x16af   :  { %v5196_v4 = vpop.f32.mrb[67].mxu1  ;;  %v2053_v5 = vsel %vm6134_vm10, %v2052_v26, -1e+30 }
0x16b0   :  { %v2054_v6 = vsel %vm281_vm5, %v2053_v5, -inf }
0x16b1   :  { %2055 = vmax.xlane.f32.xlu0 %v2054_v6  ;;  %v2232_v6 = vld [vmem:[#allocation2 + $0x258] sm:$0xff] }
0x16b4   :  { %v2158_v7 = vpop.f32.mrb[68].mxu1 }
0x16b5   :  { %v2164_v52 = vmul.f32 0.25, %v2158_v7  ;;  %v5207_v8 = vpop.f32.mrb[69].mxu1 }
0x16b6   :  { %v2161_v62 = vpop.f32.mrb[70].mxu1 }
0x16b7   :  { %v5208_v9 = vpop.f32.mrb[71].mxu1  ;;  %v2165_v10 = vsel %vm6134_vm10, %v2164_v52, -1e+30 }
0x16b8   :  { %v2166_v45 = vsel %vm281_vm5, %v2165_v10, -inf }
0x16b9   :  { %2167 = vmax.xlane.f32.xlu0 %v2166_v45 }
0x172e   :  { %v1827_v63 = vpop.xlane.xlu0 %1826 }
0x172f   :  { %v1828_v44 = vsub.f32 %v1824_v56, %v1827_v63 }
0x1731   :  { %v1829_v11 = vmul.f32 1.442695, %v1828_v44 }
0x1733   :  { %5601 = vpow2.f32 %v1829_v11  ;;  %v2233_v11 = vld [vmem:[#allocation2 + $0x260] sm:$0xff] }
0x1736   :  { %v1939_v50 = vpop.xlane.xlu1 %1938 }
0x1737   :  { %v1940_v12 = vsub.f32 %v1936_v28, %v1939_v50  ;;  %v2234_v50 = vld [vmem:[#allocation2 + $0x268] sm:$0xff] }
0x1739   :  { %v1941_v51 = vmul.f32 1.442695, %v1940_v12  ;;  %v2237_v12 = vpack.c.bf16 %v2234_v50, %v2233_v11 }
0x173b   :  { %5603 = vpow2.f32 %v1941_v51 }
0x173d   :  { %v5602_v13 = vpop.eup %5601 }
0x173e   :  { %v1831_v14 = vsel %vm281_vm5, %v5602_v13, 0.0  ;;  %v2056_v16 = vpop.xlane.xlu0 %2055 }
0x173f   :  { %1832 = vadd.xlane.f32.xlu1 %v1831_v14  ;;  %v2057_v29 = vsub.f32 %v2053_v5, %v2056_v16  ;;  %v2231_v5 = vld [vmem:[#allocation2 + $0x250] sm:$0xff] }
0x1740   :  { %v2236_v7 = vpack.c.bf16 %v2232_v6, %v2231_v5 }
0x1741   :  { %v2058_v31 = vmul.f32 1.442695, %v2057_v29 }
0x1742   :  { %5216 = vmatpush3.bf16.msra.mxu1 %v2236_v7 }
0x1743   :  { %5217 = vmatprep.subr.bf16.mxu1 %v5747_v35 }
0x1745   :  { %v5604_v30 = vpop.eup %5603 }
0x1746   :  { %v2168_v18 = vpop.xlane.xlu0 %2167  ;;  %v1943_v20 = vsel %vm281_vm5, %v5604_v30, 0.0  ;;  %5218 = vmatpush3.bf16.msra.mxu1 %v2237_v12 }
0x1747   :  { %v2169_v21 = vsub.f32 %v2165_v10, %v2168_v18  ;;  %1944 = vadd.xlane.f32.xlu0 %v1943_v20  ;;  %5231 = vmatprep.subr.bf16.mxu1 %v5747_v35 }
0x1749   :  { %v2170_v22 = vmul.f32 1.442695, %v2169_v21 }
0x174b   :  { %5605 = vpow2.f32 %v2170_v22 }
0x174c   :  { %5607 = vpow2.f32 %v2058_v31 }
0x1750   :  { %1837 = vrot.lane.b32.xlu1 %v6087_v15, %s5752_s4 }
0x1755   :  { %v5606_v23 = vpop.eup %5605 }
0x1756   :  { %v2172_v24 = vsel %vm281_vm5, %v5606_v23, 0.0  ;;  %v5608_v34 = vpop.eup %5607 }
0x1757   :  { %2173 = vadd.xlane.f32.xlu0 %v2172_v24  ;;  %v2060_v37 = vsel %vm281_vm5, %v5608_v34, 0.0 }
0x176d   :  { %1949 = vrot.lane.b32.xlu0 %v6087_v15, %s5753_s7 }
0x1774   :  { %2061 = vadd.xlane.f32.xlu1 %v2060_v37 }
0x1785   :  { %2066 = vrot.lane.b32.xlu1 %v6093_v17, %s5752_s4 }
0x1789   :  { %2178 = vrot.lane.b32.xlu1 %v6093_v17, %s5753_s7 }
0x17ad   :  { %1677 = vadd.xlane.f32.xlu1 %v1676_v43 }
0x17cc   :  { %v1833_v15 = vpop.xlane.xlu1 %1832 }
0x17cd   :  { %5609 = vrcp.f32 %v1833_v15 }
0x17d0   :  { %v1838_v46 = vpop.permute.xlu1 %1837 }
0x17d1   :  { %v1843_v47 = vsel %vm299_vm6, %v1838_v46, 0 }
0x17d2   :  { %5174 = vmatpush3.bf16.msra.mxu0 %v1843_v47 }
0x17d3   :  { %5185 = vmatprep.subr.bf16.mxu0 %v5747_v35 }
0x17d4   :  { %v1945_v17 = vpop.xlane.xlu0 %1944 }
0x17d5   :  { %5611 = vrcp.f32 %v1945_v17 }
0x17d7   :  { %v5610_v48 = vpop.eup %5609 }
0x17d8   :  { %v1835_v49 = vmul.f32 %v5610_v48, %v5602_v13 }
0x17da   :  { %v1836_v38 = vpack.c.bf16 %v1835_v49, %v1835_v49 }
0x17dc   :  { %5176 = vmatmul.mubr.msk.bf16.vlgmr.msra.gmra.mrb[48].mxu0 %vm281_vm5, %v1836_v38 }
0x17dd   :  { %5187 = vmatprep.mubr.msk.bf16.mxu0 %vm5748_vm2, %v5747_v35 }
0x17df   :  { %v5612_v53 = vpop.eup %5611 }
0x17e0   :  { %v1947_v55 = vmul.f32 %v5612_v53, %v5604_v30 }
0x17e2   :  { %v1948_v58 = vpack.c.bf16 %v1947_v55, %v1947_v55 }
0x17e4   :  { %v2174_v40 = vpop.xlane.xlu0 %2173 }
0x17e8   :  { %v1950_v56 = vpop.permute.xlu0 %1949 }
0x17e9   :  { %v1955_v57 = vsel %vm299_vm6, %v1950_v56, 0 }
0x17ea   :  { %5186 = vmatpush3.bf16.msra.mxu0 %v1955_v57 }
0x17eb   :  { %5197 = vmatprep.subr.bf16.mxu0 %v5747_v35 }
0x17ed   :  { %5188 = vmatmul.mubr.msk.bf16.vlgmr.msra.gmra.mrb[52].mxu0 %vm281_vm5, %v1948_v58 }
0x17ee   :  { %5199 = vmatprep.mubr.msk.bf16.mxu0 %vm5748_vm2, %v5747_v35 }
0x1801   :  { %v2062_v60 = vpop.xlane.xlu1 %2061 }
0x1802   :  { %5613 = vrcp.f32 %v2062_v60 }
0x1803   :  { %5615 = vrcp.f32 %v2174_v40 }
0x1805   :  { %v2067_v61 = vpop.permute.xlu1 %2066 }
0x1806   :  { %v2072_v0 = vsel %vm299_vm6, %v2067_v61, 0 }
0x1807   :  { %5198 = vmatpush3.bf16.msra.mxu0 %v2072_v0 }
0x1808   :  { %5209 = vmatprep.subr.bf16.mxu0 %v5747_v35 }
0x1809   :  { %v2179_v32 = vpop.permute.xlu1 %2178 }
0x180a   :  { %v2184_v3 = vsel %vm299_vm6, %v2179_v32, 0  ;;  %v2384_v32 = vld [vmem:[#allocation2 + $0x2a8] sm:$0xff] }
0x180c   :  { %v5614_v1 = vpop.eup %5613 }
0x180d   :  { %v2064_v28 = vmul.f32 %v5614_v1, %v5608_v34  ;;  %v5616_v26 = vpop.eup %5615 }
0x180e   :  { %v2176_v59 = vmul.f32 %v5616_v26, %v5606_v23  ;;  %v1675_v23 = vadd.f32 %v6130_v42, %v6062_v54  ;;  %v4708_v54 = vld [vmem:[#allocation2 + $0x270] ss:$0 sm:$0xff] }
0x180f   :  { %v2065_v25 = vpack.c.bf16 %v2064_v28, %v2064_v28 }
0x1810   :  { %v2177_v4 = vpack.c.bf16 %v2176_v59, %v2176_v59  ;;  %v1679_v24 = vsel %vm184_vm3, %v1675_v23, 0.0 }
0x1811   :  { %5200 = vmatmul.mubr.msk.bf16.vlgmr.msra.gmra.mrb[56].mxu0 %vm281_vm5, %v2065_v25  ;;  %v2385_v25 = vld [vmem:[#allocation2 + $0x2b0] sm:$0xff] }
0x1812   :  { %5210 = vmatpush3.bf16.msra.mxu0 %v2184_v3  ;;  %5211 = vmatprep.mubr.msk.bf16.mxu0 %vm5748_vm2, %v5747_v35  ;;  %v2389_v26 = vpack.c.bf16 %v2385_v25, %v2384_v32  ;;  %v2387_v3 = vld [vmem:[#allocation2 + $0x2c0] sm:$0xff] }
0x1813   :  { %5223 = vmatprep.subr.bf16.mxu0 %v5747_v35 }
0x1819   :  { %5212 = vmatmul.mubr.msk.bf16.vlgmr.msra.gmra.mrb[60].mxu0 %vm281_vm5, %v2177_v4 }
0x181a   :  { %5227 = vmatprep.mubr.msk.bf16.mxu0 %vm5748_vm2, %v5747_v35 }
0x183a   :  { %v1678_v15 = vpop.xlane.xlu1 %1677 }
0x183b   :  { %v1682_v47 = vmul.f32 0.03125, %v1678_v15 }
0x183d   :  { %v1684_v17 = vsub.f32 %v6165_v41, %v1682_v47 }
0x183f   :  { %v1686_v61 = vmul.f32 %v1684_v17, %v1684_v17 }
0x1841   :  { %v1688_v41 = vsel %vm184_vm3, %v1686_v61, 0.0 }
0x18af   :  { %v1879_v52 = vpop.f32.mrb[48].mxu0 }
0x18b0   :  { %v5177_v8 = vpop.f32.mrb[49].mxu0 }
0x18b1   :  { %v1882_v62 = vpop.f32.mrb[50].mxu0 }
0x18b2   :  { %v5178_v9 = vpop.f32.mrb[51].mxu0 }
0x18c0   :  { %v1991_v10 = vpop.f32.mrb[52].mxu0 }
0x18c1   :  { %v5189_v45 = vpop.f32.mrb[53].mxu0 }
0x18c2   :  { %v1994_v63 = vpop.f32.mrb[54].mxu0 }
0x18c3   :  { %v5190_v44 = vpop.f32.mrb[55].mxu0 }
0x18e4   :  { %v2108_v51 = vpop.f32.mrb[56].mxu0 }
0x18e5   :  { %v5201_v13 = vpop.f32.mrb[57].mxu0 }
0x18e6   :  { %v2111_v14 = vpop.f32.mrb[58].mxu0 }
0x18e7   :  { %v5202_v16 = vpop.f32.mrb[59].mxu0 }
0x18ec   :  { %v2220_v30 = vpop.f32.mrb[60].mxu0 }
0x18ed   :  { %v5537_v18 = vpack.i.bf16 %v2220_v30, %v1991_v10  ;;  %v5213_v20 = vpop.f32.mrb[61].mxu0 }
0x18ee   :  { %v2223_v21 = vpop.f32.mrb[62].mxu0 }
0x18ef   :  { %5538 = vrot.lane.b32.xlu0 %v5537_v18, %s5754_s1  ;;  %v5214_v22 = vpop.f32.mrb[63].mxu0 }
0x190e   :  { %1680 = vadd.xlane.f32.xlu0 %v1679_v24 }
0x1961   :  { %v5539_v29 = vpop.permute.xlu0 %5538 }
0x1962   :  { %v5541_v31 = vunpack.i.h.bf16 %v5539_v29  ;;  %v5540_v34 = vunpack.i.l.bf16 %v5539_v29 }
0x1964   :  { %v2230_v37 = vsel %vm233_vm4, %v2108_v51, %v5541_v31  ;;  %v2001_v39 = vsel %vm233_vm4, %v1879_v52, %v5540_v34  ;;  %v1673_v51 = vld [vmem:[#allocation2 + $0x220] sm:$0x3]  ;;  %v2329_v34 = vld [vmem:[#allocation2 + $0x288] sm:$0xff] }
0x1965   :  { %v2235_v43 = vpack.c.bf16 %v2230_v37, %v2001_v39  ;;  %v1705_v13 = vrot.slane %v1673_v51, %v5934_v33  ;;  %v1711_v21 = vrot.slane %v1673_v51, %v5937_v36  ;;  %v2328_v31 = vld [vmem:[#allocation2 + $0x280] sm:$0xff]  ;;  %v2330_v39 = vld [vmem:[#allocation2 + $0x290] sm:$0xff] }
0x1966   :  { %v2333_v37 = vpack.c.bf16 %v2329_v34, %v2328_v31 }
0x1967   :  { %5220 = vmatmul.mubr.msk.bf16.vlgmr.msra.gmra.mrb[72].mxu1 %vm184_vm3, %v2235_v43  ;;  %v2331_v43 = vld [vmem:[#allocation2 + $0x298] sm:$0xff] }
0x1968   :  { %5235 = vmatprep.mubr.msk.bf16.mxu1 %vm5748_vm2, %v5747_v35  ;;  %5232 = vmatpush3.bf16.msra.mxu1 %v2389_v26  ;;  %v2334_v15 = vpack.c.bf16 %v2331_v43, %v2330_v39 }
0x1969   :  { %5233 = vmatprep.subr.bf16.mxu1 %v5747_v35  ;;  %5224 = vmatpush3.bf16.msra.mxu0 %v2333_v37 }
0x196a   :  { %5225 = vmatprep.subr.bf16.mxu0 %v5747_v35 }
0x196d   :  { %5226 = vmatpush3.bf16.msra.mxu0 %v2334_v15 }
0x196e   :  { %5239 = vmatprep.subr.bf16.mxu0 %v5747_v35 }
0x199b   :  { %v1681_v46 = vpop.xlane.xlu0 %1680 }
0x199c   :  { %v1683_v42 = vmul.f32 0.03125, %v1681_v46 }
0x199e   :  { %v1685_v40 = vsub.f32 %v1675_v23, %v1683_v42 }
0x19a0   :  { %v1687_v1 = vmul.f32 %v1685_v40, %v1685_v40 }
0x19a2   :  { %v1691_v28 = vsel %vm184_vm3, %v1687_v1, 0.0 }
0x1a3a   :  { %v2280_v48 = vpop.f32.mrb[72].mxu1 }
0x1a3b   :  { %v2281_v49 = vadd.f32 %v4708_v54, %v2280_v48  ;;  %v5221_v38 = vpop.f32.mrb[73].mxu1 }
0x1a3c   :  { %v2283_v53 = vpop.f32.mrb[74].mxu1 }
0x1a3d   :  { %v2284_v55 = vadd.f32 %v4708_v54, %v2283_v53  ;;  %v5222_v56 = vpop.f32.mrb[75].mxu1  ;;  %v2288_v57 = vadd.f32 %v2281_v49, %v6073_v19  ;;  %v2386_v19 = vld [vmem:[#allocation2 + $0x2b8] sm:$0xff] }
0x1a3e   :  { %v2287_v49 = vld [vmem:[#allocation2 + $0x278] sm:$0x3] }
0x1a3f   :  { %v2290_v58 = vsel %vm184_vm3, %v2288_v57, 0.0  ;;  %v2289_v60 = vadd.f32 %v2284_v55, %v6071_v2  ;;  %v2390_v2 = vpack.c.bf16 %v2387_v3, %v2386_v19  ;;  %v2319_v38 = vrot.slane %v2287_v49, %v5934_v33 }
0x1a40   :  { %2291 = vadd.xlane.f32.xlu0 %v2290_v58  ;;  %v2325_v58 = vrot.slane %v2287_v49, %v5937_v36 }
0x1a41   :  { %v2293_v0 = vsel %vm184_vm3, %v2289_v60, 0.0  ;;  %5234 = vmatpush3.bf16.msra.mxu1 %v2390_v2 }
0x1a42   :  { %2294 = vadd.xlane.f32.xlu1 %v2293_v0  ;;  %5245 = vmatprep.subr.bf16.mxu1 %v5747_v35 }
0x1a44   :  { %1689 = vadd.xlane.f32.xlu0 %v1688_v41  ;;  %v4712_v41 = vld [vmem:[#allocation2 + $0x2c8] ss:$0 sm:$0xff] }
0x1a46   :  { %1692 = vadd.xlane.f32.xlu1 %v1691_v28 }
0x1acd   :  { %v2292_v59 = vpop.xlane.xlu0 %2291 }
0x1ace   :  { %v2296_v4 = vmul.f32 0.03125, %v2292_v59 }
0x1acf   :  { %v2295_v5 = vpop.xlane.xlu1 %2294 }
0x1ad0   :  { %v2298_v6 = vsub.f32 %v2288_v57, %v2296_v4  ;;  %v2297_v7 = vmul.f32 0.03125, %v2295_v5  ;;  %v4710_v4 = vld [vmem:[#allocation2 + $0x2a0] ss:$0 sm:$0xff] }
0x1ad1   :  { %v1690_v52 = vpop.xlane.xlu0 %1689 }
0x1ad2   :  { %v2299_v8 = vsub.f32 %v2289_v60, %v2297_v7  ;;  %v1694_v62 = vmul.f32 0.03125, %v1690_v52  ;;  %v2300_v9 = vmul.f32 %v2298_v6, %v2298_v6 }
0x1ad3   :  { %v1693_v10 = vpop.xlane.xlu1 %1692 }
0x1ad4   :  { %v1696_v45 = vadd.f32 1e-05, %v1694_v62  ;;  %v1695_v63 = vmul.f32 0.03125, %v1693_v10  ;;  %v2302_v44 = vsel %vm184_vm3, %v2300_v9, 0.0  ;;  %v2301_v11 = vmul.f32 %v2299_v8, %v2299_v8 }
0x1ad5   :  { %2303 = vadd.xlane.f32.xlu0 %v2302_v44 }
0x1ad6   :  { %5617 = vrsqrt.f32 %v1696_v45  ;;  %v1697_v50 = vadd.f32 1e-05, %v1695_v63  ;;  %v2305_v12 = vsel %vm184_vm3, %v2301_v11, 0.0 }
0x1ad7   :  { %2306 = vadd.xlane.f32.xlu1 %v2305_v12 }
0x1ad8   :  { %5619 = vrsqrt.f32 %v1697_v50 }
0x1ae0   :  { %v5618_v14 = vpop.eup %5617 }
0x1ae1   :  { %v1700_v16 = vmul.f32 %v5618_v14, %v1684_v17 }
0x1ae2   :  { %v5620_v30 = vpop.eup %5619 }
0x1ae3   :  { %v1706_v18 = vmul.f32 %v1705_v13, %v1700_v16  ;;  %v1701_v20 = vmul.f32 %v5620_v30, %v1685_v40 }
0x1ae5   :  { %v1707_v22 = vmul.f32 %v1705_v13, %v1701_v20  ;;  %v1712_v23 = vadd.f32 %v1711_v21, %v1706_v18 }
0x1ae7   :  { %v1713_v24 = vadd.f32 %v1711_v21, %v1707_v22 }
0x1ae9   :  { %v6213_v29 = vpack.c.bf16 %v1713_v24, %v1712_v23 }
0x1aeb   :  { %5236 = vmatmul.mubr.msk.bf16.vlgmr.msra.gmra.mrb[76].mxu1 %vm184_vm3, %v6213_v29 }
0x1aec   :  { %5247 = vmatprep.mubr.msk.bf16.mxu1 %vm5748_vm2, %v5747_v35 }
0x1b62   :  { %v2304_v46 = vpop.xlane.xlu0 %2303 }
0x1b63   :  { %v2308_v47 = vmul.f32 0.03125, %v2304_v46 }
0x1b64   :  { %v2307_v54 = vpop.xlane.xlu1 %2306 }
0x1b65   :  { %v2310_v42 = vadd.f32 1e-05, %v2308_v47  ;;  %v2309_v48 = vmul.f32 0.03125, %v2307_v54 }
0x1b67   :  { %5621 = vrsqrt.f32 %v2310_v42  ;;  %v2311_v17 = vadd.f32 1e-05, %v2309_v48 }
0x1b69   :  { %5623 = vrsqrt.f32 %v2311_v17 }
0x1b71   :  { %v5622_v53 = vpop.eup %5621 }
0x1b72   :  { %v2314_v40 = vmul.f32 %v5622_v53, %v2298_v6 }
0x1b73   :  { %v5624_v55 = vpop.eup %5623 }
0x1b74   :  { %v2320_v56 = vmul.f32 %v2319_v38, %v2314_v40  ;;  %v2315_v57 = vmul.f32 %v5624_v55, %v2299_v8 }
0x1b76   :  { %v2321_v60 = vmul.f32 %v2319_v38, %v2315_v57  ;;  %v6223_v61 = vadd.f32 %v2325_v58, %v2320_v56 }
0x1b78   :  { %v6225_v0 = vadd.f32 %v2325_v58, %v2321_v60 }
0x1b7a   :  { %v2332_v1 = vpack.c.bf16 %v6225_v0, %v6223_v61 }
0x1b7c   :  { %5228 = vmatmul.mubr.msk.bf16.vlgmr.msra.gmra.mrb[64].mxu0 %vm184_vm3, %v2332_v1 }
0x1b7d   :  { %5241 = vmatprep.mubr.msk.bf16.mxu0 %vm5748_vm2, %v5747_v35 }
0x1bbe   :  { %v2433_v28 = vpop.f32.mrb[76].mxu1 }
0x1bbf   :  { %v2434_v32 = vadd.f32 %v4712_v41, %v2433_v28  ;;  %v5237_v25 = vpop.f32.mrb[77].mxu1 }
0x1bc0   :  { %v2436_v26 = vpop.f32.mrb[78].mxu1 }
0x1bc1   :  { %v6232_v19 = vpack.c.bf16 %v2434_v32, %v2434_v32  ;;  %v2437_v3 = vadd.f32 %v4712_v41, %v2436_v26  ;;  %v5238_v2 = vpop.f32.mrb[79].mxu1 }
0x1bc3   :  { %2553 = vrot.lane.b32.xlu0 %v6232_v19, %s5751_s30  ;;  %v2446_v59 = vsel %vm233_vm4, %v6232_v19, 0  ;;  %v6244_v44 = vpack.c.bf16 %v2437_v3, %v2437_v3 }
0x1bc4   :  { %5240 = vmatpush3.bf16.xpose.msra.mxu0 %v2446_v59 }
0x1bc5   :  { %5251 = vmatprep.subr.bf16.mxu0 %v5747_v35  ;;  %v2673_v50 = vsel %vm233_vm4, %v6244_v44, 0 }
0x1c35   :  { %v2554_v52 = vpop.permute.xlu0 %2553 }
0x1c36   :  { %v2559_v45 = vsel %vm233_vm4, %v2554_v52, 0 }
0x1c4f   :  { %v2377_v5 = vpop.f32.mrb[64].mxu0 }
0x1c50   :  { %v2378_v6 = vadd.f32 %v4710_v4, %v2377_v5  ;;  %v5229_v7 = vpop.f32.mrb[65].mxu0 }
0x1c51   :  { %v2380_v8 = vpop.f32.mrb[66].mxu0 }
0x1c52   :  { %v2440_v62 = vpack.c.bf16 %v2378_v6, %v2378_v6  ;;  %v2381_v9 = vadd.f32 %v4710_v4, %v2380_v8  ;;  %v5230_v10 = vpop.f32.mrb[67].mxu0 }
0x1c54   :  { %v2667_v63 = vpack.c.bf16 %v2381_v9, %v2381_v9  ;;  %2551 = vrot.lane.b32.xlu1 %v2440_v62, %s5751_s30  ;;  %5242 = vmatmul.mubr.msk.bf16.vlgmr.msra.gmra.mrb[68].mxu0 %vm233_vm4, %v2440_v62 }
0x1c55   :  { %5252 = vmatpush3.bf16.xpose.msra.mxu0 %v2559_v45  ;;  %5253 = vmatprep.mubr.msk.bf16.mxu0 %vm5748_vm2, %v5747_v35 }
0x1c56   :  { %2778 = vrot.lane.b32.xlu0 %v2667_v63, %s5751_s30  ;;  %5263 = vmatprep.subr.bf16.mxu0 %v5747_v35 }
0x1c58   :  { %2780 = vrot.lane.b32.xlu1 %v6244_v44, %s5751_s30 }
0x1cc6   :  { %v2552_v11 = vpop.permute.xlu1 %2551 }
0x1cc7   :  { %5254 = vmatmul.mubr.msk.bf16.vlgmr.msra.gmra.mrb[72].mxu0 %vm233_vm4, %v2552_v11 }
0x1cc8   :  { %5264 = vmatpush3.bf16.xpose.msra.mxu0 %v2673_v50  ;;  %5265 = vmatprep.mubr.msk.bf16.mxu0 %vm5748_vm2, %v5747_v35  ;;  %v2779_v13 = vpop.permute.xlu0 %2778 }
0x1cc9   :  { %5275 = vmatprep.subr.bf16.mxu0 %v5747_v35 }
0x1cca   :  { %v2781_v12 = vpop.permute.xlu1 %2780 }
0x1ccb   :  { %v2786_v51 = vsel %vm233_vm4, %v2781_v12, 0 }
0x1ccf   :  { %5266 = vmatmul.mubr.msk.bf16.vlgmr.msra.gmra.mrb[76].mxu0 %vm233_vm4, %v2667_v63 }
0x1cd0   :  { %5276 = vmatpush3.bf16.xpose.msra.mxu0 %v2786_v51  ;;  %5277 = vmatprep.mubr.msk.bf16.mxu0 %vm5748_vm2, %v5747_v35 }
0x1cd1   :  { %5287 = vmatprep.subr.bf16.mxu0 %v5747_v35 }
0x1cd7   :  { %5278 = vmatmul.mubr.msk.bf16.vlgmr.msra.gmra.mrb[80].mxu0 %vm233_vm4, %v2779_v13 }
0x1cd8   :  { %5291 = vmatprep.mubr.msk.bf16.mxu0 %vm5748_vm2, %v5747_v35 }
0x1d27   :  { %v2482_v14 = vpop.f32.mrb[68].mxu0 }
0x1d28   :  { %v2488_v16 = vmul.f32 0.25, %v2482_v14  ;;  %v5243_v30 = vpop.f32.mrb[69].mxu0 }
0x1d29   :  { %v2485_v18 = vpop.f32.mrb[70].mxu0 }
0x1d2a   :  { %v5244_v20 = vpop.f32.mrb[71].mxu0  ;;  %v2489_v21 = vsel %vm281_vm5, %v2488_v16, -inf }
0x1d2b   :  { %2490 = vmax.xlane.f32.xlu1 %v2489_v21 }
0x1d9a   :  { %v2595_v22 = vpop.f32.mrb[72].mxu0 }
0x1d9b   :  { %v2601_v23 = vmul.f32 0.25, %v2595_v22  ;;  %v5255_v24 = vpop.f32.mrb[73].mxu0 }
0x1d9c   :  { %v2598_v31 = vpop.f32.mrb[74].mxu0 }
0x1d9d   :  { %v5256_v34 = vpop.f32.mrb[75].mxu0  ;;  %v2602_v37 = vsel %vm281_vm5, %v2601_v23, -inf }
0x1d9e   :  { %2603 = vmax.xlane.f32.xlu0 %v2602_v37  ;;  %v2894_v37 = vld [vmem:[#allocation2 + $0x2d0] sm:$0xff] }
0x1da2   :  { %v2709_v39 = vpop.f32.mrb[76].mxu0 }
0x1da3   :  { %v2715_v43 = vmul.f32 0.25, %v2709_v39  ;;  %v5267_v15 = vpop.f32.mrb[77].mxu0  ;;  %v2895_v39 = vld [vmem:[#allocation2 + $0x2d8] sm:$0xff] }
0x1da4   :  { %v2712_v46 = vpop.f32.mrb[78].mxu0 }
0x1da5   :  { %v5268_v47 = vpop.f32.mrb[79].mxu0  ;;  %v2716_v54 = vsel %vm281_vm5, %v2715_v43, -inf }
0x1da6   :  { %2717 = vmax.xlane.f32.xlu0 %v2716_v54 }
0x1daa   :  { %v2822_v42 = vpop.f32.mrb[80].mxu0 }
0x1dab   :  { %v2828_v48 = vmul.f32 0.25, %v2822_v42  ;;  %v5279_v17 = vpop.f32.mrb[81].mxu0 }
0x1dac   :  { %v2825_v49 = vpop.f32.mrb[82].mxu0 }
0x1dad   :  { %v5280_v38 = vpop.f32.mrb[83].mxu0  ;;  %v2829_v53 = vsel %vm281_vm5, %v2828_v48, -inf }
0x1dae   :  { %2830 = vmax.xlane.f32.xlu1 %v2829_v53  ;;  %v2896_v38 = vld [vmem:[#allocation2 + $0x2e0] sm:$0xff]  ;;  %v2897_v53 = vld [vmem:[#allocation2 + $0x2e8] sm:$0xff] }
0x1db8   :  { %v2491_v40 = vpop.xlane.xlu1 %2490 }
0x1db9   :  { %v2492_v55 = vsub.f32 %v2488_v16, %v2491_v40  ;;  %v2900_v40 = vpack.c.bf16 %v2897_v53, %v2896_v38 }
0x1dbb   :  { %v2493_v56 = vmul.f32 1.442695, %v2492_v55 }
0x1dbd   :  { %5625 = vpow2.f32 %v2493_v56 }
0x1dc7   :  { %v5626_v57 = vpop.eup %5625 }
0x1dc8   :  { %v2495_v58 = vsel %vm281_vm5, %v5626_v57, 0.0 }
0x1dc9   :  { %2496 = vadd.xlane.f32.xlu0 %v2495_v58 }
0x1e2b   :  { %v2604_v60 = vpop.xlane.xlu0 %2603 }
0x1e2c   :  { %v2605_v1 = vsub.f32 %v2601_v23, %v2604_v60 }
0x1e2e   :  { %v2606_v41 = vmul.f32 1.442695, %v2605_v1 }
0x1e30   :  { %5627 = vpow2.f32 %v2606_v41 }
0x1e33   :  { %v2718_v28 = vpop.xlane.xlu0 %2717 }
0x1e34   :  { %v2719_v32 = vsub.f32 %v2715_v43, %v2718_v28  ;;  %v2899_v43 = vpack.c.bf16 %v2895_v39, %v2894_v37  ;;  %v3052_v39 = vld [vmem:[#allocation2 + $0x340] sm:$0xff] }
0x1e36   :  { %v2720_v25 = vmul.f32 1.442695, %v2719_v32  ;;  %5288 = vmatpush3.bf16.msra.mxu0 %v2899_v43 }
0x1e37   :  { %5289 = vmatprep.subr.bf16.mxu0 %v5747_v35 }
0x1e38   :  { %5629 = vpow2.f32 %v2720_v25 }
0x1e3a   :  { %v5628_v26 = vpop.eup %5627  ;;  %5290 = vmatpush3.bf16.msra.mxu0 %v2900_v40 }
0x1e3b   :  { %v2608_v3 = vsel %vm281_vm5, %v5628_v26, 0.0  ;;  %v2831_v4 = vpop.xlane.xlu1 %2830  ;;  %5303 = vmatprep.subr.bf16.mxu0 %v5747_v35 }
0x1e3c   :  { %2609 = vadd.xlane.f32.xlu1 %v2608_v3  ;;  %v2832_v5 = vsub.f32 %v2828_v48, %v2831_v4 }
0x1e3e   :  { %v2833_v6 = vmul.f32 1.442695, %v2832_v5  ;;  %v4722_v5 = vld [vmem:[#allocation2 + $0x2f0] ss:$0 sm:$0xff] }
0x1e40   :  { %5631 = vpow2.f32 %v2833_v6 }
0x1e42   :  { %v5630_v2 = vpop.eup %5629 }
0x1e43   :  { %v2722_v59 = vsel %vm281_vm5, %v5630_v2, 0.0 }
0x1e44   :  { %2723 = vadd.xlane.f32.xlu0 %v2722_v59 }
0x1e4a   :  { %v5632_v7 = vpop.eup %5631 }
0x1e4b   :  { %v2835_v52 = vsel %vm281_vm5, %v5632_v7, 0.0 }
0x1e4d   :  { %2614 = vrot.lane.b32.xlu1 %v6232_v19, %s5750_s2 }
0x1e56   :  { %v2497_v8 = vpop.xlane.xlu0 %2496 }
0x1e57   :  { %5633 = vrcp.f32 %v2497_v8 }
0x1e5a   :  { %2502 = vrot.lane.b32.xlu0 %v6232_v19, %s5749_s0 }
0x1e5e   :  { %2841 = vrot.lane.b32.xlu0 %v6244_v44, %s5750_s2 }
0x1e61   :  { %v5634_v9 = vpop.eup %5633 }
0x1e62   :  { %v2499_v19 = vmul.f32 %v5634_v9, %v5626_v57 }
0x1e64   :  { %v2500_v50 = vpack.c.bf16 %v2499_v19, %v2499_v19 }
0x1e71   :  { %2836 = vadd.xlane.f32.xlu1 %v2835_v52 }
0x1e82   :  { %2729 = vrot.lane.b32.xlu1 %v6244_v44, %s5749_s0 }
0x1ec9   :  { %v2610_v62 = vpop.xlane.xlu1 %2609 }
0x1eca   :  { %5635 = vrcp.f32 %v2610_v62 }
0x1ecd   :  { %v2615_v11 = vpop.permute.xlu1 %2614 }
0x1ece   :  { %v2620_v51 = vsel %vm299_vm6, %v2615_v11, 0 }
0x1ed1   :  { %v2724_v10 = vpop.xlane.xlu0 %2723 }
0x1ed2   :  { %5637 = vrcp.f32 %v2724_v10 }
0x1ed4   :  { %v5636_v12 = vpop.eup %5635 }
0x1ed5   :  { %v2503_v45 = vpop.permute.xlu0 %2502  ;;  %v2612_v44 = vmul.f32 %v5636_v12, %v5628_v26 }
0x1ed6   :  { %v2508_v63 = vsel %vm299_vm6, %v2503_v45, 0 }
0x1ed7   :  { %5246 = vmatpush3.bf16.msra.mxu1 %v2508_v63  ;;  %v2613_v13 = vpack.c.bf16 %v2612_v44, %v2612_v44 }
0x1ed8   :  { %5257 = vmatprep.subr.bf16.mxu1 %v5747_v35 }
0x1ed9   :  { %v2842_v21 = vpop.permute.xlu0 %2841 }
0x1eda   :  { %5248 = vmatmul.mubr.msk.bf16.vlgmr.msra.gmra.mrb[80].mxu1 %vm281_vm5, %v2500_v50  ;;  %v2847_v23 = vsel %vm299_vm6, %v2842_v21, 0  ;;  %v2993_v21 = vld [vmem:[#allocation2 + $0x310] sm:$0xff] }
0x1edb   :  { %5258 = vmatpush3.bf16.msra.mxu1 %v2620_v51  ;;  %5259 = vmatprep.mubr.msk.bf16.mxu1 %vm5748_vm2, %v5747_v35 }
0x1edc   :  { %5269 = vmatprep.subr.bf16.mxu1 %v5747_v35  ;;  %v5638_v14 = vpop.eup %5637 }
0x1edd   :  { %v2726_v30 = vmul.f32 %v5638_v14, %v5630_v2 }
0x1edf   :  { %v2727_v22 = vpack.c.bf16 %v2726_v30, %v2726_v30 }
0x1ee2   :  { %5260 = vmatmul.mubr.msk.bf16.vlgmr.msra.gmra.mrb[84].mxu1 %vm281_vm5, %v2613_v13 }
0x1ee3   :  { %5271 = vmatprep.mubr.msk.bf16.mxu1 %vm5748_vm2, %v5747_v35 }
0x1efe   :  { %v2837_v16 = vpop.xlane.xlu1 %2836 }
0x1eff   :  { %5639 = vrcp.f32 %v2837_v16 }
0x1f02   :  { %v2730_v18 = vpop.permute.xlu1 %2729 }
0x1f03   :  { %v2735_v20 = vsel %vm299_vm6, %v2730_v18, 0  ;;  %v2992_v18 = vld [vmem:[#allocation2 + $0x308] sm:$0xff] }
0x1f04   :  { %5270 = vmatpush3.bf16.msra.mxu1 %v2735_v20 }
0x1f05   :  { %5281 = vmatprep.subr.bf16.mxu1 %v5747_v35 }
0x1f07   :  { %5272 = vmatmul.mubr.msk.bf16.vlgmr.msra.gmra.mrb[88].mxu1 %vm281_vm5, %v2727_v22  ;;  %v2994_v22 = vld [vmem:[#allocation2 + $0x318] sm:$0xff] }
0x1f08   :  { %5282 = vmatpush3.bf16.msra.mxu1 %v2847_v23  ;;  %5283 = vmatprep.mubr.msk.bf16.mxu1 %vm5748_vm2, %v5747_v35  ;;  %v2997_v23 = vpack.c.bf16 %v2994_v22, %v2993_v21 }
0x1f09   :  { %v5640_v24 = vpop.eup %5639  ;;  %5295 = vmatprep.subr.bf16.mxu1 %v5747_v35 }
0x1f0a   :  { %v2839_v31 = vmul.f32 %v5640_v24, %v5632_v7  ;;  %v3049_v24 = vld [vmem:[#allocation2 + $0x328] sm:$0xff] }
0x1f0c   :  { %v2840_v34 = vpack.c.bf16 %v2839_v31, %v2839_v31  ;;  %v3050_v31 = vld [vmem:[#allocation2 + $0x330] sm:$0xff] }
0x1f0d   :  { %v3058_v37 = vpack.c.bf16 %v3050_v31, %v3049_v24 }
0x1f0f   :  { %5284 = vmatmul.mubr.msk.bf16.vlgmr.msra.gmra.mrb[92].mxu1 %vm281_vm5, %v2840_v34  ;;  %v3051_v34 = vld [vmem:[#allocation2 + $0x338] sm:$0xff] }
0x1f10   :  { %5299 = vmatprep.mubr.msk.bf16.mxu1 %vm5748_vm2, %v5747_v35  ;;  %v3059_v43 = vpack.c.bf16 %v3052_v39, %v3051_v34  ;;  %v3152_v34 = vld [vmem:[#allocation2 + $0x378] sm:$0xff] }
0x1fad   :  { %v2544_v15 = vpop.f32.mrb[80].mxu1 }
0x1fae   :  { %v5249_v46 = vpop.f32.mrb[81].mxu1 }
0x1faf   :  { %v2547_v47 = vpop.f32.mrb[82].mxu1 }
0x1fb0   :  { %v5250_v54 = vpop.f32.mrb[83].mxu1 }
0x1fb5   :  { %v2656_v42 = vpop.f32.mrb[84].mxu1 }
0x1fb6   :  { %v5261_v48 = vpop.f32.mrb[85].mxu1 }
0x1fb7   :  { %v2659_v17 = vpop.f32.mrb[86].mxu1 }
0x1fb8   :  { %v5262_v49 = vpop.f32.mrb[87].mxu1  ;;  %v2950_v17 = vld [vmem:[#allocation2 + $0x2f8] sm:$0x3] }
0x1fb9   :  { %v2982_v38 = vrot.slane %v2950_v17, %v5934_v33 }
0x1fda   :  { %v2771_v55 = vpop.f32.mrb[88].mxu1 }
0x1fdb   :  { %v5273_v56 = vpop.f32.mrb[89].mxu1 }
0x1fdc   :  { %v2774_v57 = vpop.f32.mrb[90].mxu1 }
0x1fdd   :  { %v5274_v58 = vpop.f32.mrb[91].mxu1  ;;  %v2988_v57 = vrot.slane %v2950_v17, %v5937_v36 }
0x1fe2   :  { %v2883_v60 = vpop.f32.mrb[92].mxu1 }
0x1fe3   :  { %v5542_v1 = vpack.i.bf16 %v2883_v60, %v2656_v42  ;;  %v5285_v41 = vpop.f32.mrb[93].mxu1 }
0x1fe4   :  { %v2886_v28 = vpop.f32.mrb[94].mxu1 }
0x1fe5   :  { %5543 = vrot.lane.b32.xlu1 %v5542_v1, %s5754_s1  ;;  %v5286_v32 = vpop.f32.mrb[95].mxu1  ;;  %v3053_v28 = vld [vmem:[#allocation2 + $0x348] sm:$0xff] }
0x1fe6   :  { %v3054_v32 = vld [vmem:[#allocation2 + $0x350] sm:$0xff] }
0x2057   :  { %v5544_v25 = vpop.permute.xlu1 %5543 }
0x2058   :  { %v5546_v26 = vunpack.i.h.bf16 %v5544_v25  ;;  %v5545_v3 = vunpack.i.l.bf16 %v5544_v25  ;;  %v3060_v25 = vpack.c.bf16 %v3054_v32, %v3053_v28 }
0x205a   :  { %v2893_v2 = vsel %vm233_vm4, %v2771_v55, %v5546_v26  ;;  %v2666_v59 = vsel %vm233_vm4, %v2544_v15, %v5545_v3  ;;  %v3055_v26 = vld [vmem:[#allocation2 + $0x358] sm:$0xff]  ;;  %v3056_v3 = vld [vmem:[#allocation2 + $0x360] sm:$0xff] }
0x205b   :  { %v2898_v4 = vpack.c.bf16 %v2893_v2, %v2666_v59  ;;  %v3061_v2 = vpack.c.bf16 %v3056_v3, %v3055_v26  ;;  %v4724_v59 = vld [vmem:[#allocation2 + $0x320] ss:$0 sm:$0xff] }
0x205d   :  { %5292 = vmatmul.mubr.msk.bf16.vlgmr.msra.gmra.mrb[84].mxu0 %vm184_vm3, %v2898_v4 }
0x205e   :  { %5311 = vmatprep.mubr.msk.bf16.mxu0 %vm5748_vm2, %v5747_v35  ;;  %5304 = vmatpush3.bf16.msra.mxu0 %v3058_v37  ;;  %v3153_v37 = vld [vmem:[#allocation2 + $0x380] sm:$0xff] }
0x205f   :  { %5305 = vmatprep.subr.bf16.mxu0 %v5747_v35  ;;  %v3157_v39 = vpack.c.bf16 %v3153_v37, %v3152_v34 }
0x2062   :  { %5306 = vmatpush3.bf16.msra.mxu0 %v3059_v43  ;;  %v3154_v43 = vld [vmem:[#allocation2 + $0x388] sm:$0xff] }
0x2063   :  { %5307 = vmatprep.subr.bf16.mxu0 %v5747_v35 }
0x2066   :  { %5308 = vmatpush3.bf16.msra.mxu0 %v3060_v25  ;;  %v4728_v25 = vld [vmem:[#allocation2 + $0x398] ss:$0 sm:$0xff] }
0x2067   :  { %5309 = vmatprep.subr.bf16.mxu0 %v5747_v35 }
0x206a   :  { %5310 = vmatpush3.bf16.msra.mxu0 %v3061_v2 }
0x206b   :  { %5329 = vmatprep.subr.bf16.mxu0 %v5747_v35 }
0x2130   :  { %v2943_v6 = vpop.f32.mrb[84].mxu0 }
0x2131   :  { %v2944_v7 = vadd.f32 %v4722_v5, %v2943_v6  ;;  %v5293_v52 = vpop.f32.mrb[85].mxu0 }
0x2132   :  { %v2946_v8 = vpop.f32.mrb[86].mxu0 }
0x2133   :  { %v2951_v62 = vadd.f32 %v2944_v7, %v6223_v61  ;;  %v2947_v9 = vadd.f32 %v4722_v5, %v2946_v8  ;;  %v5294_v10 = vpop.f32.mrb[87].mxu0 }
0x2135   :  { %v2952_v19 = vadd.f32 %v2947_v9, %v6225_v0  ;;  %v2953_v45 = vsel %vm184_vm3, %v2951_v62, 0.0  ;;  %v2991_v0 = vld [vmem:[#allocation2 + $0x300] sm:$0xff] }
0x2136   :  { %2954 = vadd.xlane.f32.xlu0 %v2953_v45  ;;  %v2996_v20 = vpack.c.bf16 %v2992_v18, %v2991_v0 }
0x2137   :  { %v2956_v63 = vsel %vm184_vm3, %v2952_v19, 0.0 }
0x2138   :  { %2957 = vadd.xlane.f32.xlu1 %v2956_v63  ;;  %5296 = vmatpush3.bf16.msra.mxu1 %v2996_v20 }
0x2139   :  { %5297 = vmatprep.subr.bf16.mxu1 %v5747_v35 }
0x213c   :  { %5298 = vmatpush3.bf16.msra.mxu1 %v2997_v23 }
0x213d   :  { %5315 = vmatprep.subr.bf16.mxu1 %v5747_v35 }
0x21c3   :  { %v2955_v11 = vpop.xlane.xlu0 %2954 }
0x21c4   :  { %v2959_v50 = vmul.f32 0.03125, %v2955_v11 }
0x21c5   :  { %v2958_v12 = vpop.xlane.xlu1 %2957 }
0x21c6   :  { %v2961_v51 = vsub.f32 %v2951_v62, %v2959_v50  ;;  %v2960_v44 = vmul.f32 0.03125, %v2958_v12 }
0x21c8   :  { %v2962_v13 = vsub.f32 %v2952_v19, %v2960_v44  ;;  %v2963_v14 = vmul.f32 %v2961_v51, %v2961_v51  ;;  %v4726_v19 = vld [vmem:[#allocation2 + $0x368] ss:$0 sm:$0xff] }
0x21ca   :  { %v2965_v16 = vsel %vm184_vm3, %v2963_v14, 0.0  ;;  %v2964_v61 = vmul.f32 %v2962_v13, %v2962_v13 }
0x21cb   :  { %2966 = vadd.xlane.f32.xlu0 %v2965_v16 }
0x21cc   :  { %v2968_v30 = vsel %vm184_vm3, %v2964_v61, 0.0 }
0x21cf   :  { %2969 = vadd.xlane.f32.xlu0 %v2968_v30 }
0x2258   :  { %v2967_v15 = vpop.xlane.xlu0 %2966 }
0x2259   :  { %v2971_v46 = vmul.f32 0.03125, %v2967_v15  ;;  %v3155_v15 = vld [vmem:[#allocation2 + $0x390] sm:$0xff] }
0x225b   :  { %v2973_v47 = vadd.f32 1e-05, %v2971_v46  ;;  %v3158_v46 = vpack.c.bf16 %v3155_v15, %v3154_v43 }
0x225c   :  { %v2970_v54 = vpop.xlane.xlu0 %2969 }
0x225d   :  { %5641 = vrsqrt.f32 %v2973_v47  ;;  %v2972_v42 = vmul.f32 0.03125, %v2970_v54 }
0x225f   :  { %v2974_v48 = vadd.f32 1e-05, %v2972_v42 }
0x2261   :  { %5643 = vrsqrt.f32 %v2974_v48 }
0x2267   :  { %v5642_v49 = vpop.eup %5641 }
0x2268   :  { %v2977_v53 = vmul.f32 %v5642_v49, %v2961_v51 }
0x226a   :  { %v2983_v55 = vmul.f32 %v2982_v38, %v2977_v53 }
0x226b   :  { %v5644_v40 = vpop.eup %5643 }
0x226c   :  { %v2978_v56 = vmul.f32 %v5644_v40, %v2962_v13  ;;  %v2989_v60 = vadd.f32 %v2988_v57, %v2983_v55 }
0x226e   :  { %v2984_v58 = vmul.f32 %v2982_v38, %v2978_v56  ;;  %v3111_v38 = vld [vmem:[#allocation2 + $0x370] sm:$0x3] }
0x226f   :  { %v3143_v53 = vrot.slane %v3111_v38, %v5934_v33 }
0x2270   :  { %v2990_v1 = vadd.f32 %v2988_v57, %v2984_v58 }
0x2272   :  { %v2995_v41 = vpack.c.bf16 %v2990_v1, %v2989_v60 }
0x2274   :  { %5300 = vmatmul.mubr.msk.bf16.vlgmr.msra.gmra.mrb[96].mxu1 %vm184_vm3, %v2995_v41 }
0x2275   :  { %5319 = vmatprep.mubr.msk.bf16.mxu1 %vm5748_vm2, %v5747_v35  ;;  %5316 = vmatpush3.bf16.msra.mxu1 %v3157_v39 }
0x2276   :  { %5317 = vmatprep.subr.bf16.mxu1 %v5747_v35 }
0x2279   :  { %5318 = vmatpush3.bf16.msra.mxu1 %v3158_v46 }
0x227a   :  { %5323 = vmatprep.subr.bf16.mxu1 %v5747_v35 }
0x2347   :  { %v3040_v4 = vpop.f32.mrb[96].mxu1 }
0x2348   :  { %v3041_v5 = vadd.f32 %v4724_v59, %v3040_v4  ;;  %v5301_v6 = vpop.f32.mrb[97].mxu1 }
0x2349   :  { %v3043_v7 = vpop.f32.mrb[98].mxu1 }
0x234a   :  { %v3044_v52 = vadd.f32 %v4724_v59, %v3043_v7  ;;  %v5302_v8 = vpop.f32.mrb[99].mxu1  ;;  %v3047_v62 = vmax.f32 %v3041_v5, 0.0 }
0x234c   :  { %v3048_v9 = vmax.f32 %v3044_v52, 0.0 }
0x234e   :  { %v3057_v10 = vpack.c.bf16 %v3048_v9, %v3047_v62 }
0x2350   :  { %5312 = vmatmul.mubr.msk.bf16.vlgmr.msra.gmra.mrb[88].mxu0 %vm860_vm9, %v3057_v10 }
0x2351   :  { %5331 = vmatprep.mubr.msk.bf16.mxu0 %vm5748_vm2, %v5747_v35 }
0x2423   :  { %v3104_v45 = vpop.f32.mrb[88].mxu0 }
0x2424   :  { %v3105_v63 = vadd.f32 %v4726_v19, %v3104_v45  ;;  %v5313_v11 = vpop.f32.mrb[89].mxu0 }
0x2425   :  { %v3107_v50 = vpop.f32.mrb[90].mxu0 }
0x2426   :  { %v3112_v12 = vadd.f32 %v3105_v63, %v2989_v60  ;;  %v3108_v51 = vadd.f32 %v4726_v19, %v3107_v50  ;;  %v5314_v44 = vpop.f32.mrb[91].mxu0  ;;  %v3149_v60 = vrot.slane %v3111_v38, %v5937_v36 }
0x2428   :  { %v3113_v13 = vadd.f32 %v3108_v51, %v2990_v1  ;;  %v3114_v14 = vsel %vm184_vm3, %v3112_v12, 0.0 }
0x2429   :  { %3115 = vadd.xlane.f32.xlu1 %v3114_v14 }
0x242a   :  { %v3117_v16 = vsel %vm184_vm3, %v3113_v13, 0.0 }
0x242b   :  { %3118 = vadd.xlane.f32.xlu0 %v3117_v16 }
0x24b6   :  { %v3116_v61 = vpop.xlane.xlu1 %3115 }
0x24b7   :  { %v3120_v30 = vmul.f32 0.03125, %v3116_v61 }
0x24b8   :  { %v3119_v0 = vpop.xlane.xlu0 %3118 }
0x24b9   :  { %v3122_v18 = vsub.f32 %v3112_v12, %v3120_v30  ;;  %v3121_v20 = vmul.f32 0.03125, %v3119_v0 }
0x24bb   :  { %v3123_v21 = vsub.f32 %v3113_v13, %v3121_v20  ;;  %v3124_v22 = vmul.f32 %v3122_v18, %v3122_v18 }
0x24bd   :  { %v3126_v23 = vsel %vm184_vm3, %v3124_v22, 0.0  ;;  %v3125_v24 = vmul.f32 %v3123_v21, %v3123_v21 }
0x24be   :  { %3127 = vadd.xlane.f32.xlu1 %v3126_v23 }
0x24bf   :  { %v3129_v31 = vsel %vm184_vm3, %v3125_v24, 0.0 }
0x24c0   :  { %3130 = vadd.xlane.f32.xlu0 %v3129_v31 }
0x254b   :  { %v3128_v47 = vpop.xlane.xlu1 %3127 }
0x254c   :  { %v3132_v54 = vmul.f32 0.03125, %v3128_v47 }
0x254d   :  { %v3131_v42 = vpop.xlane.xlu0 %3130 }
0x254e   :  { %v3134_v48 = vadd.f32 1e-05, %v3132_v54  ;;  %v3133_v17 = vmul.f32 0.03125, %v3131_v42 }
0x2550   :  { %5645 = vrsqrt.f32 %v3134_v48  ;;  %v3135_v49 = vadd.f32 1e-05, %v3133_v17 }
0x2552   :  { %5647 = vrsqrt.f32 %v3135_v49 }
0x255a   :  { %v5646_v40 = vpop.eup %5645 }
0x255b   :  { %v3138_v55 = vmul.f32 %v5646_v40, %v3122_v18 }
0x255c   :  { %v5648_v56 = vpop.eup %5647 }
0x255d   :  { %v3144_v57 = vmul.f32 %v3143_v53, %v3138_v55  ;;  %v3139_v58 = vmul.f32 %v5648_v56, %v3123_v21 }
0x255f   :  { %v3145_v1 = vmul.f32 %v3143_v53, %v3139_v58  ;;  %v6336_v41 = vadd.f32 %v3149_v60, %v3144_v57 }
0x2561   :  { %v6338_v28 = vadd.f32 %v3149_v60, %v3145_v1 }
0x2563   :  { %v3156_v32 = vpack.c.bf16 %v6338_v28, %v6336_v41 }
0x2565   :  { %5320 = vmatmul.mubr.msk.bf16.vlgmr.msra.gmra.mrb[100].mxu1 %vm184_vm3, %v3156_v32 }
0x2566   :  { %5325 = vmatprep.mubr.msk.bf16.mxu1 %vm5748_vm2, %v5747_v35 }
0x2638   :  { %v3201_v26 = vpop.f32.mrb[100].mxu1 }
0x2639   :  { %v3202_v3 = vadd.f32 %v4728_v25, %v3201_v26  ;;  %v5321_v2 = vpop.f32.mrb[101].mxu1 }
0x263a   :  { %v3204_v59 = vpop.f32.mrb[102].mxu1 }
0x263b   :  { %v6345_v4 = vpack.c.bf16 %v3202_v3, %v3202_v3  ;;  %v3205_v5 = vadd.f32 %v4728_v25, %v3204_v59  ;;  %v5322_v6 = vpop.f32.mrb[103].mxu1 }
0x263d   :  { %3322 = vrot.lane.b32.xlu0 %v6345_v4, %s5750_s2  ;;  %3210 = vrot.lane.b32.xlu1 %v6345_v4, %s5749_s0  ;;  %v6351_v7 = vpack.c.bf16 %v3205_v5, %v3205_v5 }
0x2641   :  { %3320 = vrot.lane.b32.xlu1 %v6345_v4, %s5751_s30  ;;  %3551 = vrot.lane.b32.xlu0 %v6351_v7, %s5750_s2 }
0x2645   :  { %3439 = vrot.lane.b32.xlu1 %v6351_v7, %s5749_s0 }
0x2649   :  { %3549 = vrot.lane.b32.xlu1 %v6351_v7, %s5751_s30 }
0x26af   :  { %v3211_v52 = vpop.permute.xlu1 %3210  ;;  %v3323_v62 = vpop.permute.xlu0 %3322 }
0x26b0   :  { %v3216_v8 = vsel %vm233_vm4, %v3211_v52, 0  ;;  %v3328_v10 = vsel %vm233_vm4, %v3323_v62, 0 }
0x26b1   :  { %5324 = vmatpush3.bf16.xpose.msra.mxu1 %v3216_v8 }
0x26b2   :  { %5335 = vmatprep.subr.bf16.mxu1 %v5747_v35 }
0x26b3   :  { %v3321_v9 = vpop.permute.xlu1 %3320  ;;  %v3552_v63 = vpop.permute.xlu0 %3551 }
0x26b4   :  { %v3557_v11 = vsel %vm233_vm4, %v3552_v63, 0 }
0x26b7   :  { %v3440_v19 = vpop.permute.xlu1 %3439 }
0x26b8   :  { %5326 = vmatmul.mubr.msk.bf16.vlgmr.msra.gmra.mrb[104].mxu1 %vm233_vm4, %v6345_v4  ;;  %v3445_v45 = vsel %vm233_vm4, %v3440_v19, 0 }
0x26b9   :  { %5336 = vmatpush3.bf16.xpose.msra.mxu1 %v3328_v10  ;;  %5337 = vmatprep.mubr.msk.bf16.mxu1 %vm5748_vm2, %v5747_v35 }
0x26ba   :  { %5347 = vmatprep.subr.bf16.mxu1 %v5747_v35 }
0x26bb   :  { %v3550_v50 = vpop.permute.xlu1 %3549 }
0x26c0   :  { %5338 = vmatmul.mubr.msk.bf16.vlgmr.msra.gmra.mrb[108].mxu1 %vm233_vm4, %v3321_v9 }
0x26c1   :  { %5348 = vmatpush3.bf16.xpose.msra.mxu1 %v3445_v45  ;;  %5349 = vmatprep.mubr.msk.bf16.mxu1 %vm5748_vm2, %v5747_v35 }
0x26c2   :  { %5359 = vmatprep.subr.bf16.mxu1 %v5747_v35 }
0x26c8   :  { %5350 = vmatmul.mubr.msk.bf16.vlgmr.msra.gmra.mrb[112].mxu1 %vm233_vm4, %v6351_v7 }
0x26c9   :  { %5360 = vmatpush3.bf16.xpose.msra.mxu1 %v3557_v11  ;;  %5361 = vmatprep.mubr.msk.bf16.mxu1 %vm5748_vm2, %v5747_v35 }
0x26ca   :  { %5371 = vmatprep.subr.bf16.mxu1 %v5747_v35 }
0x26d0   :  { %5362 = vmatmul.mubr.msk.bf16.vlgmr.msra.gmra.mrb[116].mxu1 %vm233_vm4, %v3550_v50 }
0x26d1   :  { %5375 = vmatprep.mubr.msk.bf16.mxu1 %vm5748_vm2, %v5747_v35 }
0x278b   :  { %v3252_v12 = vpop.f32.mrb[104].mxu1 }
0x278c   :  { %v3258_v51 = vmul.f32 0.25, %v3252_v12  ;;  %v5327_v44 = vpop.f32.mrb[105].mxu1 }
0x278d   :  { %v3255_v13 = vpop.f32.mrb[106].mxu1 }
0x278e   :  { %v3259_v14 = vsel %vm6134_vm10, %v3258_v51, -1e+30  ;;  %v5328_v16 = vpop.f32.mrb[107].mxu1 }
0x278f   :  { %v3260_v61 = vsel %vm281_vm5, %v3259_v14, -inf }
0x2790   :  { %3261 = vmax.xlane.f32.xlu0 %v3260_v61 }
0x2793   :  { %v3364_v30 = vpop.f32.mrb[108].mxu1 }
0x2794   :  { %v3370_v0 = vmul.f32 0.25, %v3364_v30  ;;  %v5339_v18 = vpop.f32.mrb[109].mxu1 }
0x2795   :  { %v3367_v20 = vpop.f32.mrb[110].mxu1 }
0x2796   :  { %v3371_v21 = vsel %vm6134_vm10, %v3370_v0, -1e+30  ;;  %v5340_v22 = vpop.f32.mrb[111].mxu1 }
0x2797   :  { %v3372_v23 = vsel %vm281_vm5, %v3371_v21, -inf }
0x2798   :  { %3373 = vmax.xlane.f32.xlu1 %v3372_v23 }
0x279b   :  { %v3481_v24 = vpop.f32.mrb[112].mxu1 }
0x279c   :  { %v3487_v31 = vmul.f32 0.25, %v3481_v24  ;;  %v5351_v34 = vpop.f32.mrb[113].mxu1  ;;  %v3666_v24 = vld [vmem:[#allocation2 + $0x3a0] sm:$0xff] }
0x279d   :  { %v3484_v37 = vpop.f32.mrb[114].mxu1 }
0x279e   :  { %v3488_v39 = vsel %vm6134_vm10, %v3487_v31, -1e+30  ;;  %v5352_v43 = vpop.f32.mrb[115].mxu1  ;;  %v3667_v31 = vld [vmem:[#allocation2 + $0x3a8] sm:$0xff] }
0x279f   :  { %v3489_v15 = vsel %vm281_vm5, %v3488_v39, -inf  ;;  %v3671_v34 = vpack.c.bf16 %v3667_v31, %v3666_v24 }
0x27a0   :  { %3490 = vmax.xlane.f32.xlu0 %v3489_v15 }
0x27a1   :  { %5372 = vmatpush3.bf16.msra.mxu1 %v3671_v34 }
0x27a2   :  { %5373 = vmatprep.subr.bf16.mxu1 %v5747_v35 }
0x27a3   :  { %v3593_v46 = vpop.f32.mrb[116].mxu1 }
0x27a4   :  { %v3599_v47 = vmul.f32 0.25, %v3593_v46  ;;  %v5363_v54 = vpop.f32.mrb[117].mxu1 }
0x27a5   :  { %v3596_v42 = vpop.f32.mrb[118].mxu1 }
0x27a6   :  { %v3600_v48 = vsel %vm6134_vm10, %v3599_v47, -1e+30  ;;  %v5364_v17 = vpop.f32.mrb[119].mxu1 }
0x27a7   :  { %v3601_v49 = vsel %vm281_vm5, %v3600_v48, -inf  ;;  %v3669_v17 = vld [vmem:[#allocation2 + $0x3b8] sm:$0xff] }
0x27a8   :  { %3602 = vmax.xlane.f32.xlu0 %v3601_v49 }
0x281d   :  { %v3262_v38 = vpop.xlane.xlu0 %3261 }
0x281e   :  { %v3263_v53 = vsub.f32 %v3259_v14, %v3262_v38 }
0x2820   :  { %v3264_v40 = vmul.f32 1.442695, %v3263_v53 }
0x2822   :  { %5649 = vpow2.f32 %v3264_v40 }
0x2825   :  { %v3374_v55 = vpop.xlane.xlu1 %3373 }
0x2826   :  { %v3375_v56 = vsub.f32 %v3371_v21, %v3374_v55 }
0x2828   :  { %v3376_v57 = vmul.f32 1.442695, %v3375_v56 }
0x282a   :  { %5651 = vpow2.f32 %v3376_v57 }
0x282c   :  { %v5650_v58 = vpop.eup %5649 }
0x282d   :  { %v3266_v60 = vsel %vm281_vm5, %v5650_v58, 0.0  ;;  %v3491_v1 = vpop.xlane.xlu0 %3490 }
0x282e   :  { %3267 = vadd.xlane.f32.xlu1 %v3266_v60  ;;  %v3492_v5 = vsub.f32 %v3488_v39, %v3491_v1 }
0x2830   :  { %v3493_v6 = vmul.f32 1.442695, %v3492_v5 }
0x2834   :  { %v5652_v32 = vpop.eup %5651 }
0x2835   :  { %v3603_v27 = vpop.xlane.xlu0 %3602  ;;  %v3378_v25 = vsel %vm281_vm5, %v5652_v32, 0.0 }
0x2836   :  { %v3604_v26 = vsub.f32 %v3600_v48, %v3603_v27  ;;  %3379 = vadd.xlane.f32.xlu0 %v3378_v25  ;;  %v3668_v48 = vld [vmem:[#allocation2 + $0x3b0] sm:$0xff]  ;;  %v3819_v27 = vld [vmem:[#allocation2 + $0x3f8] sm:$0xff]  ;;  %v3820_v25 = vld [vmem:[#allocation2 + $0x400] sm:$0xff] }
0x2837   :  { %v3672_v49 = vpack.c.bf16 %v3669_v17, %v3668_v48  ;;  %v3823_v5 = vpack.c.bf16 %v3820_v25, %v3819_v27 }
0x2838   :  { %v3605_v3 = vmul.f32 1.442695, %v3604_v26 }
0x2839   :  { %5374 = vmatpush3.bf16.msra.mxu1 %v3672_v49 }
0x283a   :  { %5653 = vpow2.f32 %v3605_v3  ;;  %5387 = vmatprep.subr.bf16.mxu1 %v5747_v35 }
0x283b   :  { %5655 = vpow2.f32 %v3493_v6 }
0x283f   :  { %3272 = vrot.lane.b32.xlu1 %v6345_v4, %s5752_s4 }
0x2844   :  { %v5654_v2 = vpop.eup %5653 }
0x2845   :  { %v3607_v59 = vsel %vm281_vm5, %v5654_v2, 0.0  ;;  %v5656_v52 = vpop.eup %5655 }
0x2846   :  { %3608 = vadd.xlane.f32.xlu0 %v3607_v59  ;;  %v3495_v8 = vsel %vm281_vm5, %v5656_v52, 0.0 }
0x285c   :  { %3384 = vrot.lane.b32.xlu0 %v6345_v4, %s5753_s7 }
0x2863   :  { %3496 = vadd.xlane.f32.xlu1 %v3495_v8  ;;  %v3822_v8 = vld [vmem:[#allocation2 + $0x410] sm:$0xff] }
0x2874   :  { %3501 = vrot.lane.b32.xlu1 %v6351_v7, %s5752_s4 }
0x2878   :  { %3613 = vrot.lane.b32.xlu1 %v6351_v7, %s5753_s7 }
0x28bb   :  { %v3268_v62 = vpop.xlane.xlu1 %3267 }
0x28bc   :  { %5657 = vrcp.f32 %v3268_v62 }
0x28bf   :  { %v3273_v9 = vpop.permute.xlu1 %3272 }
0x28c0   :  { %v3278_v10 = vsel %vm299_vm6, %v3273_v9, 0  ;;  %v4738_v9 = vld [vmem:[#allocation2 + $0x3c0] ss:$0 sm:$0xff] }
0x28c1   :  { %5330 = vmatpush3.bf16.msra.mxu0 %v3278_v10 }
0x28c2   :  { %5341 = vmatprep.subr.bf16.mxu0 %v5747_v35 }
0x28c3   :  { %v3380_v4 = vpop.xlane.xlu0 %3379 }
0x28c4   :  { %5659 = vrcp.f32 %v3380_v4 }
0x28c6   :  { %v5658_v19 = vpop.eup %5657 }
0x28c7   :  { %v3270_v45 = vmul.f32 %v5658_v19, %v5650_v58 }
0x28c9   :  { %v3271_v63 = vpack.c.bf16 %v3270_v45, %v3270_v45 }
0x28cb   :  { %5332 = vmatmul.mubr.msk.bf16.vlgmr.msra.gmra.mrb[92].mxu0 %vm281_vm5, %v3271_v63 }
0x28cc   :  { %5343 = vmatprep.mubr.msk.bf16.mxu0 %vm5748_vm2, %v5747_v35 }
0x28ce   :  { %v5660_v11 = vpop.eup %5659 }
0x28cf   :  { %v3382_v50 = vmul.f32 %v5660_v11, %v5652_v32 }
0x28d1   :  { %v3383_v44 = vpack.c.bf16 %v3382_v50, %v3382_v50 }
0x28d3   :  { %v3609_v7 = vpop.xlane.xlu0 %3608 }
0x28d7   :  { %v3385_v12 = vpop.permute.xlu0 %3384 }
0x28d8   :  { %v3390_v51 = vsel %vm299_vm6, %v3385_v12, 0 }
0x28d9   :  { %5342 = vmatpush3.bf16.msra.mxu0 %v3390_v51 }
0x28da   :  { %5353 = vmatprep.subr.bf16.mxu0 %v5747_v35 }
0x28dc   :  { %5344 = vmatmul.mubr.msk.bf16.vlgmr.msra.gmra.mrb[96].mxu0 %vm281_vm5, %v3383_v44 }
0x28dd   :  { %5355 = vmatprep.mubr.msk.bf16.mxu0 %vm5748_vm2, %v5747_v35 }
0x28f0   :  { %v3497_v13 = vpop.xlane.xlu1 %3496 }
0x28f1   :  { %5661 = vrcp.f32 %v3497_v13  ;;  %v4742_v13 = vld [vmem:[#allocation2 + $0x418] ss:$0 sm:$0xff] }
0x28f2   :  { %5663 = vrcp.f32 %v3609_v7 }
0x28f4   :  { %v3502_v14 = vpop.permute.xlu1 %3501 }
0x28f5   :  { %v3507_v16 = vsel %vm299_vm6, %v3502_v14, 0 }
0x28f6   :  { %5354 = vmatpush3.bf16.msra.mxu0 %v3507_v16 }
0x28f7   :  { %5365 = vmatprep.subr.bf16.mxu0 %v5747_v35 }
0x28f8   :  { %v3614_v0 = vpop.permute.xlu1 %3613 }
0x28f9   :  { %v3619_v21 = vsel %vm299_vm6, %v3614_v0, 0 }
0x28fb   :  { %v5662_v61 = vpop.eup %5661 }
0x28fc   :  { %v3499_v30 = vmul.f32 %v5662_v61, %v5656_v52  ;;  %v5664_v20 = vpop.eup %5663  ;;  %v3821_v52 = vld [vmem:[#allocation2 + $0x408] sm:$0xff] }
0x28fd   :  { %v3611_v22 = vmul.f32 %v5664_v20, %v5654_v2  ;;  %v3824_v62 = vpack.c.bf16 %v3822_v8, %v3821_v52 }
0x28fe   :  { %v3500_v18 = vpack.c.bf16 %v3499_v30, %v3499_v30 }
0x28ff   :  { %v3612_v23 = vpack.c.bf16 %v3611_v22, %v3611_v22 }
0x2900   :  { %5356 = vmatmul.mubr.msk.bf16.vlgmr.msra.gmra.mrb[100].mxu0 %vm281_vm5, %v3500_v18 }
0x2901   :  { %5366 = vmatpush3.bf16.msra.mxu0 %v3619_v21  ;;  %5367 = vmatprep.mubr.msk.bf16.mxu0 %vm5748_vm2, %v5747_v35 }
0x2902   :  { %5379 = vmatprep.subr.bf16.mxu0 %v5747_v35 }
0x2908   :  { %5368 = vmatmul.mubr.msk.bf16.vlgmr.msra.gmra.mrb[104].mxu0 %vm281_vm5, %v3612_v23 }
0x2909   :  { %5383 = vmatprep.mubr.msk.bf16.mxu0 %vm5748_vm2, %v5747_v35 }
0x299e   :  { %v3314_v37 = vpop.f32.mrb[92].mxu0 }
0x299f   :  { %v5333_v39 = vpop.f32.mrb[93].mxu0 }
0x29a0   :  { %v3317_v43 = vpop.f32.mrb[94].mxu0  ;;  %v3764_v39 = vld [vmem:[#allocation2 + $0x3d8] sm:$0xff] }
0x29a1   :  { %v5334_v15 = vpop.f32.mrb[95].mxu0 }
0x29a2   :  { %v3765_v15 = vld [vmem:[#allocation2 + $0x3e0] sm:$0xff] }
0x29af   :  { %v3426_v46 = vpop.f32.mrb[96].mxu0 }
0x29b0   :  { %v5345_v47 = vpop.f32.mrb[97].mxu0 }
0x29b1   :  { %v3429_v54 = vpop.f32.mrb[98].mxu0 }
0x29b2   :  { %v5346_v42 = vpop.f32.mrb[99].mxu0 }
0x29d3   :  { %v3543_v38 = vpop.f32.mrb[100].mxu0 }
0x29d4   :  { %v5357_v53 = vpop.f32.mrb[101].mxu0 }
0x29d5   :  { %v3546_v40 = vpop.f32.mrb[102].mxu0  ;;  %v3722_v53 = vld [vmem:[#allocation2 + $0x3c8] sm:$0x3] }
0x29d6   :  { %v5358_v55 = vpop.f32.mrb[103].mxu0  ;;  %v3754_v40 = vrot.slane %v3722_v53, %v5934_v33 }
0x29db   :  { %v3655_v56 = vpop.f32.mrb[104].mxu0 }
0x29dc   :  { %v5547_v57 = vpack.i.bf16 %v3655_v56, %v3426_v46  ;;  %v5369_v58 = vpop.f32.mrb[105].mxu0  ;;  %v3766_v46 = vld [vmem:[#allocation2 + $0x3e8] sm:$0xff] }
0x29dd   :  { %v3658_v60 = vpop.f32.mrb[106].mxu0  ;;  %v3769_v47 = vpack.c.bf16 %v3766_v46, %v3765_v15 }
0x29de   :  { %5548 = vrot.lane.b32.xlu0 %v5547_v57, %s5754_s1  ;;  %v5370_v1 = vpop.f32.mrb[107].mxu0 }
0x29df   :  { %v3760_v1 = vrot.slane %v3722_v53, %v5937_v36 }
0x2a50   :  { %v5549_v32 = vpop.permute.xlu0 %5548 }
0x2a51   :  { %v5551_v26 = vunpack.i.h.bf16 %v5549_v32  ;;  %v5550_v3 = vunpack.i.l.bf16 %v5549_v32 }
0x2a53   :  { %v3665_v2 = vsel %vm233_vm4, %v3543_v38, %v5551_v26  ;;  %v3436_v59 = vsel %vm233_vm4, %v3314_v37, %v5550_v3  ;;  %v3763_v37 = vld [vmem:[#allocation2 + $0x3d0] sm:$0xff] }
0x2a54   :  { %v3670_v6 = vpack.c.bf16 %v3665_v2, %v3436_v59  ;;  %v3768_v43 = vpack.c.bf16 %v3764_v39, %v3763_v37  ;;  %v4740_v2 = vld [vmem:[#allocation2 + $0x3f0] ss:$0 sm:$0xff] }
0x2a56   :  { %5376 = vmatmul.mubr.msk.bf16.vlgmr.msra.gmra.mrb[120].mxu1 %vm184_vm3, %v3670_v6  ;;  %5380 = vmatpush3.bf16.msra.mxu0 %v3768_v43 }
0x2a57   :  { %5388 = vmatpush3.bf16.msra.mxu1 %v3823_v5  ;;  %5391 = vmatprep.mubr.msk.bf16.mxu1 %vm5748_vm2, %v5747_v35 }
0x2a58   :  { %5389 = vmatprep.subr.bf16.mxu1 %v5747_v35  ;;  %5381 = vmatprep.subr.bf16.mxu0 %v5747_v35 }
0x2a5a   :  { %5382 = vmatpush3.bf16.msra.mxu0 %v3769_v47 }
0x2a5b   :  { %5390 = vmatpush3.bf16.msra.mxu1 %v3824_v62  ;;  %5395 = vmatprep.subr.bf16.mxu0 %v5747_v35 }
0x2a5c   :  { %5401 = vmatprep.subr.bf16.mxu1 %v5747_v35 }
0x2a5e   :  { %5392 = vmatmul.mubr.msk.bf16.vlgmr.msra.gmra.mrb[124].mxu1 %vm184_vm3, %v6213_v29 }
0x2a5f   :  { %5403 = vmatprep.mubr.msk.bf16.mxu1 %vm5748_vm2, %v5747_v35 }
0x2b29   :  { %v3715_v10 = vpop.f32.mrb[120].mxu1 }
0x2b2a   :  { %v3716_v19 = vadd.f32 %v4738_v9, %v3715_v10  ;;  %v5377_v4 = vpop.f32.mrb[121].mxu1 }
0x2b2b   :  { %v3718_v45 = vpop.f32.mrb[122].mxu1 }
0x2b2c   :  { %v3723_v63 = vadd.f32 %v3716_v19, %v6336_v41  ;;  %v3719_v11 = vadd.f32 %v4738_v9, %v3718_v45  ;;  %v5378_v7 = vpop.f32.mrb[123].mxu1 }
0x2b2e   :  { %v3724_v50 = vadd.f32 %v3719_v11, %v6338_v28  ;;  %v3725_v12 = vsel %vm184_vm3, %v3723_v63, 0.0 }
0x2b2f   :  { %3726 = vadd.xlane.f32.xlu1 %v3725_v12 }
0x2b30   :  { %v3728_v51 = vsel %vm184_vm3, %v3724_v50, 0.0 }
0x2b31   :  { %3729 = vadd.xlane.f32.xlu0 %v3728_v51  ;;  %v3864_v29 = vpop.f32.mrb[124].mxu1 }
0x2b32   :  { %v5393_v44 = vpop.f32.mrb[125].mxu1  ;;  %v3865_v31 = vadd.f32 %v4742_v13, %v3864_v29 }
0x2b33   :  { %v3867_v14 = vpop.f32.mrb[126].mxu1 }
0x2b34   :  { %v6445_v16 = vadd.f32 %v4742_v13, %v3867_v14  ;;  %v5394_v61 = vpop.f32.mrb[127].mxu1  ;;  %v6449_v34 = vpack.c.bf16 %v3865_v31, %v3865_v31 }
0x2b36   :  { %v3877_v3 = vsel %vm233_vm4, %v6449_v34, 0  ;;  %v6476_v45 = vpack.c.bf16 %v6445_v16, %v6445_v16 }
0x2b38   :  { %v4104_v11 = vsel %vm233_vm4, %v6476_v45, 0 }
0x2bbc   :  { %v3727_v30 = vpop.xlane.xlu1 %3726 }
0x2bbd   :  { %v3731_v0 = vmul.f32 0.03125, %v3727_v30 }
0x2bbe   :  { %v3730_v41 = vpop.xlane.xlu0 %3729 }
0x2bbf   :  { %v3733_v18 = vsub.f32 %v3723_v63, %v3731_v0  ;;  %v3732_v20 = vmul.f32 0.03125, %v3730_v41 }
0x2bc1   :  { %v3734_v21 = vsub.f32 %v3724_v50, %v3732_v20  ;;  %v3735_v28 = vmul.f32 %v3733_v18, %v3733_v18 }
0x2bc3   :  { %v3737_v22 = vsel %vm184_vm3, %v3735_v28, 0.0  ;;  %v3736_v23 = vmul.f32 %v3734_v21, %v3734_v21 }
0x2bc4   :  { %3738 = vadd.xlane.f32.xlu0 %v3737_v22 }
0x2bc5   :  { %v3740_v24 = vsel %vm184_vm3, %v3736_v23, 0.0 }
0x2bc6   :  { %3741 = vadd.xlane.f32.xlu1 %v3740_v24 }
0x2bda   :  { %3984 = vrot.lane.b32.xlu0 %v6449_v34, %s5751_s30 }
0x2c51   :  { %v3739_v54 = vpop.xlane.xlu0 %3738 }
0x2c52   :  { %v3743_v42 = vmul.f32 0.03125, %v3739_v54 }
0x2c53   :  { %v3742_v48 = vpop.xlane.xlu1 %3741 }
0x2c54   :  { %v3745_v17 = vadd.f32 1e-05, %v3743_v42  ;;  %v3744_v49 = vmul.f32 0.03125, %v3742_v48 }
0x2c55   :  { %v3985_v52 = vpop.permute.xlu0 %3984 }
0x2c56   :  { %5665 = vrsqrt.f32 %v3745_v17  ;;  %v3746_v38 = vadd.f32 1e-05, %v3744_v49  ;;  %v3990_v19 = vsel %vm233_vm4, %v3985_v52, 0 }
0x2c58   :  { %5667 = vrsqrt.f32 %v3746_v38 }
0x2c60   :  { %v5666_v55 = vpop.eup %5665 }
0x2c61   :  { %v3749_v56 = vmul.f32 %v5666_v55, %v3733_v18 }
0x2c62   :  { %v5668_v57 = vpop.eup %5667 }
0x2c63   :  { %v3755_v58 = vmul.f32 %v3754_v40, %v3749_v56  ;;  %v3750_v60 = vmul.f32 %v5668_v57, %v3734_v21 }
0x2c65   :  { %v3756_v32 = vmul.f32 %v3754_v40, %v3750_v60  ;;  %v6457_v27 = vadd.f32 %v3760_v1, %v3755_v58 }
0x2c67   :  { %v6459_v25 = vadd.f32 %v3760_v1, %v3756_v32 }
0x2c69   :  { %v3767_v26 = vpack.c.bf16 %v6459_v25, %v6457_v27 }
0x2c6b   :  { %5384 = vmatmul.mubr.msk.bf16.vlgmr.msra.gmra.mrb[108].mxu0 %vm184_vm3, %v3767_v26 }
0x2c6c   :  { %5396 = vmatpush3.bf16.xpose.msra.mxu0 %v3877_v3  ;;  %5397 = vmatprep.mubr.msk.bf16.mxu0 %vm5748_vm2, %v5747_v35 }
0x2c6d   :  { %5407 = vmatprep.subr.bf16.mxu0 %v5747_v35 }
0x2d3e   :  { %v3812_v59 = vpop.f32.mrb[108].mxu0 }
0x2d3f   :  { %v3813_v5 = vadd.f32 %v4740_v2, %v3812_v59  ;;  %v5385_v6 = vpop.f32.mrb[109].mxu0 }
0x2d40   :  { %v3815_v8 = vpop.f32.mrb[110].mxu0 }
0x2d41   :  { %v3871_v62 = vpack.c.bf16 %v3813_v5, %v3813_v5  ;;  %v3816_v9 = vadd.f32 %v4740_v2, %v3815_v8  ;;  %v5386_v10 = vpop.f32.mrb[111].mxu0 }
0x2d43   :  { %v4098_v4 = vpack.c.bf16 %v3816_v9, %v3816_v9  ;;  %3982 = vrot.lane.b32.xlu1 %v3871_v62, %s5751_s30  ;;  %5398 = vmatmul.mubr.msk.bf16.vlgmr.msra.gmra.mrb[112].mxu0 %vm233_vm4, %v3871_v62 }
0x2d44   :  { %5408 = vmatpush3.bf16.xpose.msra.mxu0 %v3990_v19  ;;  %5409 = vmatprep.mubr.msk.bf16.mxu0 %vm5748_vm2, %v5747_v35 }
0x2d45   :  { %4209 = vrot.lane.b32.xlu0 %v4098_v4, %s5751_s30  ;;  %5419 = vmatprep.subr.bf16.mxu0 %v5747_v35 }
0x2d47   :  { %4211 = vrot.lane.b32.xlu1 %v6476_v45, %s5751_s30 }
0x2db5   :  { %v3983_v63 = vpop.permute.xlu1 %3982 }
0x2db6   :  { %5410 = vmatmul.mubr.msk.bf16.vlgmr.msra.gmra.mrb[116].mxu0 %vm233_vm4, %v3983_v63 }
0x2db7   :  { %5420 = vmatpush3.bf16.xpose.msra.mxu0 %v4104_v11  ;;  %5421 = vmatprep.mubr.msk.bf16.mxu0 %vm5748_vm2, %v5747_v35  ;;  %v4210_v12 = vpop.permute.xlu0 %4209 }
0x2db8   :  { %5431 = vmatprep.subr.bf16.mxu0 %v5747_v35 }
0x2db9   :  { %v4212_v7 = vpop.permute.xlu1 %4211 }
0x2dba   :  { %v4217_v50 = vsel %vm233_vm4, %v4212_v7, 0 }
0x2dbe   :  { %5422 = vmatmul.mubr.msk.bf16.vlgmr.msra.gmra.mrb[120].mxu0 %vm233_vm4, %v4098_v4 }
0x2dbf   :  { %5432 = vmatpush3.bf16.xpose.msra.mxu0 %v4217_v50  ;;  %5433 = vmatprep.mubr.msk.bf16.mxu0 %vm5748_vm2, %v5747_v35 }
0x2dc0   :  { %5443 = vmatprep.subr.bf16.mxu0 %v5747_v35 }
0x2dc6   :  { %5434 = vmatmul.mubr.msk.bf16.vlgmr.msra.gmra.mrb[124].mxu0 %vm233_vm4, %v4210_v12 }
0x2dc7   :  { %5447 = vmatprep.mubr.msk.bf16.mxu0 %vm5748_vm2, %v5747_v35 }
0x2e16   :  { %v3913_v51 = vpop.f32.mrb[112].mxu0 }
0x2e17   :  { %v3919_v29 = vmul.f32 0.25, %v3913_v51  ;;  %v5399_v44 = vpop.f32.mrb[113].mxu0 }
0x2e18   :  { %v3916_v13 = vpop.f32.mrb[114].mxu0 }
0x2e19   :  { %v5400_v14 = vpop.f32.mrb[115].mxu0  ;;  %v3920_v16 = vsel %vm281_vm5, %v3919_v29, -inf }
0x2e1a   :  { %3921 = vmax.xlane.f32.xlu1 %v3920_v16 }
0x2e89   :  { %v4026_v61 = vpop.f32.mrb[116].mxu0 }
0x2e8a   :  { %v4032_v30 = vmul.f32 0.25, %v4026_v61  ;;  %v5411_v0 = vpop.f32.mrb[117].mxu0 }
0x2e8b   :  { %v4029_v41 = vpop.f32.mrb[118].mxu0 }
0x2e8c   :  { %v5412_v18 = vpop.f32.mrb[119].mxu0  ;;  %v4033_v20 = vsel %vm281_vm5, %v4032_v30, -inf  ;;  %v4325_v41 = vld [vmem:[#allocation2 + $0x420] sm:$0xff] }
0x2e8d   :  { %4034 = vmax.xlane.f32.xlu0 %v4033_v20  ;;  %v4326_v18 = vld [vmem:[#allocation2 + $0x428] sm:$0xff] }
0x2e8e   :  { %v4330_v20 = vpack.c.bf16 %v4326_v18, %v4325_v41 }
0x2e90   :  { %5444 = vmatpush3.bf16.msra.mxu0 %v4330_v20 }
0x2e91   :  { %v4140_v21 = vpop.f32.mrb[120].mxu0  ;;  %5445 = vmatprep.subr.bf16.mxu0 %v5747_v35 }
0x2e92   :  { %v4146_v28 = vmul.f32 0.25, %v4140_v21  ;;  %v5423_v22 = vpop.f32.mrb[121].mxu0 }
0x2e93   :  { %v4143_v23 = vpop.f32.mrb[122].mxu0 }
0x2e94   :  { %v5424_v24 = vpop.f32.mrb[123].mxu0  ;;  %v4147_v31 = vsel %vm281_vm5, %v4146_v28, -inf }
0x2e95   :  { %4148 = vmax.xlane.f32.xlu0 %v4147_v31 }
0x2e99   :  { %v4253_v37 = vpop.f32.mrb[124].mxu0 }
0x2e9a   :  { %v4259_v39 = vmul.f32 0.25, %v4253_v37  ;;  %v5435_v43 = vpop.f32.mrb[125].mxu0 }
0x2e9b   :  { %v4256_v15 = vpop.f32.mrb[126].mxu0  ;;  %v4327_v43 = vld [vmem:[#allocation2 + $0x430] sm:$0xff] }
0x2e9c   :  { %v5436_v46 = vpop.f32.mrb[127].mxu0  ;;  %v4260_v47 = vsel %vm281_vm5, %v4259_v39, -inf  ;;  %v4328_v15 = vld [vmem:[#allocation2 + $0x438] sm:$0xff] }
0x2e9d   :  { %4261 = vmax.xlane.f32.xlu1 %v4260_v47  ;;  %v4331_v46 = vpack.c.bf16 %v4328_v15, %v4327_v43 }
0x2e9f   :  { %5446 = vmatpush3.bf16.msra.mxu0 %v4331_v46 }
0x2ea0   :  { %5459 = vmatprep.subr.bf16.mxu0 %v5747_v35 }
0x2ea7   :  { %v3922_v54 = vpop.xlane.xlu1 %3921 }
0x2ea8   :  { %v3923_v42 = vsub.f32 %v3919_v29, %v3922_v54 }
0x2eaa   :  { %v3924_v48 = vmul.f32 1.442695, %v3923_v42 }
0x2eac   :  { %5669 = vpow2.f32 %v3924_v48 }
0x2eb6   :  { %v5670_v17 = vpop.eup %5669 }
0x2eb7   :  { %v3926_v49 = vsel %vm281_vm5, %v5670_v17, 0.0 }
0x2eb8   :  { %3927 = vadd.xlane.f32.xlu0 %v3926_v49 }
0x2f1a   :  { %v4035_v38 = vpop.xlane.xlu0 %4034 }
0x2f1b   :  { %v4036_v53 = vsub.f32 %v4032_v30, %v4035_v38 }
0x2f1d   :  { %v4037_v40 = vmul.f32 1.442695, %v4036_v53 }
0x2f1f   :  { %5671 = vpow2.f32 %v4037_v40 }
0x2f22   :  { %v4149_v55 = vpop.xlane.xlu0 %4148 }
0x2f23   :  { %v4150_v56 = vsub.f32 %v4146_v28, %v4149_v55 }
0x2f25   :  { %v4151_v57 = vmul.f32 1.442695, %v4150_v56 }
0x2f27   :  { %5673 = vpow2.f32 %v4151_v57 }
0x2f29   :  { %v5672_v58 = vpop.eup %5671 }
0x2f2a   :  { %v4039_v60 = vsel %vm281_vm5, %v5672_v58, 0.0  ;;  %v4262_v26 = vpop.xlane.xlu1 %4261 }
0x2f2b   :  { %4040 = vadd.xlane.f32.xlu1 %v4039_v60  ;;  %v4263_v3 = vsub.f32 %v4259_v39, %v4262_v26 }
0x2f2d   :  { %v4264_v2 = vmul.f32 1.442695, %v4263_v3 }
0x2f2f   :  { %5675 = vpow2.f32 %v4264_v2 }
0x2f31   :  { %v5674_v1 = vpop.eup %5673 }
0x2f32   :  { %v4153_v32 = vsel %vm281_vm5, %v5674_v1, 0.0 }
0x2f33   :  { %4154 = vadd.xlane.f32.xlu0 %v4153_v32  ;;  %v4752_v32 = vld [vmem:[#allocation2 + $0x440] ss:$0 sm:$0xff] }
0x2f39   :  { %v5676_v59 = vpop.eup %5675 }
0x2f3a   :  { %v4266_v5 = vsel %vm281_vm5, %v5676_v59, 0.0 }
0x2f3c   :  { %4045 = vrot.lane.b32.xlu1 %v6449_v34, %s5750_s2 }
0x2f45   :  { %v3928_v6 = vpop.xlane.xlu0 %3927 }
0x2f46   :  { %5677 = vrcp.f32 %v3928_v6 }
0x2f49   :  { %3933 = vrot.lane.b32.xlu0 %v6449_v34, %s5749_s0 }
0x2f4d   :  { %4272 = vrot.lane.b32.xlu0 %v6476_v45, %s5750_s2 }
0x2f50   :  { %v5678_v8 = vpop.eup %5677 }
0x2f51   :  { %v3930_v34 = vmul.f32 %v5678_v8, %v5670_v17 }
0x2f53   :  { %v3931_v4 = vpack.c.bf16 %v3930_v34, %v3930_v34 }
0x2f60   :  { %4267 = vadd.xlane.f32.xlu1 %v4266_v5 }
0x2f71   :  { %4160 = vrot.lane.b32.xlu1 %v6476_v45, %s5749_s0 }
0x2fb8   :  { %v4041_v52 = vpop.xlane.xlu1 %4040 }
0x2fb9   :  { %5679 = vrcp.f32 %v4041_v52 }
0x2fbc   :  { %v4046_v19 = vpop.permute.xlu1 %4045 }
0x2fbd   :  { %v4051_v11 = vsel %vm299_vm6, %v4046_v19, 0 }
0x2fc0   :  { %v4155_v62 = vpop.xlane.xlu0 %4154 }
0x2fc1   :  { %5681 = vrcp.f32 %v4155_v62 }
0x2fc3   :  { %v5680_v63 = vpop.eup %5679 }
0x2fc4   :  { %v3934_v9 = vpop.permute.xlu0 %3933  ;;  %v4043_v45 = vmul.f32 %v5680_v63, %v5672_v58 }
0x2fc5   :  { %v3939_v10 = vsel %vm299_vm6, %v3934_v9, 0 }
0x2fc6   :  { %5402 = vmatpush3.bf16.msra.mxu1 %v3939_v10  ;;  %v4044_v7 = vpack.c.bf16 %v4043_v45, %v4043_v45 }
0x2fc7   :  { %5413 = vmatprep.subr.bf16.mxu1 %v5747_v35 }
0x2fc8   :  { %v4273_v13 = vpop.permute.xlu0 %4272 }
0x2fc9   :  { %5404 = vmatmul.mubr.msk.bf16.vlgmr.msra.gmra.mrb[128].mxu1 %vm281_vm5, %v3931_v4  ;;  %v4278_v16 = vsel %vm299_vm6, %v4273_v13, 0 }
0x2fca   :  { %5414 = vmatpush3.bf16.msra.mxu1 %v4051_v11  ;;  %5415 = vmatprep.mubr.msk.bf16.mxu1 %vm5748_vm2, %v5747_v35 }
0x2fcb   :  { %5425 = vmatprep.subr.bf16.mxu1 %v5747_v35  ;;  %v5682_v50 = vpop.eup %5681 }
0x2fcc   :  { %v4157_v51 = vmul.f32 %v5682_v50, %v5674_v1 }
0x2fce   :  { %v4158_v14 = vpack.c.bf16 %v4157_v51, %v4157_v51 }
0x2fd1   :  { %5416 = vmatmul.mubr.msk.bf16.vlgmr.msra.gmra.mrb[132].mxu1 %vm281_vm5, %v4044_v7 }
0x2fd2   :  { %5427 = vmatprep.mubr.msk.bf16.mxu1 %vm5748_vm2, %v5747_v35 }
0x2fed   :  { %v4268_v12 = vpop.xlane.xlu1 %4267 }
0x2fee   :  { %5683 = vrcp.f32 %v4268_v12  ;;  %v4423_v12 = vld [vmem:[#allocation2 + $0x458] sm:$0xff] }
0x2ff1   :  { %v4161_v29 = vpop.permute.xlu1 %4160 }
0x2ff2   :  { %v4166_v44 = vsel %vm299_vm6, %v4161_v29, 0  ;;  %v4424_v29 = vld [vmem:[#allocation2 + $0x460] sm:$0xff] }
0x2ff3   :  { %5426 = vmatpush3.bf16.msra.mxu1 %v4166_v44  ;;  %v4425_v44 = vld [vmem:[#allocation2 + $0x468] sm:$0xff] }
0x2ff4   :  { %5437 = vmatprep.subr.bf16.mxu1 %v5747_v35  ;;  %v4428_v13 = vpack.c.bf16 %v4425_v44, %v4424_v29 }
0x2ff6   :  { %5428 = vmatmul.mubr.msk.bf16.vlgmr.msra.gmra.mrb[136].mxu1 %vm281_vm5, %v4158_v14  ;;  %v4480_v14 = vld [vmem:[#allocation2 + $0x478] sm:$0xff] }
0x2ff7   :  { %5438 = vmatpush3.bf16.msra.mxu1 %v4278_v16  ;;  %5439 = vmatprep.mubr.msk.bf16.mxu1 %vm5748_vm2, %v5747_v35  ;;  %v4481_v16 = vld [vmem:[#allocation2 + $0x480] sm:$0xff] }
0x2ff8   :  { %v5684_v61 = vpop.eup %5683  ;;  %5451 = vmatprep.subr.bf16.mxu1 %v5747_v35 }
0x2ff9   :  { %v4270_v30 = vmul.f32 %v5684_v61, %v5676_v59  ;;  %v4482_v61 = vld [vmem:[#allocation2 + $0x488] sm:$0xff] }
0x2ffb   :  { %v4271_v0 = vpack.c.bf16 %v4270_v30, %v4270_v30  ;;  %v4489_v30 = vpack.c.bf16 %v4481_v16, %v4480_v14  ;;  %v4583_v14 = vld [vmem:[#allocation2 + $0x4c8] sm:$0xff]  ;;  %v4584_v16 = vld [vmem:[#allocation2 + $0x4d0] sm:$0xff] }
0x2ffe   :  { %5440 = vmatmul.mubr.msk.bf16.vlgmr.msra.gmra.mrb[140].mxu1 %vm281_vm5, %v4271_v0  ;;  %v4483_v0 = vld [vmem:[#allocation2 + $0x490] sm:$0xff] }
0x2fff   :  { %5455 = vmatprep.mubr.msk.bf16.mxu1 %vm5748_vm2, %v5747_v35  ;;  %v4490_v41 = vpack.c.bf16 %v4483_v0, %v4482_v61  ;;  %v4588_v61 = vpack.c.bf16 %v4584_v16, %v4583_v14  ;;  %v4586_v0 = vld [vmem:[#allocation2 + $0x4e0] sm:$0xff] }
0x309c   :  { %v3975_v21 = vpop.f32.mrb[128].mxu1 }
0x309d   :  { %v5405_v28 = vpop.f32.mrb[129].mxu1 }
0x309e   :  { %v3978_v22 = vpop.f32.mrb[130].mxu1 }
0x309f   :  { %v5406_v23 = vpop.f32.mrb[131].mxu1 }
0x30a4   :  { %v4087_v24 = vpop.f32.mrb[132].mxu1 }
0x30a5   :  { %v5417_v31 = vpop.f32.mrb[133].mxu1 }
0x30a6   :  { %v4090_v37 = vpop.f32.mrb[134].mxu1 }
0x30a7   :  { %v5418_v39 = vpop.f32.mrb[135].mxu1 }
0x30c9   :  { %v4202_v47 = vpop.f32.mrb[136].mxu1 }
0x30ca   :  { %v5429_v54 = vpop.f32.mrb[137].mxu1 }
0x30cb   :  { %v4205_v42 = vpop.f32.mrb[138].mxu1 }
0x30cc   :  { %v5430_v48 = vpop.f32.mrb[139].mxu1 }
0x30d1   :  { %v4314_v17 = vpop.f32.mrb[140].mxu1 }
0x30d2   :  { %v5552_v49 = vpack.i.bf16 %v4314_v17, %v4087_v24  ;;  %v5441_v38 = vpop.f32.mrb[141].mxu1  ;;  %v4381_v24 = vld [vmem:[#allocation2 + $0x448] sm:$0x3] }
0x30d3   :  { %v4317_v53 = vpop.f32.mrb[142].mxu1  ;;  %v4413_v37 = vrot.slane %v4381_v24, %v5934_v33  ;;  %v4485_v38 = vld [vmem:[#allocation2 + $0x4a0] sm:$0xff] }
0x30d4   :  { %5553 = vrot.lane.b32.xlu1 %v5552_v49, %s5754_s1  ;;  %v5442_v40 = vpop.f32.mrb[143].mxu1  ;;  %v4484_v49 = vld [vmem:[#allocation2 + $0x498] sm:$0xff] }
0x30d5   :  { %v4491_v53 = vpack.c.bf16 %v4485_v38, %v4484_v49  ;;  %v4486_v40 = vld [vmem:[#allocation2 + $0x4a8] sm:$0xff] }
0x3146   :  { %v5554_v55 = vpop.permute.xlu1 %5553 }
0x3147   :  { %v5556_v56 = vunpack.i.h.bf16 %v5554_v55  ;;  %v5555_v57 = vunpack.i.l.bf16 %v5554_v55  ;;  %v4487_v55 = vld [vmem:[#allocation2 + $0x4b0] sm:$0xff] }
0x3149   :  { %v4324_v58 = vsel %vm233_vm4, %v4202_v47, %v5556_v56  ;;  %v4097_v60 = vsel %vm233_vm4, %v3975_v21, %v5555_v57  ;;  %v4419_v47 = vrot.slane %v4381_v24, %v5937_v36  ;;  %v4492_v56 = vpack.c.bf16 %v4487_v55, %v4486_v40  ;;  %v4754_v57 = vld [vmem:[#allocation2 + $0x470] ss:$0 sm:$0xff]  ;;  %v4542_v24 = vld [vmem:[#allocation2 + $0x4c0] sm:$0x3] }
0x314a   :  { %v4329_v1 = vpack.c.bf16 %v4324_v58, %v4097_v60 }
0x314c   :  { %5448 = vmatmul.mubr.msk.bf16.vlgmr.msra.gmra.mrb[128].mxu0 %vm184_vm3, %v4329_v1 }
0x314d   :  { %5467 = vmatprep.mubr.msk.bf16.mxu0 %vm5748_vm2, %v5747_v35  ;;  %5460 = vmatpush3.bf16.msra.mxu0 %v4489_v30  ;;  %v4585_v30 = vld [vmem:[#allocation2 + $0x4d8] sm:$0xff] }
0x314e   :  { %5461 = vmatprep.subr.bf16.mxu0 %v5747_v35 }
0x3151   :  { %5462 = vmatpush3.bf16.msra.mxu0 %v4490_v41  ;;  %v4589_v41 = vpack.c.bf16 %v4586_v0, %v4585_v30 }
0x3152   :  { %5463 = vmatprep.subr.bf16.mxu0 %v5747_v35 }
0x3155   :  { %5464 = vmatpush3.bf16.msra.mxu0 %v4491_v53 }
0x3156   :  { %5465 = vmatprep.subr.bf16.mxu0 %v5747_v35 }
0x3159   :  { %5466 = vmatpush3.bf16.msra.mxu0 %v4492_v56 }
0x321f   :  { %v4374_v26 = vpop.f32.mrb[128].mxu0 }
0x3220   :  { %v4375_v3 = vadd.f32 %v4752_v32, %v4374_v26  ;;  %v5449_v2 = vpop.f32.mrb[129].mxu0 }
0x3221   :  { %v4377_v59 = vpop.f32.mrb[130].mxu0 }
0x3222   :  { %v4382_v5 = vadd.f32 %v4375_v3, %v6457_v27  ;;  %v4378_v6 = vadd.f32 %v4752_v32, %v4377_v59  ;;  %v5450_v52 = vpop.f32.mrb[131].mxu0 }
0x3224   :  { %v4383_v8 = vadd.f32 %v4378_v6, %v6459_v25  ;;  %v4384_v62 = vsel %vm184_vm3, %v4382_v5, 0.0  ;;  %v4422_v25 = vld [vmem:[#allocation2 + $0x450] sm:$0xff]  ;;  %v4756_v6 = vld [vmem:[#allocation2 + $0x4b8] ss:$0 sm:$0xff] }
0x3225   :  { %4385 = vadd.xlane.f32.xlu0 %v4384_v62  ;;  %v4427_v51 = vpack.c.bf16 %v4423_v12, %v4422_v25 }
0x3226   :  { %v4387_v34 = vsel %vm184_vm3, %v4383_v8, 0.0 }
0x3227   :  { %4388 = vadd.xlane.f32.xlu1 %v4387_v34  ;;  %5452 = vmatpush3.bf16.msra.mxu1 %v4427_v51 }
0x3228   :  { %5453 = vmatprep.subr.bf16.mxu1 %v5747_v35 }
0x322b   :  { %5454 = vmatpush3.bf16.msra.mxu1 %v4428_v13 }
0x322c   :  { %5471 = vmatprep.subr.bf16.mxu1 %v5747_v35 }
0x32b2   :  { %v4386_v9 = vpop.xlane.xlu0 %4385 }
0x32b3   :  { %v4390_v10 = vmul.f32 0.03125, %v4386_v9 }
0x32b4   :  { %v4389_v19 = vpop.xlane.xlu1 %4388 }
0x32b5   :  { %v4392_v4 = vsub.f32 %v4382_v5, %v4390_v10  ;;  %v4391_v63 = vmul.f32 0.03125, %v4389_v19 }
0x32b7   :  { %v4393_v11 = vsub.f32 %v4383_v8, %v4391_v63  ;;  %v4394_v45 = vmul.f32 %v4392_v4, %v4392_v4 }
0x32b9   :  { %v4396_v7 = vsel %vm184_vm3, %v4394_v45, 0.0  ;;  %v4395_v27 = vmul.f32 %v4393_v11, %v4393_v11 }
0x32ba   :  { %4397 = vadd.xlane.f32.xlu0 %v4396_v7 }
0x32bb   :  { %v4399_v50 = vsel %vm184_vm3, %v4395_v27, 0.0 }
0x32be   :  { %4400 = vadd.xlane.f32.xlu0 %v4399_v50 }
0x3347   :  { %v4398_v18 = vpop.xlane.xlu0 %4397 }
0x3348   :  { %v4402_v20 = vmul.f32 0.03125, %v4398_v18 }
0x334a   :  { %v4404_v21 = vadd.f32 1e-05, %v4402_v20 }
0x334b   :  { %v4401_v28 = vpop.xlane.xlu0 %4400 }
0x334c   :  { %5685 = vrsqrt.f32 %v4404_v21  ;;  %v4403_v22 = vmul.f32 0.03125, %v4401_v28 }
0x334e   :  { %v4405_v23 = vadd.f32 1e-05, %v4403_v22 }
0x3350   :  { %5687 = vrsqrt.f32 %v4405_v23 }
0x3356   :  { %v5686_v31 = vpop.eup %5685 }
0x3357   :  { %v4408_v39 = vmul.f32 %v5686_v31, %v4392_v4  ;;  %v4574_v31 = vrot.slane %v4542_v24, %v5934_v33 }
0x3359   :  { %v4414_v15 = vmul.f32 %v4413_v37, %v4408_v39 }
0x335a   :  { %v5688_v43 = vpop.eup %5687 }
0x335b   :  { %v4409_v46 = vmul.f32 %v5688_v43, %v4393_v11  ;;  %v4420_v42 = vadd.f32 %v4419_v47, %v4414_v15 }
0x335d   :  { %v4415_v54 = vmul.f32 %v4413_v37, %v4409_v46 }
0x335f   :  { %v4421_v48 = vadd.f32 %v4419_v47, %v4415_v54 }
0x3361   :  { %v4426_v17 = vpack.c.bf16 %v4421_v48, %v4420_v42 }
0x3363   :  { %5456 = vmatmul.mubr.msk.bf16.vlgmr.msra.gmra.mrb[144].mxu1 %vm184_vm3, %v4426_v17  ;;  %v4758_v17 = vld [vmem:[#allocation2 + $0x4e8] ss:$0 sm:$0xff] }
0x3364   :  { %5475 = vmatprep.mubr.msk.bf16.mxu1 %vm5748_vm2, %v5747_v35  ;;  %5472 = vmatpush3.bf16.msra.mxu1 %v4588_v61 }
0x3365   :  { %5473 = vmatprep.subr.bf16.mxu1 %v5747_v35  ;;  %v4580_v35 = vrot.slane %v4542_v24, %v5937_v36 }
0x3368   :  { %5474 = vmatpush3.bf16.msra.mxu1 %v4589_v41 }
0x3436   :  { %v4471_v58 = vpop.f32.mrb[144].mxu1 }
0x3437   :  { %v4472_v60 = vadd.f32 %v4754_v57, %v4471_v58  ;;  %v5457_v1 = vpop.f32.mrb[145].mxu1 }
0x3438   :  { %v4474_v32 = vpop.f32.mrb[146].mxu1 }
0x3439   :  { %v4475_v26 = vadd.f32 %v4754_v57, %v4474_v32  ;;  %v5458_v3 = vpop.f32.mrb[147].mxu1  ;;  %v4478_v2 = vmax.f32 %v4472_v60, 0.0 }
0x343b   :  { %v4479_v59 = vmax.f32 %v4475_v26, 0.0 }
0x343d   :  { %v4488_v5 = vpack.c.bf16 %v4479_v59, %v4478_v2 }
0x343f   :  { %5468 = vmatmul.mubr.msk.bf16.vlgmr.msra.gmra.mrb[132].mxu0 %vm860_vm9, %v4488_v5 }
0x3512   :  { %v4535_v52 = vpop.f32.mrb[132].mxu0 }
0x3513   :  { %v4536_v8 = vadd.f32 %v4756_v6, %v4535_v52  ;;  %v5469_v62 = vpop.f32.mrb[133].mxu0 }
0x3514   :  { %v4538_v34 = vpop.f32.mrb[134].mxu0 }
0x3515   :  { %v4543_v9 = vadd.f32 %v4536_v8, %v4420_v42  ;;  %v4539_v10 = vadd.f32 %v4756_v6, %v4538_v34  ;;  %v5470_v19 = vpop.f32.mrb[135].mxu0 }
0x3517   :  { %v4544_v4 = vadd.f32 %v4539_v10, %v4421_v48  ;;  %v4545_v63 = vsel %vm184_vm3, %v4543_v9, 0.0 }
0x3518   :  { %4546 = vadd.xlane.f32.xlu1 %v4545_v63 }
0x3519   :  { %v4548_v11 = vsel %vm184_vm3, %v4544_v4, 0.0 }
0x351a   :  { %4549 = vadd.xlane.f32.xlu0 %v4548_v11 }
0x35a5   :  { %v4547_v45 = vpop.xlane.xlu1 %4546 }
0x35a6   :  { %v4551_v7 = vmul.f32 0.03125, %v4547_v45 }
0x35a7   :  { %v4550_v27 = vpop.xlane.xlu0 %4549 }
0x35a8   :  { %v4553_v50 = vsub.f32 %v4543_v9, %v4551_v7  ;;  %v4552_v25 = vmul.f32 0.03125, %v4550_v27 }
0x35aa   :  { %v4554_v12 = vsub.f32 %v4544_v4, %v4552_v25  ;;  %v4555_v51 = vmul.f32 %v4553_v50, %v4553_v50 }
0x35ac   :  { %v4557_v29 = vsel %vm184_vm3, %v4555_v51, 0.0  ;;  %v4556_v44 = vmul.f32 %v4554_v12, %v4554_v12 }
0x35ad   :  { %4558 = vadd.xlane.f32.xlu1 %v4557_v29 }
0x35ae   :  { %v4560_v13 = vsel %vm184_vm3, %v4556_v44, 0.0 }
0x35af   :  { %4561 = vadd.xlane.f32.xlu0 %v4560_v13 }
0x363a   :  { %v4559_v18 = vpop.xlane.xlu1 %4558 }
0x363b   :  { %v4563_v20 = vmul.f32 0.03125, %v4559_v18 }
0x363c   :  { %v4562_v21 = vpop.xlane.xlu0 %4561 }
0x363d   :  { %v4565_v28 = vadd.f32 1e-05, %v4563_v20  ;;  %v4564_v22 = vmul.f32 0.03125, %v4562_v21 }
0x363f   :  { %5689 = vrsqrt.f32 %v4565_v28  ;;  %v4566_v23 = vadd.f32 1e-05, %v4564_v22 }
0x3641   :  { %5691 = vrsqrt.f32 %v4566_v23 }
0x3649   :  { %v5690_v37 = vpop.eup %5689 }
0x364a   :  { %v4569_v39 = vmul.f32 %v5690_v37, %v4553_v50 }
0x364b   :  { %v5692_v43 = vpop.eup %5691 }
0x364c   :  { %v4575_v15 = vmul.f32 %v4574_v31, %v4569_v39  ;;  %v4570_v46 = vmul.f32 %v5692_v43, %v4554_v12 }
0x364e   :  { %v4576_v47 = vmul.f32 %v4574_v31, %v4570_v46  ;;  %v4581_v54 = vadd.f32 %v4580_v35, %v4575_v15 }
0x3650   :  { %v4582_v42 = vadd.f32 %v4580_v35, %v4576_v47 }
0x3652   :  { %v4587_v48 = vpack.c.bf16 %v4582_v42, %v4581_v54 }
0x3654   :  { %5476 = vmatmul.mubr.msk.bf16.vlgmr.msra.gmra.mrb[148].mxu1 %vm184_vm3, %v4587_v48 }
0x3727   :  { %v4632_v49 = vpop.f32.mrb[148].mxu1 }
0x3728   :  { %v4633_v38 = vadd.f32 %v4758_v17, %v4632_v49  ;;  %v5477_v53 = vpop.f32.mrb[149].mxu1 }
0x3729   :  { %v4635_v33 = vpop.f32.mrb[150].mxu1 }
0x372a   :  { %4639 = vst.msk [vmem:[#allocation5] sm:$0xff] %vm860_vm9, %v4633_v38  ;;  %v4636_v40 = vadd.f32 %v4758_v17, %v4635_v33  ;;  %v5478_v55 = vpop.f32.mrb[151].mxu1 }
0x372c   :  { %4640 = vst.msk [vmem:[#allocation5 + $0x8] sm:$0xff] %vm860_vm9, %v4636_v40 }
0x372d   :  { %5727 = shalt.err (!%p5724_p12)
}
0x372e   :  { %s5728_s15 = scalar_lea.hbm %s6585_s3, 256 }
0x372f   :  { %p5729_p13 = scmp.ne.s32.totalorder %s6585_s3, %s5728_s15  ;;  %p5732_p0 = scmp.lt.u32.totalorder %s5728_s15, %s6585_s3 }
0x3731   :  { %p5734_p1 = pnand %p5732_p0, %p5729_p13 }
0x3733   :  { %5737 = shalt.err (!%p5734_p1)
}
0x3734   :  { %4652 = dma.vmem_to_hbm [thread:$0]  %s4647_s11, 256, %s6585_s3, [#allocation4], %s5743_s22, %s5743_s22, %s5744_s23  }
0x3735   :  { %5740 = dma.done.wait [#allocation4], 256  }
0x3736   :  { %5741 = vsyncadd [#allocation4], 4294967040 }
0x3737   :  { %4656 = vsyncpa [#allocation3], 1 }
0x3738   :  { %4657 = vsyncpa [#allocation4], 1 }

</bundles_post_ra>
